<compile_context>
chip_gen: v5e
topology: v5e:2x2
jax: 0.10.0
libtpu: 0.0.40
codegen_flags: <defaults>
</compile_context>

<pallas_src>
import functools

import jax
import jax.numpy as jnp
from jax.experimental import pallas as pl
from jax.experimental.pallas import tpu as pltpu


# ----------------------------- Pallas kernels -----------------------------


def _cv1_kernel(x_ref, w_ref, b_ref, a_ref, z_ref, *, half):
    """Fused 1x1 conv + folded BN + SiLU, split into the two chunk() halves."""
    y = jnp.dot(x_ref[...], w_ref[...], preferred_element_type=jnp.float32)
    y = y + b_ref[...]
    y = y * jax.nn.sigmoid(y)                       # SiLU in f32
    a_ref[...] = y[:, :half].astype(a_ref.dtype)
    z_ref[...] = y[:, half:].astype(z_ref.dtype)


def _cv2_kernel(a_ref, z_ref, wa_ref, wz_ref, b_ref, o_ref):
    """Fused concat([a, z]) -> 1x1 conv + BN + SiLU (concat folded into two
    matmuls via an input-channel split of the weight)."""
    y = jnp.dot(a_ref[...], wa_ref[...], preferred_element_type=jnp.float32)
    y = y + jnp.dot(z_ref[...], wz_ref[...], preferred_element_type=jnp.float32)
    y = y + b_ref[...]
    y = y * jax.nn.sigmoid(y)
    o_ref[...] = y.astype(o_ref.dtype)


def _psablock_kernel(z_ref, qkv_w_ref, qkv_b_ref, dw_w_ref, dw_b_ref,
                     out_w_ref, out_b_ref, f1_w_ref, f1_b_ref,
                     f2_w_ref, f2_b_ref, o_ref, attn_ref, vpad_ref,
                     *, num_head, dim_key, dim_head, W, pad_rows):
    """One full PSABlock for one batch element, entirely in VMEM."""
    HW, ch = z_ref.shape
    nh, dk, dh = num_head, dim_key, dim_head
    v_off = 2 * nh * dk

    z_bf = z_ref[...]                               # (HW, ch) bf16
    z = z_bf.astype(jnp.float32)

    # --- qkv projection (1x1 conv + folded BN); columns = [Q | K | V] -------
    qkv = jnp.dot(z_bf, qkv_w_ref[...], preferred_element_type=jnp.float32)
    qkv = qkv + qkv_b_ref[...]                      # (HW, 2*nh*dk + ch) f32
    qkv_bf = qkv.astype(jnp.bfloat16)               # single cast; sliced below

    # --- per-head attention (scale pre-folded into the q columns) -----------
    attn_out = None
    for h in range(nh):
        q = qkv_bf[:, h * dk:(h + 1) * dk]
        k = qkv_bf[:, nh * dk + h * dk: nh * dk + (h + 1) * dk]
        v = qkv_bf[:, v_off + h * dh: v_off + (h + 1) * dh]
        # s[i, j] = sum_d q[i, d] * k[j, d]  (contract last dims, no k.T)
        s = jax.lax.dot_general(
            q, k, dimension_numbers=(((1,), (1,)), ((), ())),
            preferred_element_type=jnp.float32)
        m = jnp.max(s, axis=-1, keepdims=True)
        p = jnp.exp(s - m)
        p = p * pl.reciprocal(jnp.sum(p, axis=-1, keepdims=True), approx=True)
        o_h = jnp.dot(p.astype(jnp.bfloat16), v,
                      preferred_element_type=jnp.float32)
        if nh == 1:
            attn_out = o_h
        else:
            attn_ref[:, h * dh:(h + 1) * dh] = o_h   # column slice of scratch
    if nh > 1:
        attn_out = attn_ref[...]

    # --- positional encoding: depthwise 3x3 conv (pad=1) on v ---------------
    # Zero-padded VMEM window: tap (dy, dx) is a static-offset read of the
    # padded slab; W-boundary wrap is removed with in-kernel iota masks.
    v_f32 = qkv[:, v_off:]                          # (HW, ch) f32, contiguous
    halo = W + 1
    vpad_ref[pl.ds(pad_rows - halo, halo), :] = jnp.zeros((halo, ch), jnp.float32)
    vpad_ref[pl.ds(pad_rows + HW, halo), :] = jnp.zeros((halo, ch), jnp.float32)
    vpad_ref[pl.ds(pad_rows, HW), :] = v_f32

    col = jax.lax.broadcasted_iota(jnp.int32, (HW, 1), 0) % W
    mask_l = (col >= 1).astype(jnp.float32)         # valid for dx = -1
    mask_r = (col <= W - 2).astype(jnp.float32)     # valid for dx = +1

    pe = v_f32 * dw_w_ref[4, :]                     # center tap (dy=0, dx=0)
    for dy in (-1, 0, 1):
        for dx in (-1, 0, 1):
            if dy == 0 and dx == 0:
                continue
            sft = dy * W + dx
            tap = vpad_ref[pl.ds(pad_rows + sft, HW), :]
            if dx == -1:
                tap = tap * mask_l
            elif dx == 1:
                tap = tap * mask_r
            pe = pe + tap * dw_w_ref[(dy + 1) * 3 + (dx + 1), :]
    pe = pe + dw_b_ref[...]

    # --- attention output projection (1x1 conv) + residual ------------------
    attn_in = (attn_out + pe).astype(jnp.bfloat16)
    z1 = z + jnp.dot(attn_in, out_w_ref[...],
                     preferred_element_type=jnp.float32) + out_b_ref[...]

    # --- FFN: 1x1 conv + SiLU -> 1x1 conv, + residual ------------------------
    h1 = jnp.dot(z1.astype(jnp.bfloat16), f1_w_ref[...],
                 preferred_element_type=jnp.float32) + f1_b_ref[...]
    h1 = h1 * jax.nn.sigmoid(h1)
    out = z1 + jnp.dot(h1.astype(jnp.bfloat16), f2_w_ref[...],
                       preferred_element_type=jnp.float32) + f2_b_ref[...]
    o_ref[...] = out.astype(o_ref.dtype)


# ------------------------------- wrappers ----------------------------------


def _row_tile(n):
    # Large fixed row tile (mem-bound roofline knee ~512 rows).  The grid uses
    # cdiv so a ragged last step is masked instead of shrinking the tile.
    t = min(512, n)
    return ((t + 7) // 8) * 8


def conv_cv1(x_flat, w, b, half):
    """cv1: 1x1 conv + BN + SiLU on (N, Cin); returns the two chunk halves."""
    N, Cin = x_flat.shape
    Cout = w.shape[1]
    tn = _row_tile(N)
    return pl.pallas_call(
        functools.partial(_cv1_kernel, half=half),
        out_shape=(jax.ShapeDtypeStruct((N, half), jnp.bfloat16),
                   jax.ShapeDtypeStruct((N, half), jnp.bfloat16)),
        grid=(pl.cdiv(N, tn),),
        in_specs=[
            pl.BlockSpec((tn, Cin), lambda i: (i, 0)),
            pl.BlockSpec((Cin, Cout), lambda i: (0, 0)),
            pl.BlockSpec((1, Cout), lambda i: (0, 0)),
        ],
        out_specs=(pl.BlockSpec((tn, half), lambda i: (i, 0)),
                   pl.BlockSpec((tn, half), lambda i: (i, 0))),
        compiler_params=pltpu.CompilerParams(dimension_semantics=("parallel",)),
    )(x_flat, w, b.reshape(1, Cout))


def conv_cv2(a_flat, z_flat, wa, wz, b):
    """cv2: concat([a, z]) -> 1x1 conv + BN + SiLU, concat folded in-kernel."""
    N, half = a_flat.shape
    Cout = wa.shape[1]
    tn = _row_tile(N)
    return pl.pallas_call(
        _cv2_kernel,
        out_shape=jax.ShapeDtypeStruct((N, Cout), jnp.float32),
        grid=(pl.cdiv(N, tn),),
        in_specs=[
            pl.BlockSpec((tn, half), lambda i: (i, 0)),
            pl.BlockSpec((tn, half), lambda i: (i, 0)),
            pl.BlockSpec((half, Cout), lambda i: (0, 0)),
            pl.BlockSpec((half, Cout), lambda i: (0, 0)),
            pl.BlockSpec((1, Cout), lambda i: (0, 0)),
        ],
        out_specs=pl.BlockSpec((tn, Cout), lambda i: (i, 0)),
        compiler_params=pltpu.CompilerParams(dimension_semantics=("parallel",)),
    )(a_flat, z_flat, wa, wz, b.reshape(1, Cout))


def psablock(z_flat, blk, B, H, W, num_head, dim_key, dim_head):
    HW = H * W
    ch = num_head * dim_head
    nqk = num_head * dim_key
    scale = float(dim_key) ** -0.5

    qkv_w, qkv_b = blk["qkv"]
    # Fold the attention scale into the q columns (params are jit constants,
    # so this is free at runtime) -> no (HW,HW)*scale VPU pass in the kernel.
    qkv_w = qkv_w.at[:, :nqk].multiply(scale)
    qkv_b = qkv_b.at[:nqk].multiply(scale)

    dw_w, dw_b = blk["dw"]
    out_w, out_b = blk["attn_out"]
    f1_w, f1_b = blk["ffn1"]
    f2_w, f2_b = blk["ffn2"]
    qkv_dim = qkv_w.shape[1]
    pad_rows = ((W + 1 + 7) // 8) * 8
    const = lambda b: (0, 0)
    kernel = functools.partial(
        _psablock_kernel, num_head=num_head, dim_key=dim_key,
        dim_head=dim_head, W=W, pad_rows=pad_rows)
    return pl.pallas_call(
        kernel,
        out_shape=jax.ShapeDtypeStruct((B * HW, ch), jnp.bfloat16),
        grid=(B,),
        in_specs=[
            pl.BlockSpec((HW, ch), lambda b: (b, 0)),      # z for batch b
            pl.BlockSpec((ch, qkv_dim), const),
            pl.BlockSpec((1, qkv_dim), const),
            pl.BlockSpec((9, ch), const),
            pl.BlockSpec((1, ch), const),
            pl.BlockSpec((ch, ch), const),
            pl.BlockSpec((1, ch), const),
            pl.BlockSpec((ch, 2 * ch), const),
            pl.BlockSpec((1, 2 * ch), const),
            pl.BlockSpec((2 * ch, ch), const),
            pl.BlockSpec((1, ch), const),
        ],
        out_specs=pl.BlockSpec((HW, ch), lambda b: (b, 0)),
        scratch_shapes=[
            pltpu.VMEM((HW, ch), jnp.float32),                 # head accum
            pltpu.VMEM((2 * pad_rows + HW, ch), jnp.float32),  # padded v window
        ],
        compiler_params=pltpu.CompilerParams(
            dimension_semantics=("parallel",),
            vmem_limit_bytes=48 * 1024 * 1024),
    )(z_flat, qkv_w, qkv_b.reshape(1, -1), dw_w, dw_b.reshape(1, -1),
      out_w, out_b.reshape(1, -1), f1_w, f1_b.reshape(1, -1),
      f2_w, f2_b.reshape(1, -1))


# ----------------------------- parameter init ------------------------------

_BN_EPS = 1e-3


def _bn_fold_factors(keys, cout):
    kg, kb, km, kv = keys
    gamma = 1.0 + 0.1 * jax.random.normal(kg, (cout,), jnp.float32)
    beta = 0.1 * jax.random.normal(kb, (cout,), jnp.float32)
    mean = 0.1 * jax.random.normal(km, (cout,), jnp.float32)
    var = 0.5 + jax.random.uniform(kv, (cout,), jnp.float32)
    scale = gamma / jnp.sqrt(var + _BN_EPS)
    bias = beta - mean * scale
    return scale, bias


def make_conv_params(key, cin, cout):
    """Conv2d(cin, cout, 1, bias=False) + BatchNorm2d(cout) folded (eval mode).
    Weight stored bf16 (MXU operand), bias kept f32."""
    kw, kg, kb, km, kv = jax.random.split(key, 5)
    w = jax.random.normal(kw, (cout, cin), jnp.float32) * (1.0 / jnp.sqrt(cin))
    scale, bias = _bn_fold_factors((kg, kb, km, kv), cout)
    w_folded = (w * scale[:, None]).T                      # (cin, cout)
    return w_folded.astype(jnp.bfloat16), bias


def make_dwconv_params(key, ch):
    """Conv2d(ch, ch, 3, p=1, groups=ch, bias=False) + BN folded -> ((9,ch), b)."""
    kw, kg, kb, km, kv = jax.random.split(key, 5)
    w = jax.random.normal(kw, (ch, 3, 3), jnp.float32) * (1.0 / 3.0)
    scale, bias = _bn_fold_factors((kg, kb, km, kv), ch)
    w_folded = w * scale[:, None, None]                    # (ch, 3, 3)
    w9c = jnp.transpose(w_folded, (1, 2, 0)).reshape(9, ch)
    return w9c, bias


def init_psa_params(key, ch, n):
    assert ch % 128 == 0, "PSA uses num_head = ch // 128; need ch >= 128"
    half = ch // 2
    num_head = ch // 128
    dim_head = half // num_head
    dim_key = dim_head // 2
    keys = jax.random.split(key, 2 + n)
    cv2_w, cv2_b = make_conv_params(keys[1], 2 * half, ch)
    params = {
        "cv1": make_conv_params(keys[0], ch, 2 * half),
        # cv2 weight pre-split by input-channel halves (concat folded in-kernel)
        "cv2": (cv2_w[:half], cv2_w[half:], cv2_b),
        "blocks": [],
        "num_head": num_head,
        "dim_head": dim_head,
        "dim_key": dim_key,
    }
    for i in range(n):
        bk = jax.random.split(keys[2 + i], 5)
        params["blocks"].append({
            # qkv columns interpreted as [Q | K | V], each head-major (an
            # equivalent reparameterization of PyTorch's per-head interleave).
            "qkv": make_conv_params(bk[0], half, half + dim_key * num_head * 2),
            "dw": make_dwconv_params(bk[1], half),
            "attn_out": make_conv_params(bk[2], half, half),
            "ffn1": make_conv_params(bk[3], half, half * 2),
            "ffn2": make_conv_params(bk[4], half * 2, half),
        })
    return params


# ------------------------------- forward ----------------------------------


def psa_forward(x_nchw, params):
    B, C, H, W = x_nchw.shape
    half = C // 2
    HW = H * W
    # NCHW -> channel-last flat; cast to bf16 during the interface transpose.
    x = jnp.transpose(x_nchw, (0, 2, 3, 1)).reshape(B * HW, C).astype(jnp.bfloat16)

    w1, b1 = params["cv1"]
    a, z = conv_cv1(x, w1, b1, half)          # bf16 (B*HW, half) each

    for blk in params["blocks"]:
        z = psablock(z, blk, B, H, W, params["num_head"], params["dim_key"],
                     params["dim_head"])

    wa, wz, b2 = params["cv2"]
    out = conv_cv2(a, z, wa, wz, b2)          # f32 (B*HW, C)
    return out.reshape(B, H, W, C).transpose(0, 3, 1, 2)


# ------------------------- pure-JAX f32 reference --------------------------


def psa_reference(x_nchw, params):
    """Pure-jnp f32 reference with the PyTorch module's math (for parity)."""
    B, C, H, W = x_nchw.shape
    half = C // 2
    HW = H * W
    nh, dk, dh = params["num_head"], params["dim_key"], params["dim_head"]
    scale = dk ** -0.5
    f32 = jnp.float32
    silu = lambda v: v * jax.nn.sigmoid(v)

    x = jnp.transpose(x_nchw, (0, 2, 3, 1)).reshape(B * HW, C).astype(f32)
    w1, b1 = params["cv1"]
    y = silu(x @ w1.astype(f32) + b1)
    a, z = y[:, :half], y[:, half:]

    for blk in params["blocks"]:
        qkv_w, qkv_b = blk["qkv"]
        dw_w, dw_b = blk["dw"]
        out_w, out_b = blk["attn_out"]
        f1_w, f1_b = blk["ffn1"]
        f2_w, f2_b = blk["ffn2"]
        qkv = (z @ qkv_w.astype(f32) + qkv_b).reshape(B, HW, -1)
        q = qkv[..., :nh * dk].reshape(B, HW, nh, dk)
        k = qkv[..., nh * dk:2 * nh * dk].reshape(B, HW, nh, dk)
        v = qkv[..., 2 * nh * dk:].reshape(B, HW, nh, dh)
        s = jnp.einsum("bqhd,bkhd->bhqk", q, k) * scale
        p = jax.nn.softmax(s, axis=-1)
        attn = jnp.einsum("bhqk,bkhd->bqhd", p, v).reshape(B, HW, half)
        vimg = v.reshape(B, H, W, half)
        vp = jnp.pad(vimg, ((0, 0), (1, 1), (1, 1), (0, 0)))
        pe = jnp.zeros((B, H, W, half), f32) + dw_b
        for dy in (-1, 0, 1):
            for dx in (-1, 0, 1):
                pe = pe + (vp[:, 1 + dy:1 + dy + H, 1 + dx:1 + dx + W, :]
                           * dw_w[(dy + 1) * 3 + (dx + 1)])
        pe = pe.reshape(B, HW, half)
        zb = z.reshape(B, HW, half)
        z1 = zb + (attn + pe) @ out_w.astype(f32) + out_b
        h1 = silu(z1 @ f1_w.astype(f32) + f1_b)
        zb = z1 + h1 @ f2_w.astype(f32) + f2_b
        z = zb.reshape(B * HW, half)

    wa, wz, b2 = params["cv2"]
    out = silu(a @ wa.astype(f32) + z @ wz.astype(f32) + b2)
    return out.reshape(B, H, W, C).transpose(0, 3, 1, 2)


# --------------------------------- main ------------------------------------

if __name__ == "__main__":
    B, C, H, W = 2, 128, 8, 8   # ch must be >= 128 so num_head = ch // 128 >= 1
    n = 2

    key = jax.random.PRNGKey(0)
    kx, kp = jax.random.split(key)
    x = jax.random.normal(kx, (B, C, H, W), jnp.float32)
    params = init_psa_params(kp, C, n)

    fwd = jax.jit(lambda inp: psa_forward(inp, params))
    out = jax.block_until_ready(fwd(x))
    assert out.shape == (B, C, H, W), out.shape
    assert bool(jnp.all(jnp.isfinite(out)))

    # Parity vs a pure-JAX f32 reference (bf16 operands + approx reciprocal in
    # the kernel path, hence the loose tolerance).
    ref = psa_reference(x, params)
    err = float(jnp.max(jnp.abs(out - ref) / (1.0 + jnp.abs(ref))))
    assert err < 0.15, f"mismatch vs f32 reference: max normalized err {err:.4f}"

    print("KERNEL_OK")
</pallas_src>

<mosaic_0001>
module attributes {stable_mosaic.version = 11 : i64} {
  func.func @_cv1_kernel(%arg0: i32, %arg1: memref<128x128xbf16, #tpu.memory_space<vmem>>, %arg2: memref<128x128xbf16, #tpu.memory_space<vmem>>, %arg3: memref<1x128xf32, #tpu.memory_space<vmem>>, %arg4: memref<128x64xbf16, #tpu.memory_space<vmem>>, %arg5: memref<128x64xbf16, #tpu.memory_space<vmem>>) attributes {dimension_semantics = [#tpu.dimension_semantics<parallel>], iteration_bounds = array<i64: 1>, scalar_prefetch = 0 : i64, scratch_operands = 0 : i64, tpu.core_type = #tpu.core_type<tc>, window_params = [{transform_indices = @transform_0, window_bounds = array<i64: 128, 128>}, {pipeline_mode = #tpu.pipeline_mode<synchronous>, transform_indices = @transform_1, window_bounds = array<i64: 128, 128>}, {pipeline_mode = #tpu.pipeline_mode<synchronous>, transform_indices = @transform_2, window_bounds = array<i64: 1, 128>}, {transform_indices = @transform_3, window_bounds = array<i64: 128, 64>}, {transform_indices = @transform_4, window_bounds = array<i64: 128, 64>}]} {
    %c0 = arith.constant 0 : index
    %c0_0 = arith.constant 0 : index
    %0 = vector.load %arg1[%c0, %c0_0] : memref<128x128xbf16, #tpu.memory_space<vmem>>, vector<128x128xbf16>
    %c0_1 = arith.constant 0 : index
    %c0_2 = arith.constant 0 : index
    %1 = vector.load %arg2[%c0_1, %c0_2] : memref<128x128xbf16, #tpu.memory_space<vmem>>, vector<128x128xbf16>
    %cst = arith.constant dense<0.000000e+00> : vector<128x128xf32>
    %2 = tpu.matmul %0, %1, %cst {dimension_numbers = #tpu.dot_dimension_numbers<[1], [0], [0], [1], [0, 0, 1, 1], [], []>} : vector<128x128xbf16>, vector<128x128xbf16>, vector<128x128xf32> -> vector<128x128xf32>
    %c0_3 = arith.constant 0 : index
    %c0_4 = arith.constant 0 : index
    %3 = vector.load %arg3[%c0_3, %c0_4] : memref<1x128xf32, #tpu.memory_space<vmem>>, vector<1x128xf32>
    %4 = vector.broadcast %3 : vector<1x128xf32> to vector<128x128xf32>
    %5 = arith.addf %2, %4 : vector<128x128xf32>
    %6 = arith.negf %5 : vector<128x128xf32>
    %7 = math.exp %6 : vector<128x128xf32>
    %cst_5 = arith.constant 1.000000e+00 : f32
    %8 = vector.broadcast %cst_5 : f32 to vector<128x128xf32>
    %9 = arith.addf %8, %7 : vector<128x128xf32>
    %10 = arith.divf %8, %9 : vector<128x128xf32>
    %11 = arith.mulf %5, %10 : vector<128x128xf32>
    %12 = vector.extract_strided_slice %11 {offsets = [0, 0], sizes = [128, 64], strides = [1, 1]} : vector<128x128xf32> to vector<128x64xf32>
    %13 = arith.truncf %12 : vector<128x64xf32> to vector<128x64xbf16>
    %c0_6 = arith.constant 0 : index
    %c0_7 = arith.constant 0 : index
    %14 = vector.load %arg4[%c0_6, %c0_7] : memref<128x64xbf16, #tpu.memory_space<vmem>>, vector<128x64xbf16>
    tpu.vector_store %arg4[%c0_6, %c0_7], %13 {strides = array<i32>} : memref<128x64xbf16, #tpu.memory_space<vmem>>, vector<128x64xbf16>,
    %15 = vector.extract_strided_slice %11 {offsets = [0, 64], sizes = [128, 64], strides = [1, 1]} : vector<128x128xf32> to vector<128x64xf32>
    %16 = arith.truncf %15 : vector<128x64xf32> to vector<128x64xbf16>
    %c0_8 = arith.constant 0 : index
    %c0_9 = arith.constant 0 : index
    %17 = vector.load %arg5[%c0_8, %c0_9] : memref<128x64xbf16, #tpu.memory_space<vmem>>, vector<128x64xbf16>
    tpu.vector_store %arg5[%c0_8, %c0_9], %16 {strides = array<i32>} : memref<128x64xbf16, #tpu.memory_space<vmem>>, vector<128x64xbf16>,
    return
  }
  func.func @transform_0(%arg0: i32) -> (i32, i32) {
    %c0_i32 = arith.constant 0 : i32
    %c0_i32_0 = arith.constant 0 : i32
    return %arg0, %c0_i32 : i32, i32
  }
  func.func @transform_1(%arg0: i32) -> (i32, i32) {
    %c0_i32 = arith.constant 0 : i32
    %c0_i32_0 = arith.constant 0 : i32
    %c0_i32_1 = arith.constant 0 : i32
    return %c0_i32, %c0_i32_0 : i32, i32
  }
  func.func @transform_2(%arg0: i32) -> (i32, i32) {
    %c0_i32 = arith.constant 0 : i32
    %c0_i32_0 = arith.constant 0 : i32
    %c0_i32_1 = arith.constant 0 : i32
    return %c0_i32, %c0_i32_0 : i32, i32
  }
  func.func @transform_3(%arg0: i32) -> (i32, i32) {
    %c0_i32 = arith.constant 0 : i32
    %c0_i32_0 = arith.constant 0 : i32
    return %arg0, %c0_i32 : i32, i32
  }
  func.func @transform_4(%arg0: i32) -> (i32, i32) {
    %c0_i32 = arith.constant 0 : i32
    %c0_i32_0 = arith.constant 0 : i32
    return %arg0, %c0_i32 : i32, i32
  }
}

module attributes {stable_mosaic.version = 11 : i64} {
  func.func @_psablock_kernel(%arg0: i32, %arg1: memref<64x64xbf16, #tpu.memory_space<vmem>>, %arg2: memref<64x128xbf16, #tpu.memory_space<vmem>>, %arg3: memref<1x128xf32, #tpu.memory_space<vmem>>, %arg4: memref<9x64xf32, #tpu.memory_space<vmem>>, %arg5: memref<1x64xf32, #tpu.memory_space<vmem>>, %arg6: memref<64x64xbf16, #tpu.memory_space<vmem>>, %arg7: memref<1x64xf32, #tpu.memory_space<vmem>>, %arg8: memref<64x128xbf16, #tpu.memory_space<vmem>>, %arg9: memref<1x128xf32, #tpu.memory_space<vmem>>, %arg10: memref<128x64xbf16, #tpu.memory_space<vmem>>, %arg11: memref<1x64xf32, #tpu.memory_space<vmem>>, %arg12: memref<64x64xbf16, #tpu.memory_space<vmem>>, %arg13: memref<64x64xf32, #tpu.memory_space<vmem>>, %arg14: memref<96x64xf32, #tpu.memory_space<vmem>>) attributes {dimension_semantics = [#tpu.dimension_semantics<parallel>], iteration_bounds = array<i64: 2>, scalar_prefetch = 0 : i64, scratch_operands = 2 : i64, tpu.core_type = #tpu.core_type<tc>, window_params = [{transform_indices = @transform_0, window_bounds = array<i64: 64, 64>}, {pipeline_mode = #tpu.pipeline_mode<synchronous>, transform_indices = @transform_1, window_bounds = array<i64: 64, 128>}, {pipeline_mode = #tpu.pipeline_mode<synchronous>, transform_indices = @transform_2, window_bounds = array<i64: 1, 128>}, {pipeline_mode = #tpu.pipeline_mode<synchronous>, transform_indices = @transform_3, window_bounds = array<i64: 9, 64>}, {pipeline_mode = #tpu.pipeline_mode<synchronous>, transform_indices = @transform_4, window_bounds = array<i64: 1, 64>}, {pipeline_mode = #tpu.pipeline_mode<synchronous>, transform_indices = @transform_5, window_bounds = array<i64: 64, 64>}, {pipeline_mode = #tpu.pipeline_mode<synchronous>, transform_indices = @transform_6, window_bounds = array<i64: 1, 64>}, {pipeline_mode = #tpu.pipeline_mode<synchronous>, transform_indices = @transform_7, window_bounds = array<i64: 64, 128>}, {pipeline_mode = #tpu.pipeline_mode<synchronous>, transform_indices = @transform_8, window_bounds = array<i64: 1, 128>}, {pipeline_mode = #tpu.pipeline_mode<synchronous>, transform_indices = @transform_9, window_bounds = array<i64: 128, 64>}, {pipeline_mode = #tpu.pipeline_mode<synchronous>, transform_indices = @transform_10, window_bounds = array<i64: 1, 64>}, {transform_indices = @transform_11, window_bounds = array<i64: 64, 64>}]} {
    %c0 = arith.constant 0 : index
    %c0_0 = arith.constant 0 : index
    %0 = vector.load %arg1[%c0, %c0_0] : memref<64x64xbf16, #tpu.memory_space<vmem>>, vector<64x64xbf16>
    %1 = arith.extf %0 : vector<64x64xbf16> to vector<64x64xf32>
    %c0_1 = arith.constant 0 : index
    %c0_2 = arith.constant 0 : index
    %2 = vector.load %arg2[%c0_1, %c0_2] : memref<64x128xbf16, #tpu.memory_space<vmem>>, vector<64x128xbf16>
    %cst = arith.constant dense<0.000000e+00> : vector<64x128xf32>
    %3 = tpu.matmul %0, %2, %cst {dimension_numbers = #tpu.dot_dimension_numbers<[1], [0], [0], [1], [0, 0, 1, 1], [], []>} : vector<64x64xbf16>, vector<64x128xbf16>, vector<64x128xf32> -> vector<64x128xf32>
    %c0_3 = arith.constant 0 : index
    %c0_4 = arith.constant 0 : index
    %4 = vector.load %arg3[%c0_3, %c0_4] : memref<1x128xf32, #tpu.memory_space<vmem>>, vector<1x128xf32>
    %5 = vector.broadcast %4 : vector<1x128xf32> to vector<64x128xf32>
    %6 = arith.addf %3, %5 : vector<64x128xf32>
    %7 = arith.truncf %6 : vector<64x128xf32> to vector<64x128xbf16>
    %8 = vector.extract_strided_slice %7 {offsets = [0, 0], sizes = [64, 32], strides = [1, 1]} : vector<64x128xbf16> to vector<64x32xbf16>
    %9 = vector.extract_strided_slice %7 {offsets = [0, 32], sizes = [64, 32], strides = [1, 1]} : vector<64x128xbf16> to vector<64x32xbf16>
    %10 = vector.extract_strided_slice %7 {offsets = [0, 64], sizes = [64, 64], strides = [1, 1]} : vector<64x128xbf16> to vector<64x64xbf16>
    %cst_5 = arith.constant dense<0.000000e+00> : vector<64x64xf32>
    %11 = tpu.matmul %8, %9, %cst_5 {dimension_numbers = #tpu.dot_dimension_numbers<[1], [1], [0], [0], [0, 0, 1, 0], [], []>} : vector<64x32xbf16>, vector<64x32xbf16>, vector<64x64xf32> -> vector<64x64xf32>
    %cst_6 = arith.constant dense<0xFF800000> : vector<64xf32>
    %12 = vector.multi_reduction <maximumf>, %11, %cst_6 [1] : vector<64x64xf32> to vector<64xf32>
    %13 = vector.shape_cast %12 : vector<64xf32> to vector<64x1xf32>
    %14 = vector.broadcast %13 : vector<64x1xf32> to vector<64x64xf32>
    %15 = arith.subf %11, %14 : vector<64x64xf32>
    %16 = math.exp %15 : vector<64x64xf32>
    %cst_7 = arith.constant dense<0.000000e+00> : vector<64xf32>
    %17 = vector.multi_reduction <add>, %16, %cst_7 [1] : vector<64x64xf32> to vector<64xf32>
    %18 = vector.shape_cast %17 : vector<64xf32> to vector<64x1xf32>
    %19 = tpu.reciprocal %18 {approx = true} : vector<64x1xf32> -> vector<64x1xf32>
    %20 = vector.broadcast %19 : vector<64x1xf32> to vector<64x64xf32>
    %21 = arith.mulf %16, %20 : vector<64x64xf32>
    %22 = arith.truncf %21 : vector<64x64xf32> to vector<64x64xbf16>
    %cst_8 = arith.constant dense<0.000000e+00> : vector<64x64xf32>
    %23 = tpu.matmul %22, %10, %cst_8 {dimension_numbers = #tpu.dot_dimension_numbers<[1], [0], [0], [1], [0, 0, 1, 1], [], []>} : vector<64x64xbf16>, vector<64x64xbf16>, vector<64x64xf32> -> vector<64x64xf32>
    %24 = vector.extract_strided_slice %6 {offsets = [0, 64], sizes = [64, 64], strides = [1, 1]} : vector<64x128xf32> to vector<64x64xf32>
    %cst_9 = arith.constant 0.000000e+00 : f32
    %25 = vector.broadcast %cst_9 : f32 to vector<9x64xf32>
    %c7 = arith.constant 7 : index
    %c0_10 = arith.constant 0 : index
    %26 = vector.load %arg14[%c7, %c0_10] : memref<96x64xf32, #tpu.memory_space<vmem>>, vector<9x64xf32>
    tpu.vector_store %arg14[%c7, %c0_10], %25 {strides = array<i32>} : memref<96x64xf32, #tpu.memory_space<vmem>>, vector<9x64xf32>,
    %cst_11 = arith.constant 0.000000e+00 : f32
    %27 = vector.broadcast %cst_11 : f32 to vector<9x64xf32>
    %c80 = arith.constant 80 : index
    %c0_12 = arith.constant 0 : index
    %28 = vector.load %arg14[%c80, %c0_12] : memref<96x64xf32, #tpu.memory_space<vmem>>, vector<9x64xf32>
    tpu.vector_store %arg14[%c80, %c0_12], %27 {strides = array<i32>} : memref<96x64xf32, #tpu.memory_space<vmem>>, vector<9x64xf32>,
    %c16 = arith.constant 16 : index
    %c0_13 = arith.constant 0 : index
    %29 = vector.load %arg14[%c16, %c0_13] : memref<96x64xf32, #tpu.memory_space<vmem>>, vector<64x64xf32>
    tpu.vector_store %arg14[%c16, %c0_13], %24 {strides = array<i32>} : memref<96x64xf32, #tpu.memory_space<vmem>>, vector<64x64xf32>,
    %30 = tpu.iota {dimensions = array<i32: 0>} : vector<64x1xi32>
    %c8_i32 = arith.constant 8 : i32
    %c0_i32 = arith.constant 0 : i32
    %31 = arith.cmpi eq, %c8_i32, %c0_i32 : i32
    %c1_i32 = arith.constant 1 : i32
    %32 = arith.select %31, %c1_i32, %c8_i32 : i32
    %33 = vector.broadcast %32 : i32 to vector<64x1xi32>
    %34 = arith.remsi %30, %33 : vector<64x1xi32>
    %c0_i32_14 = arith.constant 0 : i32
    %35 = vector.broadcast %c0_i32_14 : i32 to vector<64x1xi32>
    %36 = arith.cmpi ne, %34, %35 : vector<64x1xi32>
    %c0_i32_15 = arith.constant 0 : i32
    %37 = vector.broadcast %c0_i32_15 : i32 to vector<64x1xi32>
    %38 = arith.cmpi slt, %34, %37 : vector<64x1xi32>
    %c0_i32_16 = arith.constant 0 : i32
    %39 = arith.cmpi slt, %32, %c0_i32_16 : i32
    %40 = vector.broadcast %39 : i1 to vector<64x1xi1>
    %41 = vector.broadcast %40 : vector<64x1xi1> to vector<64x1xi1>
    %42 = arith.xori %38, %41 : vector<64x1xi1>
    %43 = arith.andi %42, %36 : vector<64x1xi1>
    %44 = vector.broadcast %32 : i32 to vector<64x1xi32>
    %45 = arith.addi %34, %44 : vector<64x1xi32>
    %46 = arith.select %43, %45, %34 : vector<64x1xi1>, vector<64x1xi32>
    %c1_i32_17 = arith.constant 1 : i32
    %47 = vector.broadcast %c1_i32_17 : i32 to vector<64x1xi32>
    %48 = arith.cmpi sge, %46, %47 : vector<64x1xi32>
    %49 = arith.extui %48 : vector<64x1xi1> to vector<64x1xi32>
    %50 = arith.sitofp %49 : vector<64x1xi32> to vector<64x1xf32>
    %c6_i32 = arith.constant 6 : i32
    %51 = vector.broadcast %c6_i32 : i32 to vector<64x1xi32>
    %52 = arith.cmpi sle, %46, %51 : vector<64x1xi32>
    %53 = arith.extui %52 : vector<64x1xi1> to vector<64x1xi32>
    %54 = arith.sitofp %53 : vector<64x1xi32> to vector<64x1xf32>
    %c4 = arith.constant 4 : index
    %c0_18 = arith.constant 0 : index
    %55 = vector.load %arg4[%c4, %c0_18] : memref<9x64xf32, #tpu.memory_space<vmem>>, vector<1x64xf32>
    %56 = vector.shape_cast %55 : vector<1x64xf32> to vector<64xf32>
    %57 = vector.shape_cast %56 : vector<64xf32> to vector<1x64xf32>
    %58 = vector.broadcast %57 : vector<1x64xf32> to vector<64x64xf32>
    %59 = arith.mulf %24, %58 : vector<64x64xf32>
    %c7_19 = arith.constant 7 : index
    %c0_20 = arith.constant 0 : index
    %60 = vector.load %arg14[%c7_19, %c0_20] : memref<96x64xf32, #tpu.memory_space<vmem>>, vector<64x64xf32>
    %61 = vector.broadcast %50 : vector<64x1xf32> to vector<64x64xf32>
    %62 = arith.mulf %60, %61 : vector<64x64xf32>
    %c0_21 = arith.constant 0 : index
    %c0_22 = arith.constant 0 : index
    %63 = vector.load %arg4[%c0_21, %c0_22] : memref<9x64xf32, #tpu.memory_space<vmem>>, vector<1x64xf32>
    %64 = vector.shape_cast %63 : vector<1x64xf32> to vector<64xf32>
    %65 = vector.shape_cast %64 : vector<64xf32> to vector<1x64xf32>
    %66 = vector.broadcast %65 : vector<1x64xf32> to vector<64x64xf32>
    %67 = arith.mulf %62, %66 : vector<64x64xf32>
    %68 = arith.addf %59, %67 : vector<64x64xf32>
    %c8 = arith.constant 8 : index
    %c0_23 = arith.constant 0 : index
    %69 = vector.load %arg14[%c8, %c0_23] : memref<96x64xf32, #tpu.memory_space<vmem>>, vector<64x64xf32>
    %c1 = arith.constant 1 : index
    %c0_24 = arith.constant 0 : index
    %70 = vector.load %arg4[%c1, %c0_24] : memref<9x64xf32, #tpu.memory_space<vmem>>, vector<1x64xf32>
    %71 = vector.shape_cast %70 : vector<1x64xf32> to vector<64xf32>
    %72 = vector.shape_cast %71 : vector<64xf32> to vector<1x64xf32>
    %73 = vector.broadcast %72 : vector<1x64xf32> to vector<64x64xf32>
    %74 = arith.mulf %69, %73 : vector<64x64xf32>
    %75 = arith.addf %68, %74 : vector<64x64xf32>
    %c9 = arith.constant 9 : index
    %c0_25 = arith.constant 0 : index
    %76 = vector.load %arg14[%c9, %c0_25] : memref<96x64xf32, #tpu.memory_space<vmem>>, vector<64x64xf32>
    %77 = vector.broadcast %54 : vector<64x1xf32> to vector<64x64xf32>
    %78 = arith.mulf %76, %77 : vector<64x64xf32>
    %c2 = arith.constant 2 : index
    %c0_26 = arith.constant 0 : index
    %79 = vector.load %arg4[%c2, %c0_26] : memref<9x64xf32, #tpu.memory_space<vmem>>, vector<1x64xf32>
    %80 = vector.shape_cast %79 : vector<1x64xf32> to vector<64xf32>
    %81 = vector.shape_cast %80 : vector<64xf32> to vector<1x64xf32>
    %82 = vector.broadcast %81 : vector<1x64xf32> to vector<64x64xf32>
    %83 = arith.mulf %78, %82 : vector<64x64xf32>
    %84 = arith.addf %75, %83 : vector<64x64xf32>
    %c15 = arith.constant 15 : index
    %c0_27 = arith.constant 0 : index
    %85 = vector.load %arg14[%c15, %c0_27] : memref<96x64xf32, #tpu.memory_space<vmem>>, vector<64x64xf32>
    %86 = vector.broadcast %50 : vector<64x1xf32> to vector<64x64xf32>
    %87 = arith.mulf %85, %86 : vector<64x64xf32>
    %c3 = arith.constant 3 : index
    %c0_28 = arith.constant 0 : index
    %88 = vector.load %arg4[%c3, %c0_28] : memref<9x64xf32, #tpu.memory_space<vmem>>, vector<1x64xf32>
    %89 = vector.shape_cast %88 : vector<1x64xf32> to vector<64xf32>
    %90 = vector.shape_cast %89 : vector<64xf32> to vector<1x64xf32>
    %91 = vector.broadcast %90 : vector<1x64xf32> to vector<64x64xf32>
    %92 = arith.mulf %87, %91 : vector<64x64xf32>
    %93 = arith.addf %84, %92 : vector<64x64xf32>
    %c17 = arith.constant 17 : index
    %c0_29 = arith.constant 0 : index
    %94 = vector.load %arg14[%c17, %c0_29] : memref<96x64xf32, #tpu.memory_space<vmem>>, vector<64x64xf32>
    %95 = vector.broadcast %54 : vector<64x1xf32> to vector<64x64xf32>
    %96 = arith.mulf %94, %95 : vector<64x64xf32>
    %c5 = arith.constant 5 : index
    %c0_30 = arith.constant 0 : index
    %97 = vector.load %arg4[%c5, %c0_30] : memref<9x64xf32, #tpu.memory_space<vmem>>, vector<1x64xf32>
    %98 = vector.shape_cast %97 : vector<1x64xf32> to vector<64xf32>
    %99 = vector.shape_cast %98 : vector<64xf32> to vector<1x64xf32>
    %100 = vector.broadcast %99 : vector<1x64xf32> to vector<64x64xf32>
    %101 = arith.mulf %96, %100 : vector<64x64xf32>
    %102 = arith.addf %93, %101 : vector<64x64xf32>
    %c23 = arith.constant 23 : index
    %c0_31 = arith.constant 0 : index
    %103 = vector.load %arg14[%c23, %c0_31] : memref<96x64xf32, #tpu.memory_space<vmem>>, vector<64x64xf32>
    %104 = vector.broadcast %50 : vector<64x1xf32> to vector<64x64xf32>
    %105 = arith.mulf %103, %104 : vector<64x64xf32>
    %c6 = arith.constant 6 : index
    %c0_32 = arith.constant 0 : index
    %106 = vector.load %arg4[%c6, %c0_32] : memref<9x64xf32, #tpu.memory_space<vmem>>, vector<1x64xf32>
    %107 = vector.shape_cast %106 : vector<1x64xf32> to vector<64xf32>
    %108 = vector.shape_cast %107 : vector<64xf32> to vector<1x64xf32>
    %109 = vector.broadcast %108 : vector<1x64xf32> to vector<64x64xf32>
    %110 = arith.mulf %105, %109 : vector<64x64xf32>
    %111 = arith.addf %102, %110 : vector<64x64xf32>
    %c24 = arith.constant 24 : index
    %c0_33 = arith.constant 0 : index
    %112 = vector.load %arg14[%c24, %c0_33] : memref<96x64xf32, #tpu.memory_space<vmem>>, vector<64x64xf32>
    %c7_34 = arith.constant 7 : index
    %c0_35 = arith.constant 0 : index
    %113 = vector.load %arg4[%c7_34, %c0_35] : memref<9x64xf32, #tpu.memory_space<vmem>>, vector<1x64xf32>
    %114 = vector.shape_cast %113 : vector<1x64xf32> to vector<64xf32>
    %115 = vector.shape_cast %114 : vector<64xf32> to vector<1x64xf32>
    %116 = vector.broadcast %115 : vector<1x64xf32> to vector<64x64xf32>
    %117 = arith.mulf %112, %116 : vector<64x64xf32>
    %118 = arith.addf %111, %117 : vector<64x64xf32>
    %c25 = arith.constant 25 : index
    %c0_36 = arith.constant 0 : index
    %119 = vector.load %arg14[%c25, %c0_36] : memref<96x64xf32, #tpu.memory_space<vmem>>, vector<64x64xf32>
    %120 = vector.broadcast %54 : vector<64x1xf32> to vector<64x64xf32>
    %121 = arith.mulf %119, %120 : vector<64x64xf32>
    %c8_37 = arith.constant 8 : index
    %c0_38 = arith.constant 0 : index
    %122 = vector.load %arg4[%c8_37, %c0_38] : memref<9x64xf32, #tpu.memory_space<vmem>>, vector<1x64xf32>
    %123 = vector.shape_cast %122 : vector<1x64xf32> to vector<64xf32>
    %124 = vector.shape_cast %123 : vector<64xf32> to vector<1x64xf32>
    %125 = vector.broadcast %124 : vector<1x64xf32> to vector<64x64xf32>
    %126 = arith.mulf %121, %125 : vector<64x64xf32>
    %127 = arith.addf %118, %126 : vector<64x64xf32>
    %c0_39 = arith.constant 0 : index
    %c0_40 = arith.constant 0 : index
    %128 = vector.load %arg5[%c0_39, %c0_40] : memref<1x64xf32, #tpu.memory_space<vmem>>, vector<1x64xf32>
    %129 = vector.broadcast %128 : vector<1x64xf32> to vector<64x64xf32>
    %130 = arith.addf %127, %129 : vector<64x64xf32>
    %131 = arith.addf %23, %130 : vector<64x64xf32>
    %132 = arith.truncf %131 : vector<64x64xf32> to vector<64x64xbf16>
    %c0_41 = arith.constant 0 : index
    %c0_42 = arith.constant 0 : index
    %133 = vector.load %arg6[%c0_41, %c0_42] : memref<64x64xbf16, #tpu.memory_space<vmem>>, vector<64x64xbf16>
    %cst_43 = arith.constant dense<0.000000e+00> : vector<64x64xf32>
    %134 = tpu.matmul %132, %133, %cst_43 {dimension_numbers = #tpu.dot_dimension_numbers<[1], [0], [0], [1], [0, 0, 1, 1], [], []>} : vector<64x64xbf16>, vector<64x64xbf16>, vector<64x64xf32> -> vector<64x64xf32>
    %135 = arith.addf %1, %134 : vector<64x64xf32>
    %c0_44 = arith.constant 0 : index
    %c0_45 = arith.constant 0 : index
    %136 = vector.load %arg7[%c0_44, %c0_45] : memref<1x64xf32, #tpu.memory_space<vmem>>, vector<1x64xf32>
    %137 = vector.broadcast %136 : vector<1x64xf32> to vector<64x64xf32>
    %138 = arith.addf %135, %137 : vector<64x64xf32>
    %139 = arith.truncf %138 : vector<64x64xf32> to vector<64x64xbf16>
    %c0_46 = arith.constant 0 : index
    %c0_47 = arith.constant 0 : index
    %140 = vector.load %arg8[%c0_46, %c0_47] : memref<64x128xbf16, #tpu.memory_space<vmem>>, vector<64x128xbf16>
    %cst_48 = arith.constant dense<0.000000e+00> : vector<64x128xf32>
    %141 = tpu.matmul %139, %140, %cst_48 {dimension_numbers = #tpu.dot_dimension_numbers<[1], [0], [0], [1], [0, 0, 1, 1], [], []>} : vector<64x64xbf16>, vector<64x128xbf16>, vector<64x128xf32> -> vector<64x128xf32>
    %c0_49 = arith.constant 0 : index
    %c0_50 = arith.constant 0 : index
    %142 = vector.load %arg9[%c0_49, %c0_50] : memref<1x128xf32, #tpu.memory_space<vmem>>, vector<1x128xf32>
    %143 = vector.broadcast %142 : vector<1x128xf32> to vector<64x128xf32>
    %144 = arith.addf %141, %143 : vector<64x128xf32>
    %145 = arith.negf %144 : vector<64x128xf32>
    %146 = math.exp %145 : vector<64x128xf32>
    %cst_51 = arith.constant 1.000000e+00 : f32
    %147 = vector.broadcast %cst_51 : f32 to vector<64x128xf32>
    %148 = arith.addf %147, %146 : vector<64x128xf32>
    %149 = arith.divf %147, %148 : vector<64x128xf32>
    %150 = arith.mulf %144, %149 : vector<64x128xf32>
    %151 = arith.truncf %150 : vector<64x128xf32> to vector<64x128xbf16>
    %c0_52 = arith.constant 0 : index
    %c0_53 = arith.constant 0 : index
    %152 = vector.load %arg10[%c0_52, %c0_53] : memref<128x64xbf16, #tpu.memory_space<vmem>>, vector<128x64xbf16>
    %cst_54 = arith.constant dense<0.000000e+00> : vector<64x64xf32>
    %153 = tpu.matmul %151, %152, %cst_54 {dimension_numbers = #tpu.dot_dimension_numbers<[1], [0], [0], [1], [0, 0, 1, 1], [], []>} : vector<64x128xbf16>, vector<128x64xbf16>, vector<64x64xf32> -> vector<64x64xf32>
    %154 = arith.addf %138, %153 : vector<64x64xf32>
    %c0_55 = arith.constant 0 : index
    %c0_56 = arith.constant 0 : index
    %155 = vector.load %arg11[%c0_55, %c0_56] : memref<1x64xf32, #tpu.memory_space<vmem>>, vector<1x64xf32>
    %156 = vector.broadcast %155 : vector<1x64xf32> to vector<64x64xf32>
    %157 = arith.addf %154, %156 : vector<64x64xf32>
    %158 = arith.truncf %157 : vector<64x64xf32> to vector<64x64xbf16>
    %c0_57 = arith.constant 0 : index
    %c0_58 = arith.constant 0 : index
    %159 = vector.load %arg12[%c0_57, %c0_58] : memref<64x64xbf16, #tpu.memory_space<vmem>>, vector<64x64xbf16>
    tpu.vector_store %arg12[%c0_57, %c0_58], %158 {strides = array<i32>} : memref<64x64xbf16, #tpu.memory_space<vmem>>, vector<64x64xbf16>,
    return
  }
  func.func @transform_0(%arg0: i32) -> (i32, i32) {
    %c0_i32 = arith.constant 0 : i32
    %c0_i32_0 = arith.constant 0 : i32
    return %arg0, %c0_i32 : i32, i32
  }
  func.func @transform_1(%arg0: i32) -> (i32, i32) {
    %c0_i32 = arith.constant 0 : i32
    %c0_i32_0 = arith.constant 0 : i32
    %c0_i32_1 = arith.constant 0 : i32
    return %c0_i32, %c0_i32_0 : i32, i32
  }
  func.func @transform_2(%arg0: i32) -> (i32, i32) {
    %c0_i32 = arith.constant 0 : i32
    %c0_i32_0 = arith.constant 0 : i32
    %c0_i32_1 = arith.constant 0 : i32
    return %c0_i32, %c0_i32_0 : i32, i32
  }
  func.func @transform_3(%arg0: i32) -> (i32, i32) {
    %c0_i32 = arith.constant 0 : i32
    %c0_i32_0 = arith.constant 0 : i32
    %c0_i32_1 = arith.constant 0 : i32
    return %c0_i32, %c0_i32_0 : i32, i32
  }
  func.func @transform_4(%arg0: i32) -> (i32, i32) {
    %c0_i32 = arith.constant 0 : i32
    %c0_i32_0 = arith.constant 0 : i32
    %c0_i32_1 = arith.constant 0 : i32
    return %c0_i32, %c0_i32_0 : i32, i32
  }
  func.func @transform_5(%arg0: i32) -> (i32, i32) {
    %c0_i32 = arith.constant 0 : i32
    %c0_i32_0 = arith.constant 0 : i32
    %c0_i32_1 = arith.constant 0 : i32
    return %c0_i32, %c0_i32_0 : i32, i32
  }
  func.func @transform_6(%arg0: i32) -> (i32, i32) {
    %c0_i32 = arith.constant 0 : i32
    %c0_i32_0 = arith.constant 0 : i32
    %c0_i32_1 = arith.constant 0 : i32
    return %c0_i32, %c0_i32_0 : i32, i32
  }
  func.func @transform_7(%arg0: i32) -> (i32, i32) {
    %c0_i32 = arith.constant 0 : i32
    %c0_i32_0 = arith.constant 0 : i32
    %c0_i32_1 = arith.constant 0 : i32
    return %c0_i32, %c0_i32_0 : i32, i32
  }
  func.func @transform_8(%arg0: i32) -> (i32, i32) {
    %c0_i32 = arith.constant 0 : i32
    %c0_i32_0 = arith.constant 0 : i32
    %c0_i32_1 = arith.constant 0 : i32
    return %c0_i32, %c0_i32_0 : i32, i32
  }
  func.func @transform_9(%arg0: i32) -> (i32, i32) {
    %c0_i32 = arith.constant 0 : i32
    %c0_i32_0 = arith.constant 0 : i32
    %c0_i32_1 = arith.constant 0 : i32
    return %c0_i32, %c0_i32_0 : i32, i32
  }
  func.func @transform_10(%arg0: i32) -> (i32, i32) {
    %c0_i32 = arith.constant 0 : i32
    %c0_i32_0 = arith.constant 0 : i32
    %c0_i32_1 = arith.constant 0 : i32
    return %c0_i32, %c0_i32_0 : i32, i32
  }
  func.func @transform_11(%arg0: i32) -> (i32, i32) {
    %c0_i32 = arith.constant 0 : i32
    %c0_i32_0 = arith.constant 0 : i32
    return %arg0, %c0_i32 : i32, i32
  }
}

module attributes {stable_mosaic.version = 11 : i64} {
  func.func @_cv2_kernel(%arg0: i32, %arg1: memref<128x64xbf16, #tpu.memory_space<vmem>>, %arg2: memref<128x64xbf16, #tpu.memory_space<vmem>>, %arg3: memref<64x128xbf16, #tpu.memory_space<vmem>>, %arg4: memref<64x128xbf16, #tpu.memory_space<vmem>>, %arg5: memref<1x128xf32, #tpu.memory_space<vmem>>, %arg6: memref<128x128xf32, #tpu.memory_space<vmem>>) attributes {dimension_semantics = [#tpu.dimension_semantics<parallel>], iteration_bounds = array<i64: 1>, scalar_prefetch = 0 : i64, scratch_operands = 0 : i64, tpu.core_type = #tpu.core_type<tc>, window_params = [{transform_indices = @transform_0, window_bounds = array<i64: 128, 64>}, {transform_indices = @transform_1, window_bounds = array<i64: 128, 64>}, {pipeline_mode = #tpu.pipeline_mode<synchronous>, transform_indices = @transform_2, window_bounds = array<i64: 64, 128>}, {pipeline_mode = #tpu.pipeline_mode<synchronous>, transform_indices = @transform_3, window_bounds = array<i64: 64, 128>}, {pipeline_mode = #tpu.pipeline_mode<synchronous>, transform_indices = @transform_4, window_bounds = array<i64: 1, 128>}, {transform_indices = @transform_5, window_bounds = array<i64: 128, 128>}]} {
    %c0 = arith.constant 0 : index
    %c0_0 = arith.constant 0 : index
    %0 = vector.load %arg1[%c0, %c0_0] : memref<128x64xbf16, #tpu.memory_space<vmem>>, vector<128x64xbf16>
    %c0_1 = arith.constant 0 : index
    %c0_2 = arith.constant 0 : index
    %1 = vector.load %arg3[%c0_1, %c0_2] : memref<64x128xbf16, #tpu.memory_space<vmem>>, vector<64x128xbf16>
    %cst = arith.constant dense<0.000000e+00> : vector<128x128xf32>
    %2 = tpu.matmul %0, %1, %cst {dimension_numbers = #tpu.dot_dimension_numbers<[1], [0], [0], [1], [0, 0, 1, 1], [], []>} : vector<128x64xbf16>, vector<64x128xbf16>, vector<128x128xf32> -> vector<128x128xf32>
    %c0_3 = arith.constant 0 : index
    %c0_4 = arith.constant 0 : index
    %3 = vector.load %arg2[%c0_3, %c0_4] : memref<128x64xbf16, #tpu.memory_space<vmem>>, vector<128x64xbf16>
    %c0_5 = arith.constant 0 : index
    %c0_6 = arith.constant 0 : index
    %4 = vector.load %arg4[%c0_5, %c0_6] : memref<64x128xbf16, #tpu.memory_space<vmem>>, vector<64x128xbf16>
    %cst_7 = arith.constant dense<0.000000e+00> : vector<128x128xf32>
    %5 = tpu.matmul %3, %4, %cst_7 {dimension_numbers = #tpu.dot_dimension_numbers<[1], [0], [0], [1], [0, 0, 1, 1], [], []>} : vector<128x64xbf16>, vector<64x128xbf16>, vector<128x128xf32> -> vector<128x128xf32>
    %6 = arith.addf %2, %5 : vector<128x128xf32>
    %c0_8 = arith.constant 0 : index
    %c0_9 = arith.constant 0 : index
    %7 = vector.load %arg5[%c0_8, %c0_9] : memref<1x128xf32, #tpu.memory_space<vmem>>, vector<1x128xf32>
    %8 = vector.broadcast %7 : vector<1x128xf32> to vector<128x128xf32>
    %9 = arith.addf %6, %8 : vector<128x128xf32>
    %10 = arith.negf %9 : vector<128x128xf32>
    %11 = math.exp %10 : vector<128x128xf32>
    %cst_10 = arith.constant 1.000000e+00 : f32
    %12 = vector.broadcast %cst_10 : f32 to vector<128x128xf32>
    %13 = arith.addf %12, %11 : vector<128x128xf32>
    %14 = arith.divf %12, %13 : vector<128x128xf32>
    %15 = arith.mulf %9, %14 : vector<128x128xf32>
    %c0_11 = arith.constant 0 : index
    %c0_12 = arith.constant 0 : index
    %16 = vector.load %arg6[%c0_11, %c0_12] : memref<128x128xf32, #tpu.memory_space<vmem>>, vector<128x128xf32>
    tpu.vector_store %arg6[%c0_11, %c0_12], %15 {strides = array<i32>} : memref<128x128xf32, #tpu.memory_space<vmem>>, vector<128x128xf32>,
    return
  }
  func.func @transform_0(%arg0: i32) -> (i32, i32) {
    %c0_i32 = arith.constant 0 : i32
    %c0_i32_0 = arith.constant 0 : i32
    return %arg0, %c0_i32 : i32, i32
  }
  func.func @transform_1(%arg0: i32) -> (i32, i32) {
    %c0_i32 = arith.constant 0 : i32
    %c0_i32_0 = arith.constant 0 : i32
    return %arg0, %c0_i32 : i32, i32
  }
  func.func @transform_2(%arg0: i32) -> (i32, i32) {
    %c0_i32 = arith.constant 0 : i32
    %c0_i32_0 = arith.constant 0 : i32
    %c0_i32_1 = arith.constant 0 : i32
    return %c0_i32, %c0_i32_0 : i32, i32
  }
  func.func @transform_3(%arg0: i32) -> (i32, i32) {
    %c0_i32 = arith.constant 0 : i32
    %c0_i32_0 = arith.constant 0 : i32
    %c0_i32_1 = arith.constant 0 : i32
    return %c0_i32, %c0_i32_0 : i32, i32
  }
  func.func @transform_4(%arg0: i32) -> (i32, i32) {
    %c0_i32 = arith.constant 0 : i32
    %c0_i32_0 = arith.constant 0 : i32
    %c0_i32_1 = arith.constant 0 : i32
    return %c0_i32, %c0_i32_0 : i32, i32
  }
  func.func @transform_5(%arg0: i32) -> (i32, i32) {
    %c0_i32 = arith.constant 0 : i32
    %c0_i32_0 = arith.constant 0 : i32
    return %arg0, %c0_i32 : i32, i32
  }
}

</mosaic_0001>

<bundles_post_ra>
// kernel: _lambda_.4
= control target key start
LH: loop header
LB: loop body
LE: loop exit
PB: predicated region body
PF: predicated region fallthrough
CT: control target
= control target key end

     0   :  { %vm1446_vm9 = vcmask 519168   ;;  %s824_s15 = smov 64   ;;  %s1441_s1 = inlined_call_operand.vmem [shape: bf16[128,128], index: 1, kind: input, shape index: {}]   ;;  %s1442_s2 = inlined_call_operand.vmem [shape: f32[1,128], index: 2, kind: input, shape index: {}]   ;;  %s1443_s0 = inlined_call_operand.vmem [shape: bf16[128,128], index: 0, kind: input, shape index: {}]   ;;  %s1444_s3 = inlined_call_operand.vmem [shape: bf16[128,64], index: 3, kind: output, shape index: {0}]   ;;  %s1445_s4 = inlined_call_operand.vmem [shape: bf16[128,64], index: 4, kind: output, shape index: {1}]  }
   0x1   :  { %v733_v0 = vld [vmem:[%s1441_s1 + $0x38] sm:$0xff]  ;;  %v732_v1 = vld [vmem:[%s1441_s1 + $0x30] sm:$0xff]  ;;  %v731_v2 = vld [vmem:[%s1441_s1 + $0x28] sm:$0xff] }
   0x2   :  { %148 = vmatpush.bf16.msra.mxu0 %v733_v0  ;;  %734 = vmatpush.bf16.msra.mxu1 %v733_v0  ;;  %v730_v3 = vld [vmem:[%s1441_s1 + $0x20] sm:$0xff]  ;;  %v729_v4 = vld [vmem:[%s1441_s1 + $0x18] sm:$0xff]  ;;  %v728_v5 = vld [vmem:[%s1441_s1 + $0x10] sm:$0xff] }
   0x3   :  { %735 = vmatpush.bf16.msra.mxu2 %v733_v0  ;;  %736 = vmatpush.bf16.msra.mxu3 %v733_v0  ;;  %v727_v6 = vld [vmem:[%s1441_s1 + $0x8] sm:$0xff]  ;;  %v726_v7 = vld [vmem:[%s1441_s1] sm:$0xff]  ;;  %v720_v9 = vld [vmem:[%s1443_s0 + $0x10] sm:$0xff] }
   0x4   :  { %v718_v8 = vld [vmem:[%s1443_s0] sm:$0xff]  ;;  %v724_v11 = vld [vmem:[%s1443_s0 + $0x30] sm:$0xff]  ;;  %v719_v12 = vld [vmem:[%s1443_s0 + $0x8] sm:$0xff] }
   0x5   :  { %v722_v10 = vld [vmem:[%s1443_s0 + $0x20] sm:$0xff]  ;;  %v721_v13 = vld [vmem:[%s1443_s0 + $0x18] sm:$0xff]  ;;  %v723_v14 = vld [vmem:[%s1443_s0 + $0x28] sm:$0xff] }
   0x6   :  { %149 = vmatpush.bf16.msra.mxu0 %v732_v1  ;;  %737 = vmatpush.bf16.msra.mxu1 %v732_v1  ;;  %v725_v15 = vld [vmem:[%s1443_s0 + $0x38] sm:$0xff]  ;;  %v901_v16 = vld [vmem:[%s1442_s2] ss:$0 sm:$0xff] }
   0x7   :  { %738 = vmatpush.bf16.msra.mxu2 %v732_v1  ;;  %739 = vmatpush.bf16.msra.mxu3 %v732_v1 }
   0xa   :  { %150 = vmatpush.bf16.msra.mxu0 %v731_v2  ;;  %740 = vmatpush.bf16.msra.mxu1 %v731_v2 }
   0xb   :  { %741 = vmatpush.bf16.msra.mxu2 %v731_v2  ;;  %742 = vmatpush.bf16.msra.mxu3 %v731_v2 }
   0xe   :  { %151 = vmatpush.bf16.msra.mxu0 %v730_v3  ;;  %743 = vmatpush.bf16.msra.mxu1 %v730_v3 }
   0xf   :  { %744 = vmatpush.bf16.msra.mxu2 %v730_v3  ;;  %745 = vmatpush.bf16.msra.mxu3 %v730_v3 }
  0x12   :  { %152 = vmatpush.bf16.msra.mxu0 %v729_v4  ;;  %746 = vmatpush.bf16.msra.mxu1 %v729_v4 }
  0x13   :  { %747 = vmatpush.bf16.msra.mxu2 %v729_v4  ;;  %748 = vmatpush.bf16.msra.mxu3 %v729_v4 }
  0x16   :  { %153 = vmatpush.bf16.msra.mxu0 %v728_v5  ;;  %749 = vmatpush.bf16.msra.mxu1 %v728_v5 }
  0x17   :  { %750 = vmatpush.bf16.msra.mxu2 %v728_v5  ;;  %751 = vmatpush.bf16.msra.mxu3 %v728_v5 }
  0x1a   :  { %154 = vmatpush.bf16.msra.mxu0 %v727_v6  ;;  %752 = vmatpush.bf16.msra.mxu1 %v727_v6 }
  0x1b   :  { %753 = vmatpush.bf16.msra.mxu2 %v727_v6  ;;  %754 = vmatpush.bf16.msra.mxu3 %v727_v6 }
  0x1e   :  { %155 = vmatpush.bf16.msra.mxu0 %v726_v7  ;;  %755 = vmatpush.bf16.msra.mxu1 %v726_v7 }
  0x1f   :  { %756 = vmatpush.bf16.msra.mxu2 %v726_v7  ;;  %757 = vmatpush.bf16.msra.mxu3 %v726_v7 }
  0x21   :  { %156 = vmatmul.bf16.vlgmr.msra.gmra.mxu0 %v718_v8  ;;  %166 = vmatmul.bf16.vlgmr.msra.gmra.mxu1 %v720_v9 }
  0x22   :  { %176 = vmatmul.bf16.vlgmr.msra.gmra.mxu2 %v722_v10  ;;  %186 = vmatmul.bf16.vlgmr.msra.gmra.mxu3 %v724_v11 }
  0x31   :  { %161 = vmatmul.bf16.gmra.mxu0 %v719_v12  ;;  %171 = vmatmul.bf16.gmra.mxu1 %v721_v13 }
  0x32   :  { %181 = vmatmul.bf16.gmra.mxu2 %v723_v14  ;;  %191 = vmatmul.bf16.gmra.mxu3 %v725_v15 }
  0x9e   :  { %v157_v17 = vpop.f32.mrf.mxu0  ;;  %v167_v18 = vpop.f32.mrf.mxu1 }
  0x9f   :  { %v904_v19 = vadd.f32 %v901_v16, %v157_v17  ;;  %v907_v20 = vadd.f32 %v901_v16, %v167_v18 }
  0xa1   :  { %v702_v21 = vmul.f32 -1.442695, %v904_v19  ;;  %v706_v22 = vmul.f32 -1.442695, %v907_v20 }
  0xa3   :  { %760 = vpow2.f32 %v702_v21 }
  0xa4   :  { %762 = vpow2.f32 %v706_v22 }
  0xa5   :  { %v177_v23 = vpop.f32.mrf.mxu2  ;;  %v187_v24 = vpop.f32.mrf.mxu3 }
  0xa6   :  { %v912_v25 = vadd.f32 %v901_v16, %v177_v23  ;;  %v915_v26 = vadd.f32 %v901_v16, %v187_v24  ;;  %v159_v27 = vpop.f32.mrf.mxu0  ;;  %v169_v28 = vpop.f32.mrf.mxu1 }
  0xa7   :  { %v918_v29 = vadd.f32 %v901_v16, %v159_v27  ;;  %v921_v30 = vadd.f32 %v901_v16, %v169_v28 }
  0xa8   :  { %v710_v31 = vmul.f32 -1.442695, %v912_v25  ;;  %v714_v32 = vmul.f32 -1.442695, %v915_v26 }
  0xa9   :  { %v761_v33 = vpop.eup %760  ;;  %v703_v35 = vmul.f32 -1.442695, %v918_v29  ;;  %v707_v36 = vmul.f32 -1.442695, %v921_v30 }
  0xaa   :  { %v763_v34 = vpop.eup %762  ;;  %764 = vpow2.f32 %v710_v31  ;;  %v927_v37 = vadd.f32 1.0, %v761_v33 }
  0xab   :  { %766 = vpow2.f32 %v714_v32  ;;  %v929_v38 = vadd.f32 1.0, %v763_v34 }
  0xac   :  { %768 = vpow2.f32 %v703_v35 }
  0xad   :  { %v179_v39 = vpop.f32.mrf.mxu2  ;;  %v189_v40 = vpop.f32.mrf.mxu3  ;;  %770 = vpow2.f32 %v707_v36 }
  0xae   :  { %v932_v41 = vadd.f32 %v901_v16, %v179_v39  ;;  %v935_v42 = vadd.f32 %v901_v16, %v189_v40  ;;  %v162_v43 = vpop.f32.mrf.mxu0  ;;  %772 = vrcp.f32 %v927_v37  ;;  %v172_v50 = vpop.f32.mrf.mxu1 }
  0xaf   :  { %v938_v44 = vadd.f32 %v901_v16, %v162_v43  ;;  %774 = vrcp.f32 %v929_v38  ;;  %v952_v54 = vadd.f32 %v901_v16, %v172_v50 }
  0xb0   :  { %v765_v45 = vpop.eup %764  ;;  %v711_v46 = vmul.f32 -1.442695, %v932_v41  ;;  %v715_v49 = vmul.f32 -1.442695, %v935_v42 }
  0xb1   :  { %v767_v47 = vpop.eup %766  ;;  %v943_v48 = vadd.f32 1.0, %v765_v45  ;;  %v704_v52 = vmul.f32 -1.442695, %v938_v44  ;;  %v708_v2 = vmul.f32 -1.442695, %v952_v54 }
  0xb2   :  { %v946_v51 = vadd.f32 1.0, %v767_v47  ;;  %776 = vpow2.f32 %v711_v46  ;;  %v769_v53 = vpop.eup %768 }
  0xb3   :  { %778 = vrcp.f32 %v943_v48  ;;  %v771_v55 = vpop.eup %770  ;;  %v954_v56 = vadd.f32 1.0, %v769_v53  ;;  %v390_v58 = vand.u32 2147483647, %v943_v48  ;;  %v392_v59 = vand.u32 2147483648, %v943_v48 }
  0xb4   :  { %780 = vrcp.f32 %v946_v51  ;;  %v956_v57 = vpop.eup %772  ;;  %v960_v60 = vadd.f32 1.0, %v771_v55  ;;  %v450_v62 = vand.u32 2147483647, %v946_v51  ;;  %v452_v63 = vand.u32 2147483648, %v946_v51 }
  0xb5   :  { %782 = vpow2.f32 %v715_v49  ;;  %v962_v61 = vpop.eup %774  ;;  %v287_v1 = vand.u32 2147483648, %v954_v56  ;;  %vm386_vm0 = vweird.f32 %v943_v48  ;;  %vm446_vm1 = vweird.f32 %v946_v51  ;;  %v182_v28 = vpop.f32.mrf.mxu2 }
  0xb6   :  { %784 = vpow2.f32 %v704_v52  ;;  %v347_v4 = vand.u32 2147483648, %v960_v60  ;;  %vm976_vm2 = vcmp.eq.f32.partialorder %v390_v58, 8.507059e+37  ;;  %v393_v9 = vor.u32 1.1754944e-38, %v392_v59  ;;  %v192_v36 = vpop.f32.mrf.mxu3 }
  0xb7   :  { %786 = vrcp.f32 %v954_v56  ;;  %v285_v10 = vand.u32 2147483647, %v954_v56  ;;  %vm982_vm3 = vcmp.eq.f32.partialorder %v450_v62, 8.507059e+37  ;;  %v453_v14 = vor.u32 1.1754944e-38, %v452_v63 }
  0xb8   :  { %v777_v0 = vpop.eup %776  ;;  %788 = vrcp.f32 %v960_v60  ;;  %v345_v15 = vand.u32 2147483647, %v960_v60  ;;  %vm281_vm4 = vweird.f32 %v954_v56  ;;  %v288_v21 = vor.u32 1.1754944e-38, %v287_v1 }
  0xb9   :  { %v779_v3 = vpop.eup %778  ;;  %v973_v5 = vadd.f32 1.0, %v777_v0  ;;  %vm341_vm5 = vweird.f32 %v960_v60  ;;  %v348_v27 = vor.u32 1.1754944e-38, %v347_v4  ;;  %vm993_vm8 = vcmp.eq.f32.partialorder %v285_v10, 8.507059e+37 }
  0xba   :  { %v781_v6 = vpop.eup %780  ;;  %v382_v7 = vmul.f32 %v779_v3, %v943_v48  ;;  %vm387_vm6 = vweird.f32 %v779_v3  ;;  %vm999_vm10 = vcmp.eq.f32.partialorder %v345_v15, 8.507059e+37  ;;  %v1009_v50 = vadd.f32 %v901_v16, %v182_v28 }
  0xbb   :  { %v783_v11 = vpop.eup %782  ;;  %v442_v12 = vmul.f32 %v781_v6, %v946_v51  ;;  %790 = vrcp.f32 %v973_v5  ;;  %vm447_vm7 = vweird.f32 %v781_v6  ;;  %v405_v35 = vand.u32 2147483647, %v973_v5  ;;  %vm388_vm12 = vmor %vm386_vm0, %vm387_vm6 }
  0xbc   :  { %v785_v17 = vpop.eup %784  ;;  %v383_v18 = vsub.f32 1.0, %v382_v7  ;;  %v990_v22 = vadd.f32 1.0, %v783_v11  ;;  %792 = vpow2.f32 %v708_v2  ;;  %v407_v45 = vand.u32 2147483648, %v973_v5  ;;  %vm448_vm14 = vmor %vm446_vm1, %vm447_vm7 }
  0xbd   :  { %v787_v23 = vpop.eup %786  ;;  %v443_v24 = vsub.f32 1.0, %v442_v12  ;;  %v1004_v46 = vadd.f32 1.0, %v785_v17  ;;  %vm401_vm11 = vweird.f32 %v973_v5  ;;  %v1015_v58 = vadd.f32 %v901_v16, %v192_v36  ;;  %v184_v36 = vpop.f32.mrf.mxu2 }
  0xbe   :  { %v789_v31 = vpop.eup %788  ;;  %v384_v32 = vmul.f32 %v779_v3, %v383_v18  ;;  %v277_v33 = vmul.f32 %v787_v23, %v954_v56  ;;  %794 = vrcp.f32 %v990_v22  ;;  %vm282_vm13 = vweird.f32 %v787_v23 }
  0xbf   :  { %v444_v39 = vmul.f32 %v781_v6, %v443_v24  ;;  %v337_v40 = vmul.f32 %v789_v31, %v960_v60  ;;  %vm1021_vm15 = vcmp.eq.f32.partialorder %v405_v35, 8.507059e+37  ;;  %vm342_vm0 = vweird.f32 %v789_v31  ;;  %vm283_vm1 = vmor %vm281_vm4, %vm282_vm13 }
  0xc0   :  { %v385_v47 = vadd.f32 %v779_v3, %v384_v32  ;;  %v278_v49 = vsub.f32 1.0, %v277_v33  ;;  %v465_v8 = vand.u32 2147483647, %v990_v22  ;;  %v467_v24 = vand.u32 2147483648, %v990_v22  ;;  %v164_v32 = vpop.f32.mrf.mxu0  ;;  %v174_v33 = vpop.f32.mrf.mxu1 }
  0xc1   :  { %v791_v52 = vpop.eup %790  ;;  %v445_v53 = vadd.f32 %v781_v6, %v444_v39  ;;  %v338_v55 = vsub.f32 1.0, %v337_v40  ;;  %v408_v28 = vor.u32 1.1754944e-38, %v407_v45  ;;  %vm461_vm4 = vweird.f32 %v990_v22  ;;  %v194_v39 = vpop.f32.mrf.mxu3 }
  0xc2   :  { %v389_v59 = vsel %vm388_vm12, %v779_v3, %v385_v47  ;;  %v279_v62 = vmul.f32 %v787_v23, %v278_v49  ;;  %v397_v63 = vmul.f32 %v791_v52, %v973_v5  ;;  %v793_v48 = vpop.eup %792  ;;  %vm402_vm6 = vweird.f32 %v791_v52 }
  0xc3   :  { %v394_v1 = vsel %vm976_vm2, %v393_v9, %v389_v59  ;;  %v449_v2 = vsel %vm448_vm14, %v781_v6, %v445_v53  ;;  %v339_v4 = vmul.f32 %v789_v31, %v338_v55  ;;  %vm343_vm2 = vmor %vm341_vm5, %vm342_vm0  ;;  %v1039_v13 = vadd.f32 1.0, %v793_v48 }
  0xc4   :  { %v509_v3 = vmul.f32 %v394_v1, %v912_v25  ;;  %v454_v51 = vsel %vm982_vm3, %v453_v14, %v449_v2  ;;  %v280_v7 = vadd.f32 %v787_v23, %v279_v62  ;;  %v398_v10 = vsub.f32 1.0, %v397_v63  ;;  %v795_v6 = vpop.eup %794  ;;  %vm403_vm3 = vmor %vm401_vm11, %vm402_vm6 }
  0xc5   :  { %v513_v11 = vmul.f32 %v454_v51, %v915_v26  ;;  %v340_v12 = vadd.f32 %v789_v31, %v339_v4  ;;  %v457_v17 = vmul.f32 %v795_v6, %v990_v22  ;;  %796 = vrcp.f32 %v1039_v13 }
  0xc6   :  { %v1035_v9 = vpack.c.bf16 %v509_v3, %v509_v3  ;;  %v284_v15 = vsel %vm283_vm1, %v787_v23, %v280_v7  ;;  %v399_v25 = vmul.f32 %v791_v52, %v398_v10  ;;  %vm462_vm5 = vweird.f32 %v795_v6 }
  0xc7   :  { %v1041_v14 = vpack.c.bf16 %v513_v11, %v513_v11  ;;  %v289_v26 = vsel %vm993_vm8, %v288_v21, %v284_v15  ;;  %v344_v56 = vsel %vm343_vm2, %v789_v31, %v340_v12  ;;  %v712_v5 = vmul.f32 -1.442695, %v1009_v50  ;;  %vm463_vm8 = vmor %vm461_vm4, %vm462_vm5 }
  0xc8   :  { %542 = vst.msk [vmem:[%s1444_s3 + $0x20] sm:$0xf] %vm1446_vm9, %v1035_v9  ;;  %v502_v60 = vmul.f32 %v289_v26, %v918_v29  ;;  %v349_v18 = vsel %vm999_vm10, %v348_v27, %v344_v56  ;;  %v400_v23 = vadd.f32 %v791_v52, %v399_v25  ;;  %v458_v29 = vsub.f32 1.0, %v457_v17 }
  0xc9   :  { %546 = vst.msk [vmem:[%s1444_s3 + $0x30] sm:$0xf] %vm1446_vm9, %v1041_v14  ;;  %v506_v21 = vmul.f32 %v349_v18, %v921_v30  ;;  %vm1079_vm7 = vcmp.eq.f32.partialorder %v465_v8, 8.507059e+37  ;;  %v468_v45 = vor.u32 1.1754944e-38, %v467_v24  ;;  %v716_v47 = vmul.f32 -1.442695, %v1015_v58 }
  0xca   :  { %v1065_v27 = vpack.c.bf16 %v502_v60, %v502_v60  ;;  %v404_v31 = vsel %vm403_vm3, %v791_v52, %v400_v23  ;;  %v459_v35 = vmul.f32 %v795_v6, %v458_v29  ;;  %798 = vpow2.f32 %v712_v5 }
  0xcb   :  { %v1068_v34 = vpack.c.bf16 %v506_v21, %v506_v21  ;;  %v409_v30 = vsel %vm1021_vm15, %v408_v28, %v404_v31  ;;  %v1090_v52 = vadd.f32 %v901_v16, %v164_v32  ;;  %800 = vpow2.f32 %v716_v47  ;;  %v797_v62 = vpop.eup %796 }
  0xcc   :  { %535 = vst.msk [vmem:[%s1444_s3 + $0x4] sm:$0xf] %vm1446_vm9, %v1065_v27  ;;  %v510_v40 = vmul.f32 %v409_v30, %v932_v41  ;;  %v460_v49 = vadd.f32 %v795_v6, %v459_v35  ;;  %v1093_v41 = vadd.f32 %v901_v16, %v174_v33  ;;  %v1101_v55 = vadd.f32 %v901_v16, %v184_v36 }
  0xcd   :  { %539 = vst.msk [vmem:[%s1444_s3 + $0x14] sm:$0xf] %vm1446_vm9, %v1068_v34  ;;  %v1104_v59 = vadd.f32 %v901_v16, %v194_v39  ;;  %v705_v0 = vmul.f32 -1.442695, %v1090_v52  ;;  %v322_v1 = vmul.f32 %v962_v61, %v929_v38  ;;  %v352_v16 = vmul.f32 %v797_v62, %v1039_v13 }
  0xce   :  { %v1095_v53 = vpack.c.bf16 %v510_v40, %v510_v40  ;;  %v464_v63 = vsel %vm463_vm8, %v795_v6, %v460_v49  ;;  %v709_v48 = vmul.f32 -1.442695, %v1093_v41  ;;  %vm356_vm10 = vweird.f32 %v1039_v13 }
  0xcf   :  { %v469_v22 = vsel %vm1079_vm7, %v468_v45, %v464_v63  ;;  %v713_v2 = vmul.f32 -1.442695, %v1101_v55  ;;  %v362_v3 = vand.u32 2147483648, %v1039_v13  ;;  %802 = vpow2.f32 %v705_v0 }
  0xd0   :  { %543 = vst.msk [vmem:[%s1444_s3 + $0x24] sm:$0xf] %vm1446_vm9, %v1095_v53  ;;  %v514_v4 = vmul.f32 %v469_v22, %v935_v42  ;;  %v717_v51 = vmul.f32 -1.442695, %v1104_v59  ;;  %v353_v7 = vsub.f32 1.0, %v352_v16  ;;  %vm357_vm11 = vweird.f32 %v797_v62  ;;  %v799_v11 = vpop.eup %798 }
  0xd1   :  { %v360_v10 = vand.u32 2147483647, %v1039_v13  ;;  %804 = vpow2.f32 %v709_v48  ;;  %v323_v8 = vsub.f32 1.0, %v322_v1  ;;  %v801_v6 = vpop.eup %800  ;;  %v1127_v42 = vadd.f32 1.0, %v799_v11  ;;  %vm1136_vm12 = vmor %vm356_vm10, %vm357_vm11 }
  0xd2   :  { %v1124_v12 = vpack.c.bf16 %v514_v4, %v514_v4  ;;  %806 = vpow2.f32 %v713_v2  ;;  %v354_v15 = vmul.f32 %v797_v62, %v353_v7  ;;  %v363_v26 = vor.u32 1.1754944e-38, %v362_v3 }
  0xd3   :  { %808 = vrcp.f32 %v1004_v46  ;;  %v1140_v56 = vadd.f32 1.0, %v801_v6  ;;  %vm361_vm13 = vcmp.eq.f32.partialorder %v360_v10, 8.507059e+37  ;;  %v324_v18 = vmul.f32 %v962_v61, %v323_v8 }
  0xd4   :  { %547 = vst.msk [vmem:[%s1444_s3 + $0x34] sm:$0xf] %vm1446_vm9, %v1124_v12  ;;  %810 = vpow2.f32 %v717_v51  ;;  %v355_v17 = vadd.f32 %v797_v62, %v354_v15  ;;  %vm326_vm14 = vweird.f32 %v929_v38  ;;  %vm327_vm15 = vweird.f32 %v962_v61 }
  0xd5   :  { %812 = vrcp.f32 %v1127_v42  ;;  %v803_v60 = vpop.eup %802  ;;  %v422_v24 = vand.u32 2147483648, %v1127_v42  ;;  %v330_v28 = vand.u32 2147483647, %v929_v38  ;;  %v420_v32 = vand.u32 2147483647, %v1127_v42  ;;  %vm1207_vm8 = vmor %vm326_vm14, %vm327_vm15 }
  0xd6   :  { %814 = vrcp.f32 %v1140_v56  ;;  %v359_v23 = vsel %vm1136_vm12, %v797_v62, %v355_v17  ;;  %v1150_v21 = vadd.f32 1.0, %v803_v60  ;;  %v332_v30 = vand.u32 2147483648, %v929_v38 }
  0xd7   :  { %v805_v13 = vpop.eup %804  ;;  %v364_v31 = vsel %vm361_vm13, %v363_v26, %v359_v23  ;;  %v480_v36 = vand.u32 2147483647, %v1140_v56  ;;  %v482_v39 = vand.u32 2147483648, %v1140_v56  ;;  %vm416_vm0 = vweird.f32 %v1127_v42 }
  0xd8   :  { %v807_v29 = vpop.eup %806  ;;  %v1154_v33 = vadd.f32 1.0, %v805_v13  ;;  %v507_v5 = vmul.f32 %v364_v31, %v952_v54  ;;  %816 = vrcp.f32 %v1150_v21  ;;  %v1166_v43 = vadd.f32 %v962_v61, %v324_v18 }
  0xd9   :  { %v1157_v35 = vpop.eup %808  ;;  %v1170_v45 = vmul.f32 %v956_v57, %v927_v37  ;;  %v423_v49 = vor.u32 1.1754944e-38, %v422_v24  ;;  %vm476_vm1 = vweird.f32 %v1140_v56  ;;  %v1175_v62 = vadd.f32 1.0, %v807_v29 }
  0xda   :  { %v811_v40 = vpop.eup %810  ;;  %818 = vrcp.f32 %v1154_v33  ;;  %v1172_v54 = vpack.c.bf16 %v507_v5, %v507_v5  ;;  %vm1178_vm6 = vcmp.eq.f32.partialorder %v420_v32, 8.507059e+37  ;;  %v315_v1 = vand.u32 2147483647, %v1150_v21 }
  0xdb   :  { %v813_v47 = vpop.eup %812  ;;  %v317_v22 = vand.u32 2147483648, %v1150_v21  ;;  %v377_v16 = vand.u32 2147483648, %v1154_v33  ;;  %vm1191_vm2 = vcmp.eq.f32.partialorder %v480_v36, 8.507059e+37  ;;  %v483_v3 = vor.u32 1.1754944e-38, %v482_v39 }
  0xdc   :  { %v815_v63 = vpop.eup %814  ;;  %v412_v0 = vmul.f32 %v813_v47, %v1127_v42  ;;  %540 = vst.msk [vmem:[%s1444_s3 + $0x18] sm:$0xf] %vm1446_vm9, %v1172_v54  ;;  %v375_v51 = vand.u32 2147483647, %v1154_v33  ;;  %vm1196_vm3 = vcmp.eq.f32.partialorder %v330_v28, 8.507059e+37  ;;  %vm417_vm4 = vweird.f32 %v813_v47 }
  0xdd   :  { %v472_v2 = vmul.f32 %v815_v63, %v1140_v56  ;;  %vm311_vm5 = vweird.f32 %v1150_v21  ;;  %vm371_vm7 = vweird.f32 %v1154_v33  ;;  %820 = vrcp.f32 %v1175_v62  ;;  %vm418_vm15 = vmor %vm416_vm0, %vm417_vm4 }
  0xde   :  { %v413_v10 = vsub.f32 1.0, %v412_v0  ;;  %v817_v8 = vpop.eup %816  ;;  %vm477_vm10 = vweird.f32 %v815_v63  ;;  %v437_v15 = vand.u32 2147483648, %v1175_v62  ;;  %v1212_v25 = vadd.f32 1.0, %v811_v40 }
  0xdf   :  { %v473_v6 = vsub.f32 1.0, %v472_v2  ;;  %v307_v60 = vmul.f32 %v817_v8, %v1150_v21  ;;  %vm1215_vm11 = vcmp.eq.f32.partialorder %v315_v1, 8.507059e+37  ;;  %v318_v13 = vor.u32 1.1754944e-38, %v317_v22  ;;  %vm1232_vm13 = vmor %vm476_vm1, %vm477_vm10 }
  0xe0   :  { %v819_v26 = vpop.eup %818  ;;  %v414_v17 = vmul.f32 %v813_v47, %v413_v10  ;;  %v378_v23 = vor.u32 1.1754944e-38, %v377_v16  ;;  %vm1220_vm12 = vcmp.eq.f32.partialorder %v375_v51, 8.507059e+37  ;;  %v435_v31 = vand.u32 2147483647, %v1175_v62 }
  0xe1   :  { %v474_v24 = vmul.f32 %v815_v63, %v473_v6  ;;  %v367_v28 = vmul.f32 %v819_v26, %v1154_v33  ;;  %v329_v32 = vsel %vm1207_vm8, %v962_v61, %v1166_v43  ;;  %v308_v39 = vsub.f32 1.0, %v307_v60 }
  0xe2   :  { %v415_v5 = vadd.f32 %v813_v47, %v414_v17  ;;  %vm312_vm14 = vweird.f32 %v817_v8  ;;  %822 = vrcp.f32 %v1212_v25  ;;  %vm372_vm9 = vweird.f32 %v819_v26 }
  0xe3   :  { %v475_v40 = vadd.f32 %v815_v63, %v474_v24  ;;  %v368_v0 = vsub.f32 1.0, %v367_v28  ;;  %vm431_vm8 = vweird.f32 %v1175_v62  ;;  %v438_v61 = vor.u32 1.1754944e-38, %v437_v15  ;;  %v821_v43 = vpop.eup %820 }
  0xe4   :  { %v419_v56 = vsel %vm418_vm15, %v813_v47, %v415_v5  ;;  %v309_v1 = vmul.f32 %v817_v8, %v308_v39  ;;  %v495_v22 = vand.u32 2147483647, %v1212_v25  ;;  %v333_v16 = vor.u32 1.1754944e-38, %v332_v30 }
  0xe5   :  { %v424_v2 = vsel %vm1178_vm6, %v423_v49, %v419_v56  ;;  %v479_v42 = vsel %vm1232_vm13, %v815_v63, %v475_v40  ;;  %v369_v51 = vmul.f32 %v819_v26, %v368_v0  ;;  %v427_v10 = vmul.f32 %v821_v43, %v1175_v62  ;;  %vm313_vm6 = vmor %vm311_vm5, %vm312_vm14 }
  0xe6   :  { %vm1249_vm0 = vcmp.eq.f32.partialorder %v435_v31, 8.507059e+37  ;;  %v511_v47 = vmul.f32 %v424_v2, %v1009_v50  ;;  %v484_v6 = vsel %vm1191_vm2, %v483_v3, %v479_v42  ;;  %v310_v38 = vadd.f32 %v817_v8, %v309_v1  ;;  %vm373_vm2 = vmor %vm371_vm7, %vm372_vm9 }
  0xe7   :  { %vm491_vm1 = vweird.f32 %v1212_v25  ;;  %v497_v30 = vand.u32 2147483648, %v1212_v25  ;;  %v515_v49 = vmul.f32 %v484_v6, %v1015_v58  ;;  %v370_v63 = vadd.f32 %v819_v26, %v369_v51 }
  0xe8   :  { %v428_v48 = vsub.f32 1.0, %v427_v10  ;;  %v263_v15 = vsub.f32 1.0, %v1170_v45  ;;  %v823_v17 = vpop.eup %822  ;;  %v1263_v50 = vpack.c.bf16 %v511_v47, %v511_v47  ;;  %v314_v4 = vsel %vm313_vm6, %v817_v8, %v310_v38 }
  0xe9   :  { %vm432_vm4 = vweird.f32 %v821_v43  ;;  %v334_v58 = vsel %vm1196_vm3, %v333_v16, %v329_v32  ;;  %v1270_v3 = vpack.c.bf16 %v515_v49, %v515_v49  ;;  %v319_v21 = vsel %vm1215_vm11, %v318_v13, %v314_v4 }
  0xea   :  { %v374_v60 = vsel %vm373_vm2, %v819_v26, %v370_v63  ;;  %v429_v24 = vmul.f32 %v821_v43, %v428_v48  ;;  %vm1477_vm5 = vcmask 519168   ;;  %v504_v33 = vmul.f32 %v319_v21, %v1090_v52  ;;  %vm433_vm7 = vmor %vm431_vm8, %vm432_vm4 }
  0xeb   :  { %544 = vst.msk [vmem:[%s1444_s3 + $0x28] sm:$0xf] %vm1477_vm5, %v1263_v50  ;;  %v379_v45 = vsel %vm1220_vm12, %v378_v23, %v374_v60  ;;  %v487_v7 = vmul.f32 %v823_v17, %v1212_v25  ;;  %vm492_vm9 = vweird.f32 %v823_v17  ;;  %vm1478_vm3 = vmmov %vm1477_vm5  ;;  %v505_v18 = vmul.f32 %v334_v58, %v907_v20 }
  0xec   :  { %548 = vst.msk [vmem:[%s1444_s3 + $0x38] sm:$0xf] %vm1478_vm3, %v1270_v3  ;;  %v508_v8 = vmul.f32 %v379_v45, %v1093_v41  ;;  %v430_v26 = vadd.f32 %v821_v43, %v429_v24  ;;  %v264_v13 = vmul.f32 %v956_v57, %v263_v15  ;;  %v520_v52 = vpack.c.bf16 %v504_v33, %v504_v33  ;;  %vm1479_vm12 = vmmov %vm1478_vm3 }
  0xed   :  { %v488_v23 = vsub.f32 1.0, %v487_v7  ;;  %vm266_vm10 = vweird.f32 %v927_v37  ;;  %vm267_vm11 = vweird.f32 %v956_v57  ;;  %v521_v31 = vpack.c.bf16 %v505_v18, %v505_v18  ;;  %vm1482_vm14 = vmmov %vm1478_vm3 }
  0xee   :  { %v524_v28 = vpack.c.bf16 %v508_v8, %v508_v8  ;;  %v434_v29 = vsel %vm433_vm7, %v821_v43, %v430_v26  ;;  %v265_v41 = vadd.f32 %v956_v57, %v264_v13  ;;  %537 = vst.msk [vmem:[%s1444_s3 + $0xc] sm:$0xf] %vm1479_vm12, %v520_v52  ;;  %vm1303_vm13 = vmor %vm266_vm10, %vm267_vm11  ;;  %v270_v5 = vand.u32 2147483647, %v927_v37 }
  0xef   :  { %v439_v20 = vsel %vm1249_vm0, %v438_v61, %v434_v29  ;;  %v489_v62 = vmul.f32 %v823_v17, %v488_v23  ;;  %v272_v36 = vand.u32 2147483648, %v927_v37  ;;  %574 = vrot.lane.b32.xlu2 %v521_v31, %s824_s15  ;;  %v292_v0 = vmul.f32 %v1157_v35, %v1004_v46  ;;  %vm1483_vm8 = vmmov %vm1478_vm3 }
  0xf0   :  { %541 = vst.msk [vmem:[%s1444_s3 + $0x1c] sm:$0xf] %vm1482_vm14, %v524_v28  ;;  %v512_v39 = vmul.f32 %v439_v20, %v1101_v55  ;;  %v269_v40 = vsel %vm1303_vm13, %v956_v57, %v265_v41  ;;  %vm496_vm15 = vcmp.eq.f32.partialorder %v495_v22, 8.507059e+37  ;;  %vm493_vm0 = vmor %vm491_vm1, %vm492_vm9  ;;  %v498_v55 = vor.u32 1.1754944e-38, %v497_v30 }
  0xf1   :  { %v490_v61 = vadd.f32 %v823_v17, %v489_v62  ;;  %538 = vst.msk [vmem:[%s1444_s3 + $0x10] sm:$0xf] %vm1483_vm8, %v521_v31  ;;  %v273_v37 = vor.u32 1.1754944e-38, %v272_v36  ;;  %vm271_vm6 = vcmp.eq.f32.partialorder %v270_v5, 8.507059e+37  ;;  %v293_v56 = vsub.f32 1.0, %v292_v0  ;;  %vm1484_vm4 = vmmov %vm1478_vm3 }
  0xf2   :  { %v528_v43 = vpack.c.bf16 %v512_v39, %v512_v39  ;;  %vm297_vm2 = vweird.f32 %v1157_v35  ;;  %v302_v22 = vand.u32 2147483648, %v1004_v46  ;;  %v300_v42 = vand.u32 2147483647, %v1004_v46  ;;  %vm1485_vm9 = vmmov %vm1478_vm3 }
  0xf3   :  { %v494_v57 = vsel %vm493_vm0, %v823_v17, %v490_v61  ;;  %v274_v1 = vsel %vm271_vm6, %v273_v37, %v269_v40  ;;  %v294_v25 = vmul.f32 %v1157_v35, %v293_v56  ;;  %vm296_vm1 = vweird.f32 %v1004_v46  ;;  %vm1486_vm7 = vmmov %vm1484_vm4 }
  0xf4   :  { %545 = vst.msk [vmem:[%s1444_s3 + $0x2c] sm:$0xf] %vm1484_vm4, %v528_v43  ;;  %v499_v16 = vsel %vm496_vm15, %v498_v55, %v494_v57  ;;  %v501_v2 = vmul.f32 %v274_v1, %v904_v19  ;;  %vm298_vm5 = vmor %vm296_vm1, %vm297_vm2  ;;  %v303_v6 = vor.u32 1.1754944e-38, %v302_v22  ;;  %vm301_vm3 = vcmp.eq.f32.partialorder %v300_v42, 8.507059e+37 }
  0xf5   :  { %v516_v51 = vmul.f32 %v499_v16, %v1104_v59  ;;  %v295_v11 = vadd.f32 %v1157_v35, %v294_v25  ;;  %vm1487_vm10 = vmmov %vm1484_vm4 }
  0xf6   :  { %v517_v10 = vpack.c.bf16 %v501_v2, %v501_v2  ;;  %vm1488_vm11 = vmmov %vm1484_vm4 }
  0xf7   :  { %v532_v47 = vpack.c.bf16 %v516_v51, %v516_v51  ;;  %582 = vrot.lane.b32.xlu2 %v1035_v9, %s824_s15  ;;  %v299_v19 = vsel %vm298_vm5, %v1157_v35, %v295_v11  ;;  %vm1489_vm12 = vmmov %vm1484_vm4 }
  0xf8   :  { %566 = vrot.lane.b32.xlu0 %v517_v10, %s824_s15  ;;  %534 = vst.msk [vmem:[%s1444_s3] sm:$0xf] %vm1485_vm9, %v517_v10  ;;  %v304_v46 = vsel %vm301_vm3, %v303_v6, %v299_v19  ;;  %vm1490_vm13 = vmmov %vm1484_vm4 }
  0xf9   :  { %549 = vst.msk [vmem:[%s1444_s3 + $0x3c] sm:$0xf] %vm1486_vm7, %v532_v47  ;;  %v503_v59 = vmul.f32 %v304_v46, %v938_v44  ;;  %vm1491_vm14 = vmmov %vm1484_vm4 }
  0xfa   :  { %vm1492_vm15 = vmmov %vm1484_vm4 }
  0xfb   :  { %v519_v38 = vpack.c.bf16 %v503_v59, %v503_v59  ;;  %vm1493_vm8 = vmmov %vm1484_vm4 }
  0xfc   :  { %vm1494_vm0 = vmmov %vm1484_vm4 }
  0xfd   :  { %570 = vrot.lane.b32.xlu1 %v519_v38, %s824_s15  ;;  %536 = vst.msk [vmem:[%s1444_s3 + $0x8] sm:$0xf] %vm1487_vm10, %v519_v38  ;;  %vm1495_vm6 = vmmov %vm1494_vm0 }
  0xfe   :  { %vm1496_vm2 = vmmov %vm1494_vm0 }
  0xff   :  { %576 = vrot.lane.b32.xlu2 %v1068_v34, %s824_s15  ;;  %vm1497_vm4 = vmmov %vm1494_vm0 }
 0x100   :  { %590 = vrot.lane.b32.xlu0 %v1041_v14, %s824_s15  ;;  %vm1498_vm1 = vmmov %vm1494_vm0 }
 0x101   :  { %vm1499_vm5 = vmmov %vm1494_vm0 }
 0x102   :  { %vm1500_vm9 = vmmov %vm1494_vm0 }
 0x103   :  { %vm1501_vm3 = vmmov %vm1494_vm0 }
 0x104   :  { %vm1502_vm7 = vmmov %vm1494_vm0 }
 0x105   :  { %586 = vrot.lane.b32.xlu1 %v1263_v50, %s824_s15  ;;  %vm1503_vm10 = vmmov %vm1494_vm0 }
 0x107   :  { %588 = vrot.lane.b32.xlu2 %v528_v43, %s824_s15 }
 0x108   :  { %568 = vrot.lane.b32.xlu0 %v1065_v27, %s824_s15 }
 0x10d   :  { %572 = vrot.lane.b32.xlu1 %v520_v52, %s824_s15 }
 0x10f   :  { %594 = vrot.lane.b32.xlu2 %v1270_v3, %s824_s15 }
 0x110   :  { %584 = vrot.lane.b32.xlu0 %v1095_v53, %s824_s15 }
 0x115   :  { %580 = vrot.lane.b32.xlu1 %v524_v28, %s824_s15 }
 0x118   :  { %578 = vrot.lane.b32.xlu0 %v1172_v54, %s824_s15 }
 0x11d   :  { %592 = vrot.lane.b32.xlu1 %v1124_v12, %s824_s15 }
 0x120   :  { %596 = vrot.lane.b32.xlu0 %v532_v47, %s824_s15 }
 0x149   :  { %v575_v44 = vpop.permute.xlu2 %574 }
 0x14a   :  { %618 = vst.msk [vmem:[%s1445_s4 + $0x10] sm:$0xf] %vm1488_vm11, %v575_v44 }
 0x151   :  { %v583_v9 = vpop.permute.xlu2 %582 }
 0x152   :  { %622 = vst.msk [vmem:[%s1445_s4 + $0x20] sm:$0xf] %vm1489_vm12, %v583_v9 }
 0x159   :  { %v577_v14 = vpop.permute.xlu2 %576 }
 0x15a   :  { %619 = vst.msk [vmem:[%s1445_s4 + $0x14] sm:$0xf] %vm1490_vm13, %v577_v14 }
 0x161   :  { %v589_v27 = vpop.permute.xlu2 %588 }
 0x162   :  { %625 = vst.msk [vmem:[%s1445_s4 + $0x2c] sm:$0xf] %vm1491_vm14, %v589_v27 }
 0x169   :  { %v595_v53 = vpop.permute.xlu2 %594 }
 0x16a   :  { %v567_v34 = vpop.permute.xlu0 %566  ;;  %628 = vst.msk [vmem:[%s1445_s4 + $0x38] sm:$0xf] %vm1493_vm8, %v595_v53 }
 0x16b   :  { %614 = vst.msk [vmem:[%s1445_s4] sm:$0xf] %vm1492_vm15, %v567_v34 }
 0x16f   :  { %v571_v12 = vpop.permute.xlu1 %570 }
 0x170   :  { %616 = vst.msk [vmem:[%s1445_s4 + $0x8] sm:$0xf] %vm1494_vm0, %v571_v12 }
 0x172   :  { %v591_v35 = vpop.permute.xlu0 %590 }
 0x173   :  { %626 = vst.msk [vmem:[%s1445_s4 + $0x30] sm:$0xf] %vm1495_vm6, %v591_v35 }
 0x177   :  { %v587_v54 = vpop.permute.xlu1 %586 }
 0x178   :  { %624 = vst.msk [vmem:[%s1445_s4 + $0x28] sm:$0xf] %vm1496_vm2, %v587_v54 }
 0x17a   :  { %v569_v30 = vpop.permute.xlu0 %568 }
 0x17b   :  { %615 = vst.msk [vmem:[%s1445_s4 + $0x4] sm:$0xf] %vm1497_vm4, %v569_v30 }
 0x17f   :  { %v573_v49 = vpop.permute.xlu1 %572 }
 0x180   :  { %617 = vst.msk [vmem:[%s1445_s4 + $0xc] sm:$0xf] %vm1498_vm1, %v573_v49 }
 0x182   :  { %v585_v63 = vpop.permute.xlu0 %584 }
 0x183   :  { %623 = vst.msk [vmem:[%s1445_s4 + $0x24] sm:$0xf] %vm1499_vm5, %v585_v63 }
 0x187   :  { %v581_v48 = vpop.permute.xlu1 %580 }
 0x188   :  { %621 = vst.msk [vmem:[%s1445_s4 + $0x1c] sm:$0xf] %vm1500_vm9, %v581_v48 }
 0x18a   :  { %v579_v15 = vpop.permute.xlu0 %578 }
 0x18b   :  { %620 = vst.msk [vmem:[%s1445_s4 + $0x18] sm:$0xf] %vm1501_vm3, %v579_v15 }
 0x18f   :  { %v593_v17 = vpop.permute.xlu1 %592 }
 0x190   :  { %627 = vst.msk [vmem:[%s1445_s4 + $0x34] sm:$0xf] %vm1502_vm7, %v593_v17 }
 0x192   :  { %v597_v50 = vpop.permute.xlu0 %596 }
 0x193   :  { %629 = vst.msk [vmem:[%s1445_s4 + $0x3c] sm:$0xf] %vm1503_vm10, %v597_v50 }

// kernel: _lambda_.7
= control target key start
LH: loop header
LB: loop body
LE: loop exit
PB: predicated region body
PF: predicated region fallthrough
CT: control target
= control target key end

     0   :  { %s1314_s0 = inlined_call_operand.vmem [shape: bf16[128,64], index: 0, kind: input, shape index: {}]   ;;  %s1315_s1 = inlined_call_operand.vmem [shape: bf16[128,64], index: 1, kind: input, shape index: {}]   ;;  %s1316_s2 = inlined_call_operand.vmem [shape: bf16[64,128], index: 2, kind: input, shape index: {}]   ;;  %s1317_s3 = inlined_call_operand.vmem [shape: bf16[64,128], index: 3, kind: input, shape index: {}]   ;;  %s1318_s4 = inlined_call_operand.vmem [shape: f32[1,128], index: 4, kind: input, shape index: {}]   ;;  %s1319_s5 = inlined_call_operand.hbm [shape: f32[128,128], index: 5, kind: output, shape index: {}]  }
   0x1   :  { %v870_v0 = vld [vmem:[%s1317_s3 + $0x18] sm:$0xff]  ;;  %v869_v2 = vld [vmem:[%s1317_s3 + $0x10] sm:$0xff]  ;;  %v868_v4 = vld [vmem:[%s1317_s3 + $0x8] sm:$0xff] }
   0x2   :  { %v858_v1 = vld [vmem:[%s1316_s2 + $0x18] sm:$0xff]  ;;  %163 = vmatpush.bf16.msra.mxu0 %v870_v0  ;;  %871 = vmatpush.bf16.msra.mxu2 %v870_v0  ;;  %v857_v3 = vld [vmem:[%s1316_s2 + $0x10] sm:$0xff] }
   0x3   :  { %300 = vmatpush.bf16.msra.mxu1 %v858_v1  ;;  %875 = vmatpush.bf16.msra.mxu3 %v858_v1 }
   0x6   :  { %164 = vmatpush.bf16.msra.mxu0 %v869_v2  ;;  %872 = vmatpush.bf16.msra.mxu2 %v869_v2 }
   0x7   :  { %10 = vsyncpa [#allocation3], 0  ;;  %301 = vmatpush.bf16.msra.mxu1 %v857_v3  ;;  %876 = vmatpush.bf16.msra.mxu3 %v857_v3  ;;  %v856_v5 = vld [vmem:[%s1316_s2 + $0x8] sm:$0xff]  ;;  %v867_v6 = vld [vmem:[%s1317_s3] sm:$0xff]  ;;  %vm134_vm0 = vcmask 523264   ;;  %s974_s16 = smov 128  }
   0x8   :  { %v855_v7 = vld [vmem:[%s1316_s2] sm:$0xff]  ;;  %v860_v12 = vld [vmem:[%s1315_s1 + $0x8] sm:$0xff]  ;;  %v861_v16 = vld [vmem:[%s1315_s1 + $0x10] sm:$0xff]  ;;  %s707_s2 = sshll.u32 %s1319_s5, 4  ;;  %s975_s17 = smov 8   ;;  %s708_s2 = int_to_ptr.hbm [resolvable:$true] %s707_s2 }
   0x9   :  { %v859_v8 = vld [vmem:[%s1315_s1] sm:$0xff]  ;;  %v864_v13 = vld [vmem:[%s1315_s1 + $0x28] sm:$0xff]  ;;  %v865_v17 = vld [vmem:[%s1315_s1 + $0x30] sm:$0xff] }
   0xa   :  { %165 = vmatpush.bf16.msra.mxu0 %v868_v4  ;;  %873 = vmatpush.bf16.msra.mxu2 %v868_v4  ;;  %v863_v9 = vld [vmem:[%s1315_s1 + $0x20] sm:$0xff]  ;;  %v848_v14 = vld [vmem:[%s1314_s0 + $0x8] sm:$0xff]  ;;  %v849_v18 = vld [vmem:[%s1314_s0 + $0x10] sm:$0xff] }
   0xb   :  { %302 = vmatpush.bf16.msra.mxu1 %v856_v5  ;;  %877 = vmatpush.bf16.msra.mxu3 %v856_v5  ;;  %v847_v10 = vld [vmem:[%s1314_s0] sm:$0xff]  ;;  %v852_v15 = vld [vmem:[%s1314_s0 + $0x28] sm:$0xff]  ;;  %v853_v19 = vld [vmem:[%s1314_s0 + $0x30] sm:$0xff] }
   0xc   :  { %v851_v11 = vld [vmem:[%s1314_s0 + $0x20] sm:$0xff]  ;;  %v862_v20 = vld [vmem:[%s1315_s1 + $0x18] sm:$0xff] }
   0xd   :  { %v866_v21 = vld [vmem:[%s1315_s1 + $0x38] sm:$0xff]  ;;  %v1097_v25 = vld [vmem:[%s1318_s4] ss:$0 sm:$0xff] }
   0xe   :  { %166 = vmatpush.bf16.msra.mxu0 %v867_v6  ;;  %874 = vmatpush.bf16.msra.mxu2 %v867_v6  ;;  %v850_v22 = vld [vmem:[%s1314_s0 + $0x18] sm:$0xff] }
   0xf   :  { %303 = vmatpush.bf16.msra.mxu1 %v855_v7  ;;  %878 = vmatpush.bf16.msra.mxu3 %v855_v7  ;;  %v854_v23 = vld [vmem:[%s1314_s0 + $0x38] sm:$0xff]  ;;  %s973_s0 = smov [#allocation2]  }
  0x10   :  { %s705_s1 = sshll.u32 %s973_s0, 4  ;;  %s706_s1 = int_to_ptr.vmem [resolvable:$true] %s705_s1 }
  0x11   :  { %767 = vmatmul.msk.bf16.vlgmr.msra.gmra.mxu0 %vm134_vm0, %v859_v8  ;;  %771 = vmatmul.msk.bf16.vlgmr.msra.gmra.mxu2 %vm134_vm0, %v863_v9 }
  0x12   :  { %823 = vmatmul.msk.bf16.vlgmr.msra.gmra.mxu1 %vm134_vm0, %v847_v10  ;;  %827 = vmatmul.msk.bf16.vlgmr.msra.gmra.mxu3 %vm134_vm0, %v851_v11 }
  0x21   :  { %768 = vmatmul.msk.bf16.gmra.mxu0 %vm134_vm0, %v860_v12  ;;  %772 = vmatmul.msk.bf16.gmra.mxu2 %vm134_vm0, %v864_v13 }
  0x22   :  { %824 = vmatmul.msk.bf16.gmra.mxu1 %vm134_vm0, %v848_v14  ;;  %828 = vmatmul.msk.bf16.gmra.mxu3 %vm134_vm0, %v852_v15 }
  0x31   :  { %769 = vmatmul.msk.bf16.gmra.mxu0 %vm134_vm0, %v861_v16  ;;  %773 = vmatmul.msk.bf16.gmra.mxu2 %vm134_vm0, %v865_v17 }
  0x32   :  { %825 = vmatmul.msk.bf16.gmra.mxu1 %vm134_vm0, %v849_v18  ;;  %829 = vmatmul.msk.bf16.gmra.mxu3 %vm134_vm0, %v853_v19 }
  0x41   :  { %770 = vmatmul.msk.bf16.gmra.mxu0 %vm134_vm0, %v862_v20  ;;  %774 = vmatmul.msk.bf16.gmra.mxu2 %vm134_vm0, %v866_v21 }
  0x42   :  { %826 = vmatmul.msk.bf16.gmra.mxu1 %vm134_vm0, %v850_v22  ;;  %830 = vmatmul.msk.bf16.gmra.mxu3 %vm134_vm0, %v854_v23 }
  0x8e   :  { %v168_v24 = vpop.f32.mrf.mxu0 }
  0x8f   :  { %v305_v26 = vpop.f32.mrf.mxu1 }
  0x90   :  { %v306_v27 = vadd.f32 %v305_v26, %v168_v24 }
  0x92   :  { %v1100_v28 = vadd.f32 %v1097_v25, %v306_v27 }
  0x94   :  { %v831_v29 = vmul.f32 -1.442695, %v1100_v28  ;;  %v188_v30 = vpop.f32.mrf.mxu2 }
  0x95   :  { %v325_v31 = vpop.f32.mrf.mxu3 }
  0x96   :  { %883 = vpow2.f32 %v831_v29  ;;  %v326_v32 = vadd.f32 %v325_v31, %v188_v30  ;;  %v170_v33 = vpop.f32.mrf.mxu0 }
  0x97   :  { %v307_v34 = vpop.f32.mrf.mxu1 }
  0x98   :  { %v1104_v35 = vadd.f32 %v1097_v25, %v326_v32  ;;  %v308_v36 = vadd.f32 %v307_v34, %v170_v33 }
  0x9a   :  { %v839_v37 = vmul.f32 -1.442695, %v1104_v35  ;;  %v1108_v38 = vadd.f32 %v1097_v25, %v308_v36 }
  0x9c   :  { %v884_v39 = vpop.eup %883  ;;  %885 = vpow2.f32 %v839_v37  ;;  %v832_v40 = vmul.f32 -1.442695, %v1108_v38  ;;  %v190_v41 = vpop.f32.mrf.mxu2 }
  0x9d   :  { %v413_v42 = vadd.f32 1.0, %v884_v39  ;;  %v327_v43 = vpop.f32.mrf.mxu3 }
  0x9e   :  { %887 = vpow2.f32 %v832_v40  ;;  %v328_v44 = vadd.f32 %v327_v43, %v190_v41  ;;  %v173_v45 = vpop.f32.mrf.mxu0 }
  0x9f   :  { %889 = vrcp.f32 %v413_v42  ;;  %v310_v46 = vpop.f32.mrf.mxu1  ;;  %v438_v59 = vand.u32 2147483647, %v413_v42  ;;  %v440_v62 = vand.u32 2147483648, %v413_v42  ;;  %vm434_vm1 = vweird.f32 %v413_v42 }
  0xa0   :  { %v1112_v47 = vadd.f32 %v1097_v25, %v328_v44  ;;  %v311_v48 = vadd.f32 %v310_v46, %v173_v45 }
  0xa1   :  { %vm1129_vm3 = vcmp.eq.f32.partialorder %v438_v59, 8.507059e+37  ;;  %v441_v9 = vor.u32 1.1754944e-38, %v440_v62 }
  0xa2   :  { %v886_v49 = vpop.eup %885  ;;  %v840_v50 = vmul.f32 -1.442695, %v1112_v47  ;;  %v1116_v51 = vadd.f32 %v1097_v25, %v311_v48 }
  0xa3   :  { %v1118_v52 = vadd.f32 1.0, %v886_v49 }
  0xa4   :  { %v888_v53 = vpop.eup %887  ;;  %891 = vpow2.f32 %v840_v50  ;;  %v833_v54 = vmul.f32 -1.442695, %v1116_v51  ;;  %v193_v55 = vpop.f32.mrf.mxu2 }
  0xa5   :  { %v890_v56 = vpop.eup %889  ;;  %893 = vrcp.f32 %v1118_v52  ;;  %v330_v57 = vpop.f32.mrf.mxu3  ;;  %v1122_v60 = vadd.f32 1.0, %v888_v53  ;;  %v558_v2 = vand.u32 2147483647, %v1118_v52  ;;  %v560_v10 = vand.u32 2147483648, %v1118_v52 }
  0xa6   :  { %v430_v58 = vmul.f32 %v890_v56, %v413_v42  ;;  %895 = vpow2.f32 %v833_v54  ;;  %v175_v61 = vpop.f32.mrf.mxu0  ;;  %v331_v63 = vadd.f32 %v330_v57, %v193_v55  ;;  %vm435_vm2 = vweird.f32 %v890_v56 }
  0xa7   :  { %v312_v0 = vpop.f32.mrf.mxu1  ;;  %897 = vrcp.f32 %v1122_v60  ;;  %vm554_vm4 = vweird.f32 %v1118_v52  ;;  %vm1139_vm5 = vcmp.eq.f32.partialorder %v558_v2, 8.507059e+37  ;;  %vm436_vm6 = vmor %vm434_vm1, %vm435_vm2  ;;  %v453_v18 = vand.u32 2147483647, %v1122_v60 }
  0xa8   :  { %v431_v1 = vsub.f32 1.0, %v430_v58  ;;  %v1127_v3 = vadd.f32 %v1097_v25, %v331_v63  ;;  %v313_v4 = vadd.f32 %v312_v0, %v175_v61  ;;  %v455_v19 = vand.u32 2147483648, %v1122_v60 }
  0xa9   :  { %v561_v30 = vor.u32 1.1754944e-38, %v560_v10  ;;  %vm449_vm8 = vweird.f32 %v1122_v60  ;;  %vm1158_vm9 = vcmp.eq.f32.partialorder %v453_v18, 8.507059e+37 }
  0xaa   :  { %v892_v5 = vpop.eup %891  ;;  %v432_v6 = vmul.f32 %v890_v56, %v431_v1  ;;  %v841_v12 = vmul.f32 -1.442695, %v1127_v3  ;;  %v1147_v20 = vadd.f32 %v1097_v25, %v313_v4  ;;  %v456_v40 = vor.u32 1.1754944e-38, %v455_v19 }
  0xab   :  { %v894_v8 = vpop.eup %893  ;;  %v1134_v11 = vadd.f32 1.0, %v892_v5 }
  0xac   :  { %v896_v13 = vpop.eup %895  ;;  %v433_v14 = vadd.f32 %v890_v56, %v432_v6  ;;  %v550_v15 = vmul.f32 %v894_v8, %v1118_v52  ;;  %v195_v17 = vpop.f32.mrf.mxu2  ;;  %vm555_vm7 = vweird.f32 %v894_v8  ;;  %v834_v42 = vmul.f32 -1.442695, %v1147_v20 }
  0xad   :  { %899 = vrcp.f32 %v1134_v11  ;;  %v332_v21 = vpop.f32.mrf.mxu3  ;;  %v898_v22 = vpop.eup %897  ;;  %v1149_v26 = vadd.f32 1.0, %v896_v13  ;;  %v573_v36 = vand.u32 2147483647, %v1134_v11  ;;  %vm556_vm10 = vmor %vm554_vm4, %vm555_vm7  ;;  %vm569_vm12 = vweird.f32 %v1134_v11 }
  0xae   :  { %v437_v23 = vsel %vm436_vm6, %v890_v56, %v433_v14  ;;  %v551_v24 = vsub.f32 1.0, %v550_v15  ;;  %901 = vpow2.f32 %v841_v12  ;;  %v178_v27 = vpop.f32.mrf.mxu0  ;;  %v445_v31 = vmul.f32 %v898_v22, %v1122_v60 }
  0xaf   :  { %v442_v29 = vsel %vm1129_vm3, %v441_v9, %v437_v23  ;;  %v315_v32 = vpop.f32.mrf.mxu1  ;;  %903 = vrcp.f32 %v1149_v26  ;;  %v333_v43 = vadd.f32 %v332_v21, %v195_v17  ;;  %vm450_vm11 = vweird.f32 %v898_v22 }
  0xb0   :  { %v669_v33 = vmul.f32 %v442_v29, %v1100_v28  ;;  %v552_v34 = vmul.f32 %v894_v8, %v551_v24  ;;  %v446_v37 = vsub.f32 1.0, %v445_v31  ;;  %v316_v44 = vadd.f32 %v315_v32, %v178_v27  ;;  %vm451_vm14 = vmor %vm449_vm8, %vm450_vm11 }
  0xb1   :  { %v575_v46 = vand.u32 2147483648, %v1134_v11  ;;  %vm1169_vm13 = vcmp.eq.f32.partialorder %v573_v36, 8.507059e+37  ;;  %905 = vpow2.f32 %v834_v42  ;;  %v1178_v57 = vadd.f32 %v1097_v25, %v333_v43 }
  0xb2   :  { %685 = vst [vmem:[#allocation2] sm:$0xff] %v669_v33  ;;  %v553_v41 = vadd.f32 %v894_v8, %v552_v34  ;;  %v447_v45 = vmul.f32 %v898_v22, %v446_v37  ;;  %v1185_v63 = vadd.f32 %v1097_v25, %v316_v44  ;;  %vm464_vm0 = vweird.f32 %v1149_v26 }
  0xb3   :  { %v900_v28 = vpop.eup %899  ;;  %v576_v4 = vor.u32 1.1754944e-38, %v575_v46  ;;  %v468_v9 = vand.u32 2147483647, %v1149_v26  ;;  %v842_v10 = vmul.f32 -1.442695, %v1178_v57  ;;  %v470_v14 = vand.u32 2147483648, %v1149_v26 }
  0xb4   :  { %v902_v48 = vpop.eup %901  ;;  %v557_v49 = vsel %vm556_vm10, %v894_v8, %v553_v41  ;;  %v565_v50 = vmul.f32 %v900_v28, %v1134_v11  ;;  %v198_v54 = vpop.f32.mrf.mxu2  ;;  %v448_v55 = vadd.f32 %v898_v22, %v447_v45  ;;  %vm570_vm15 = vweird.f32 %v900_v28 }
  0xb5   :  { %v562_v52 = vsel %vm1139_vm5, %v561_v30, %v557_v49  ;;  %v1175_v56 = vadd.f32 1.0, %v902_v48  ;;  %v335_v58 = vpop.f32.mrf.mxu3  ;;  %v904_v59 = vpop.eup %903  ;;  %v835_v15 = vmul.f32 -1.442695, %v1185_v63  ;;  %vm571_vm1 = vmor %vm569_vm12, %vm570_vm15  ;;  %v471_v30 = vor.u32 1.1754944e-38, %v470_v14 }
  0xb6   :  { %v677_v61 = vmul.f32 %v562_v52, %v1104_v35  ;;  %v566_v62 = vsub.f32 1.0, %v565_v50  ;;  %v336_v0 = vadd.f32 %v335_v58, %v198_v54  ;;  %v180_v1 = vpop.f32.mrf.mxu0  ;;  %v452_v2 = vsel %vm451_vm14, %v898_v22, %v448_v55 }
  0xb7   :  { %v460_v5 = vmul.f32 %v904_v59, %v1149_v26  ;;  %907 = vrcp.f32 %v1175_v56  ;;  %v317_v6 = vpop.f32.mrf.mxu1  ;;  %v457_v35 = vsel %vm1158_vm9, %v456_v40, %v452_v2  ;;  %v906_v12 = vpop.eup %905  ;;  %vm465_vm2 = vweird.f32 %v904_v59 }
  0xb8   :  { %693 = vst [vmem:[#allocation2 + $0x40] sm:$0xff] %v677_v61  ;;  %v567_v7 = vmul.f32 %v900_v28, %v566_v62  ;;  %v670_v60 = vmul.f32 %v457_v35, %v1108_v38  ;;  %v1198_v16 = vadd.f32 %v1097_v25, %v336_v0  ;;  %v1202_v38 = vadd.f32 1.0, %v906_v12  ;;  %vm466_vm3 = vmor %vm464_vm0, %vm465_vm2 }
  0xb9   :  { %v461_v8 = vsub.f32 1.0, %v460_v5  ;;  %909 = vpow2.f32 %v842_v10  ;;  %v318_v21 = vadd.f32 %v317_v6, %v180_v1  ;;  %vm469_vm4 = vcmp.eq.f32.partialorder %v468_v9, 8.507059e+37 }
  0xba   :  { %v568_v13 = vadd.f32 %v900_v28, %v567_v7  ;;  %686 = vst [vmem:[#allocation2 + $0x8] sm:$0xff] %v670_v60  ;;  %911 = vpow2.f32 %v835_v15  ;;  %v843_v19 = vmul.f32 -1.442695, %v1198_v16  ;;  %v588_v26 = vand.u32 2147483647, %v1175_v56 }
  0xbb   :  { %v462_v17 = vmul.f32 %v904_v59, %v461_v8  ;;  %913 = vrcp.f32 %v1202_v38  ;;  %v1213_v33 = vadd.f32 %v1097_v25, %v318_v21  ;;  %v590_v41 = vand.u32 2147483648, %v1175_v56 }
  0xbc   :  { %v572_v18 = vsel %vm571_vm1, %v900_v28, %v568_v13  ;;  %v200_v27 = vpop.f32.mrf.mxu2  ;;  %915 = vpow2.f32 %v843_v19  ;;  %vm584_vm6 = vweird.f32 %v1175_v56  ;;  %v483_v52 = vand.u32 2147483647, %v1202_v38 }
  0xbd   :  { %v908_v22 = vpop.eup %907  ;;  %v577_v23 = vsel %vm1169_vm13, %v576_v4, %v572_v18  ;;  %v463_v24 = vadd.f32 %v904_v59, %v462_v17  ;;  %v337_v11 = vpop.f32.mrf.mxu3  ;;  %v836_v42 = vmul.f32 -1.442695, %v1213_v33  ;;  %v591_v54 = vor.u32 1.1754944e-38, %v590_v41 }
  0xbe   :  { %v678_v29 = vmul.f32 %v577_v23, %v1112_v47  ;;  %v580_v31 = vmul.f32 %v908_v22, %v1175_v56  ;;  %v183_v37 = vpop.f32.mrf.mxu0  ;;  %vm585_vm5 = vweird.f32 %v908_v22  ;;  %v338_v45 = vadd.f32 %v337_v11, %v200_v27 }
  0xbf   :  { %v467_v32 = vsel %vm466_vm3, %v904_v59, %v463_v24  ;;  %v320_v39 = vpop.f32.mrf.mxu1  ;;  %v910_v40 = vpop.eup %909  ;;  %917 = vpow2.f32 %v836_v42  ;;  %vm586_vm7 = vmor %vm584_vm6, %vm585_vm5  ;;  %v485_v55 = vand.u32 2147483648, %v1202_v38  ;;  %vm589_vm8 = vcmp.eq.f32.partialorder %v588_v26, 8.507059e+37 }
  0xc0   :  { %694 = vst [vmem:[#allocation2 + $0x48] sm:$0xff] %v678_v29  ;;  %v472_v34 = vsel %vm469_vm4, %v471_v30, %v467_v32  ;;  %v581_v36 = vsub.f32 1.0, %v580_v31  ;;  %v912_v43 = vpop.eup %911  ;;  %v1219_v28 = vadd.f32 1.0, %v910_v40  ;;  %v321_v49 = vadd.f32 %v320_v39, %v183_v37 }
  0xc1   :  { %v671_v47 = vmul.f32 %v472_v34, %v1116_v51  ;;  %v914_v46 = vpop.eup %913  ;;  %v1221_v48 = vadd.f32 1.0, %v912_v43  ;;  %v1230_v61 = vadd.f32 %v1097_v25, %v338_v45  ;;  %vm479_vm10 = vweird.f32 %v1202_v38 }
  0xc2   :  { %v582_v44 = vmul.f32 %v908_v22, %v581_v36  ;;  %v475_v51 = vmul.f32 %v914_v46, %v1202_v38  ;;  %919 = vrcp.f32 %v1219_v28  ;;  %v916_v53 = vpop.eup %915  ;;  %vm480_vm9 = vweird.f32 %v914_v46 }
  0xc3   :  { %687 = vst [vmem:[#allocation2 + $0x10] sm:$0xff] %v671_v47  ;;  %921 = vrcp.f32 %v1221_v48  ;;  %v603_v62 = vand.u32 2147483647, %v1219_v28  ;;  %v1234_v0 = vadd.f32 %v1097_v25, %v321_v49  ;;  %v605_v6 = vand.u32 2147483648, %v1219_v28  ;;  %vm481_vm14 = vmor %vm479_vm10, %vm480_vm9 }
  0xc4   :  { %v583_v50 = vadd.f32 %v908_v22, %v582_v44  ;;  %v476_v59 = vsub.f32 1.0, %v475_v51  ;;  %v203_v1 = vpop.f32.mrf.mxu2  ;;  %v1238_v35 = vadd.f32 1.0, %v916_v53  ;;  %vm1241_vm11 = vcmp.eq.f32.partialorder %v483_v52, 8.507059e+37 }
  0xc5   :  { %v340_v2 = vpop.f32.mrf.mxu3  ;;  %v918_v7 = vpop.eup %917  ;;  %v486_v8 = vor.u32 1.1754944e-38, %v485_v55  ;;  %vm599_vm12 = vweird.f32 %v1219_v28  ;;  %vm494_vm13 = vweird.f32 %v1221_v48  ;;  %vm1251_vm15 = vcmp.eq.f32.partialorder %v603_v62, 8.507059e+37 }
  0xc6   :  { %v587_v58 = vsel %vm586_vm7, %v908_v22, %v583_v50  ;;  %v477_v5 = vmul.f32 %v914_v46, %v476_v59  ;;  %923 = vrcp.f32 %v1238_v35  ;;  %v1255_v15 = vadd.f32 1.0, %v918_v7  ;;  %v185_v11 = vpop.f32.mrf.mxu0 }
  0xc7   :  { %v592_v56 = vsel %vm589_vm8, %v591_v54, %v587_v58  ;;  %v844_v17 = vmul.f32 -1.442695, %v1230_v61  ;;  %v341_v38 = vadd.f32 %v340_v2, %v203_v1  ;;  %v606_v19 = vor.u32 1.1754944e-38, %v605_v6  ;;  %v322_v29 = vpop.f32.mrf.mxu1 }
  0xc8   :  { %v679_v4 = vmul.f32 %v592_v56, %v1127_v3  ;;  %v920_v9 = vpop.eup %919  ;;  %v478_v10 = vadd.f32 %v914_v46, %v477_v5  ;;  %v498_v3 = vand.u32 2147483647, %v1221_v48  ;;  %v837_v22 = vmul.f32 -1.442695, %v1234_v0 }
  0xc9   :  { %v922_v12 = vpop.eup %921  ;;  %v595_v13 = vmul.f32 %v920_v9, %v1219_v28  ;;  %v500_v27 = vand.u32 2147483648, %v1221_v48  ;;  %925 = vrcp.f32 %v1255_v15  ;;  %v620_v34 = vand.u32 2147483648, %v1238_v35 }
  0xca   :  { %695 = vst [vmem:[#allocation2 + $0x50] sm:$0xff] %v679_v4  ;;  %v482_v18 = vsel %vm481_vm14, %v914_v46, %v478_v10  ;;  %v490_v21 = vmul.f32 %v922_v12, %v1221_v48  ;;  %vm1265_vm0 = vcmp.eq.f32.partialorder %v498_v3, 8.507059e+37  ;;  %vm600_vm1 = vweird.f32 %v920_v9 }
  0xcb   :  { %v487_v23 = vsel %vm1241_vm11, %v486_v8, %v482_v18  ;;  %v596_v24 = vsub.f32 1.0, %v595_v13  ;;  %927 = vpow2.f32 %v844_v17  ;;  %v1271_v37 = vadd.f32 %v1097_v25, %v341_v38  ;;  %vm601_vm4 = vmor %vm599_vm12, %vm600_vm1 }
  0xcc   :  { %v672_v30 = vmul.f32 %v487_v23, %v1147_v20  ;;  %v491_v31 = vsub.f32 1.0, %v490_v21  ;;  %v924_v39 = vpop.eup %923  ;;  %vm495_vm2 = vweird.f32 %v922_v12  ;;  %929 = vpow2.f32 %v837_v22  ;;  %v205_v42 = vpop.f32.mrf.mxu2 }
  0xcd   :  { %v597_v36 = vmul.f32 %v920_v9, %v596_v24  ;;  %v323_v47 = vadd.f32 %v322_v29, %v185_v11  ;;  %v501_v26 = vor.u32 1.1754944e-38, %v500_v27  ;;  %v610_v41 = vmul.f32 %v924_v39, %v1238_v35  ;;  %v342_v43 = vpop.f32.mrf.mxu3  ;;  %vm496_vm5 = vmor %vm494_vm13, %vm495_vm2 }
  0xce   :  { %688 = vst [vmem:[#allocation2 + $0x18] sm:$0xff] %v672_v30  ;;  %v492_v40 = vmul.f32 %v922_v12, %v491_v31  ;;  %vm614_vm3 = vweird.f32 %v1238_v35  ;;  %v618_v45 = vand.u32 2147483647, %v1238_v35  ;;  %v621_v46 = vor.u32 1.1754944e-38, %v620_v34 }
  0xcf   :  { %v598_v20 = vadd.f32 %v920_v9, %v597_v36  ;;  %v845_v49 = vmul.f32 -1.442695, %v1271_v37  ;;  %v926_v50 = vpop.eup %925  ;;  %v611_v53 = vsub.f32 1.0, %v610_v41  ;;  %vm615_vm6 = vweird.f32 %v924_v39 }
  0xd0   :  { %v493_v44 = vadd.f32 %v922_v12, %v492_v40  ;;  %v1284_v54 = vadd.f32 %v1097_v25, %v323_v47  ;;  %v505_v55 = vmul.f32 %v926_v50, %v1255_v15  ;;  %v343_v58 = vadd.f32 %v342_v43, %v205_v42  ;;  %vm616_vm7 = vmor %vm614_vm3, %vm615_vm6 }
  0xd1   :  { %v602_v51 = vsel %vm601_vm4, %v920_v9, %v598_v20  ;;  %v928_v59 = vpop.eup %927  ;;  %v612_v48 = vmul.f32 %v924_v39, %v611_v53  ;;  %931 = vpow2.f32 %v845_v49  ;;  %v513_v5 = vand.u32 2147483647, %v1255_v15 }
  0xd2   :  { %v607_v28 = vsel %vm1251_vm15, %v606_v19, %v602_v51  ;;  %v497_v52 = vsel %vm496_vm5, %v922_v12, %v493_v44  ;;  %v930_v1 = vpop.eup %929  ;;  %v506_v4 = vsub.f32 1.0, %v505_v55  ;;  %v426_v6 = vadd.f32 1.0, %v928_v59 }
  0xd3   :  { %v680_v56 = vmul.f32 %v607_v28, %v1178_v57  ;;  %v502_v62 = vsel %vm1265_vm0, %v501_v26, %v497_v52  ;;  %v613_v7 = vadd.f32 %v924_v39, %v612_v48  ;;  %v515_v60 = vand.u32 2147483648, %v1255_v15 }
  0xd4   :  { %v673_v2 = vmul.f32 %v502_v62, %v1185_v63  ;;  %v419_v8 = vadd.f32 1.0, %v930_v1  ;;  %v838_v9 = vmul.f32 -1.442695, %v1284_v54  ;;  %v507_v57 = vmul.f32 %v926_v50, %v506_v4 }
  0xd5   :  { %696 = vst [vmem:[#allocation2 + $0x58] sm:$0xff] %v680_v56  ;;  %vm510_vm8 = vweird.f32 %v926_v50  ;;  %933 = vrcp.f32 %v426_v6  ;;  %v1300_v63 = vadd.f32 %v1097_v25, %v343_v58  ;;  %v617_v10 = vsel %vm616_vm7, %v924_v39, %v613_v7 }
  0xd6   :  { %689 = vst [vmem:[#allocation2 + $0x20] sm:$0xff] %v673_v2  ;;  %vm619_vm9 = vcmp.eq.f32.partialorder %v618_v45, 8.507059e+37  ;;  %935 = vrcp.f32 %v419_v8  ;;  %v508_v12 = vadd.f32 %v926_v50, %v507_v57  ;;  %vm509_vm10 = vweird.f32 %v1255_v15 }
  0xd7   :  { %v622_v3 = vsel %vm619_vm9, %v621_v46, %v617_v10  ;;  %v932_v13 = vpop.eup %931  ;;  %vm511_vm11 = vmor %vm509_vm10, %vm510_vm8  ;;  %v516_v17 = vor.u32 1.1754944e-38, %v515_v60  ;;  %937 = vpow2.f32 %v838_v9  ;;  %vm514_vm12 = vcmp.eq.f32.partialorder %v513_v5, 8.507059e+37 }
  0xd8   :  { %v681_v14 = vmul.f32 %v622_v3, %v1198_v16  ;;  %v512_v35 = vsel %vm511_vm11, %v926_v50, %v508_v12  ;;  %v427_v38 = vadd.f32 1.0, %v932_v13  ;;  %v846_v18 = vmul.f32 -1.442695, %v1300_v63 }
  0xd9   :  { %v517_v25 = vsel %vm514_vm12, %v516_v17, %v512_v35  ;;  %v633_v27 = vand.u32 2147483647, %v426_v6  ;;  %v635_v11 = vand.u32 2147483648, %v426_v6  ;;  %v528_v30 = vand.u32 2147483647, %v419_v8 }
  0xda   :  { %697 = vst [vmem:[#allocation2 + $0x60] sm:$0xff] %v681_v14  ;;  %v674_v21 = vmul.f32 %v517_v25, %v1213_v33  ;;  %939 = vrcp.f32 %v427_v38  ;;  %v530_v34 = vand.u32 2147483648, %v419_v8  ;;  %vm524_vm14 = vweird.f32 %v419_v8 }
  0xdb   :  { %v934_v19 = vpop.eup %933  ;;  %941 = vpow2.f32 %v846_v18  ;;  %vm629_vm0 = vweird.f32 %v426_v6  ;;  %vm634_vm1 = vcmp.eq.f32.partialorder %v633_v27, 8.507059e+37  ;;  %v636_v20 = vor.u32 1.1754944e-38, %v635_v11 }
  0xdc   :  { %v936_v22 = vpop.eup %935  ;;  %v625_v23 = vmul.f32 %v934_v19, %v426_v6  ;;  %690 = vst [vmem:[#allocation2 + $0x28] sm:$0xff] %v674_v21  ;;  %vm630_vm13 = vweird.f32 %v934_v19  ;;  %vm529_vm3 = vcmp.eq.f32.partialorder %v528_v30, 8.507059e+37  ;;  %v531_v43 = vor.u32 1.1754944e-38, %v530_v34 }
  0xdd   :  { %v520_v15 = vmul.f32 %v936_v22, %v419_v8  ;;  %v938_v16 = vpop.eup %937  ;;  %vm525_vm15 = vweird.f32 %v936_v22  ;;  %vm631_vm2 = vmor %vm629_vm0, %vm630_vm13  ;;  %v648_v45 = vand.u32 2147483647, %v427_v38  ;;  %v650_v50 = vand.u32 2147483648, %v427_v38 }
  0xde   :  { %v626_v24 = vsub.f32 1.0, %v625_v23  ;;  %v420_v31 = vadd.f32 1.0, %v938_v16  ;;  %vm526_vm4 = vmor %vm524_vm14, %vm525_vm15  ;;  %vm644_vm6 = vweird.f32 %v427_v38 }
  0xdf   :  { %v521_v29 = vsub.f32 1.0, %v520_v15  ;;  %v651_v56 = vor.u32 1.1754944e-38, %v650_v50  ;;  %vm649_vm8 = vcmp.eq.f32.partialorder %v648_v45, 8.507059e+37 }
  0xe0   :  { %v627_v32 = vmul.f32 %v934_v19, %v626_v24  ;;  %v940_v36 = vpop.eup %939  ;;  %943 = vrcp.f32 %v420_v31  ;;  %v543_v4 = vand.u32 2147483647, %v420_v31  ;;  %vm539_vm10 = vweird.f32 %v420_v31 }
  0xe1   :  { %v522_v39 = vmul.f32 %v936_v22, %v521_v29  ;;  %v942_v33 = vpop.eup %941  ;;  %v640_v47 = vmul.f32 %v940_v36, %v427_v38  ;;  %vm645_vm5 = vweird.f32 %v940_v36 }
  0xe2   :  { %v628_v40 = vadd.f32 %v934_v19, %v627_v32  ;;  %v428_v41 = vadd.f32 1.0, %v942_v33  ;;  %vm646_vm7 = vmor %vm644_vm6, %vm645_vm5  ;;  %vm544_vm12 = vcmp.eq.f32.partialorder %v543_v4, 8.507059e+37 }
  0xe3   :  { %v523_v26 = vadd.f32 %v936_v22, %v522_v39  ;;  %v641_v44 = vsub.f32 1.0, %v640_v47 }
  0xe4   :  { %v632_v42 = vsel %vm631_vm2, %v934_v19, %v628_v40  ;;  %945 = vrcp.f32 %v428_v41  ;;  %v665_v9 = vand.u32 2147483648, %v428_v41  ;;  %v663_v3 = vand.u32 2147483647, %v428_v41 }
  0xe5   :  { %v637_v46 = vsel %vm634_vm1, %v636_v20, %v632_v42  ;;  %v527_v49 = vsel %vm526_vm4, %v936_v22, %v523_v26  ;;  %v642_v28 = vmul.f32 %v940_v36, %v641_v44  ;;  %vm659_vm14 = vweird.f32 %v428_v41 }
  0xe6   :  { %v682_v51 = vmul.f32 %v637_v46, %v1230_v61  ;;  %v532_v53 = vsel %vm529_vm3, %v531_v43, %v527_v49  ;;  %v944_v52 = vpop.eup %943  ;;  %v545_v61 = vand.u32 2147483648, %v420_v31  ;;  %vm664_vm0 = vcmp.eq.f32.partialorder %v663_v3, 8.507059e+37 }
  0xe7   :  { %v675_v55 = vmul.f32 %v532_v53, %v1234_v0  ;;  %v643_v58 = vadd.f32 %v940_v36, %v642_v28  ;;  %v535_v59 = vmul.f32 %v944_v52, %v420_v31  ;;  %vm540_vm9 = vweird.f32 %v944_v52 }
  0xe8   :  { %698 = vst [vmem:[#allocation2 + $0x68] sm:$0xff] %v682_v51  ;;  %vm541_vm11 = vmor %vm539_vm10, %vm540_vm9  ;;  %v546_v8 = vor.u32 1.1754944e-38, %v545_v61 }
  0xe9   :  { %691 = vst [vmem:[#allocation2 + $0x30] sm:$0xff] %v675_v55  ;;  %v647_v62 = vsel %vm646_vm7, %v940_v36, %v643_v58  ;;  %v536_v48 = vsub.f32 1.0, %v535_v59 }
  0xea   :  { %v946_v1 = vpop.eup %945  ;;  %v652_v2 = vsel %vm649_vm8, %v651_v56, %v647_v62 }
  0xeb   :  { %v683_v5 = vmul.f32 %v652_v2, %v1271_v37  ;;  %v537_v6 = vmul.f32 %v944_v52, %v536_v48  ;;  %v655_v7 = vmul.f32 %v946_v1, %v428_v41  ;;  %vm660_vm13 = vweird.f32 %v946_v1 }
  0xec   :  { %vm661_vm15 = vmor %vm659_vm14, %vm660_vm13  ;;  %v666_v37 = vor.u32 1.1754944e-38, %v665_v9 }
  0xed   :  { %699 = vst [vmem:[#allocation2 + $0x70] sm:$0xff] %v683_v5  ;;  %v538_v0 = vadd.f32 %v944_v52, %v537_v6  ;;  %v656_v60 = vsub.f32 1.0, %v655_v7 }
  0xef   :  { %v542_v57 = vsel %vm541_vm11, %v944_v52, %v538_v0  ;;  %v657_v10 = vmul.f32 %v946_v1, %v656_v60 }
  0xf0   :  { %v547_v12 = vsel %vm544_vm12, %v546_v8, %v542_v57 }
  0xf1   :  { %v676_v13 = vmul.f32 %v547_v12, %v1284_v54  ;;  %v658_v14 = vadd.f32 %v946_v1, %v657_v10 }
  0xf3   :  { %692 = vst [vmem:[#allocation2 + $0x38] sm:$0xff] %v676_v13  ;;  %v662_v17 = vsel %vm661_vm15, %v946_v1, %v658_v14 }
  0xf4   :  { %v667_v35 = vsel %vm664_vm0, %v666_v37, %v662_v17 }
  0xf5   :  { %v684_v38 = vmul.f32 %v667_v35, %v1300_v63 }
  0xf7   :  { %700 = vst [vmem:[#allocation2 + $0x78] sm:$0xff] %v684_v38 }
  0xf8   :  { %713 = dma.vmem_to_hbm [thread:$0]  %s706_s1, 2048, %s708_s2, [#allocation3], %s974_s16, %s974_s16, %s975_s17  }
  0xf9   :  { %971 = dma.done.wait [#allocation3], 2048  }
  0xfa   :  { %972 = vsyncadd [#allocation3], 4294965248 }
  0xfb   :  { %718 = vsyncpa [#allocation3], 1 }

// kernel: _lambda_.5
= control target key start
LH: loop header
LB: loop body
LE: loop exit
PB: predicated region body
PF: predicated region fallthrough
CT: control target
= control target key end

     0   :  { %s2347_s17 = smov 0   ;;  %s3181_s0 = inlined_call_operand.vmem [shape: bf16[128,64], index: 0, kind: input, shape index: {}]   ;;  %s3182_s1 = inlined_call_operand.vmem [shape: bf16[64,128], index: 1, kind: input, shape index: {}]   ;;  %s3183_s2 = inlined_call_operand.vmem [shape: f32[1,128], index: 2, kind: input, shape index: {}]   ;;  %s3184_s3 = inlined_call_operand.vmem [shape: f32[9,64], index: 3, kind: input, shape index: {}]   ;;  %s3185_s4 = inlined_call_operand.vmem [shape: f32[1,64], index: 4, kind: input, shape index: {}]   ;;  %s3186_s5 = inlined_call_operand.vmem [shape: bf16[64,64], index: 5, kind: input, shape index: {}]   ;;  %s3187_s6 = inlined_call_operand.vmem [shape: f32[1,64], index: 6, kind: input, shape index: {}]   ;;  %s3188_s7 = inlined_call_operand.vmem [shape: bf16[64,128], index: 7, kind: input, shape index: {}]   ;;  %s3189_s8 = inlined_call_operand.vmem [shape: f32[1,128], index: 8, kind: input, shape index: {}]   ;;  %s3190_s9 = inlined_call_operand.vmem [shape: bf16[128,64], index: 9, kind: input, shape index: {}]   ;;  %s3191_s10 = inlined_call_operand.vmem [shape: f32[1,64], index: 10, kind: input, shape index: {}]   ;;  %s3192_s11 = inlined_call_operand.vmem [shape: bf16[128,64], index: 11, kind: output, shape index: {}]  }
   0x1 LB: > { %s2004_s18 = sadd.s32 4294967295, %s2282_s17   ;;  %p2008_p0 = scmp.ge.s32.totalorder %s2282_s17, 1  ;;  %s2282_s17 = sphi %s2347_s17, %s21_s17  }
   0x2   : > { %p338_p1 = scmp.lt.s32.totalorder %s2282_s17, 3 }
   0x4   : > { %p339_p2 = pnand %p2008_p0, %p338_p1 }
   0x6   : > { %342 = sbr.rel (%p339_p2) target bundleno = 1549 (0x60d), region = 64 }
   0xb   : > { %v2162_v0 = vld [vmem:[%s3182_s1 + $0x18] sm:$0xff]  ;;  %s2009_s21 = sshll.u32 %s2004_s18, 3  ;;  %v2161_v1 = vld [vmem:[%s3182_s1 + $0x10] sm:$0xff]  ;;  %v2160_v2 = vld [vmem:[%s3182_s1 + $0x8] sm:$0xff]  ;;  %vm463_vm0 = vcmask 523264   ;;  %vm688_vm1 = vcmask 516096   ;;  %v732_v50 = vlaneseq }
   0xc   : > { %p379_p3 = scmp.lt.s32.totalorder %s2009_s21, 15  ;;  %480 = vmatpush.bf16.msra.mxu1 %v2162_v0  ;;  %2179 = vmatpush.bf16.msra.mxu3 %v2162_v0  ;;  %v2159_v3 = vld [vmem:[%s3182_s1] sm:$0xff]  ;;  %v3195_v13 = vmov 0.0   ;;  %s2285_s15 = smov 64   ;;  %vm541_vm3 = vcmask 261120  }
   0xd   : > { %v2198_v9 = vld [vmem:[%s3183_s2] ss:$0 sm:$0xff]  ;;  %687 = vst.msk [vmem:[#allocation3 + $0x7] sm:$0xff] %vm463_vm0, %v3195_v13  ;;  %s2286_s16 = smov 96   ;;  %v2199_v31 = vld [vmem:[%s3184_s3 + $0x4] ss:$0 sm:$0xff] }
   0xe   : > { %s3225_s21 = smov (!%p379_p3, %s2009_s21), 15  ;;  %689 = vst.msk [vmem:[#allocation3 + $0xf] sm:$0x1] %vm688_vm1, %v3195_v13  ;;  %v2435_v33 = vld [vmem:[%s3184_s3 + $0x1] ss:$0 sm:$0xff]  ;;  %v2473_v51 = vshrl.u32 %v732_v50, 7 }
   0xf   : > { %s2010_s26 = sshll.u32 %s3225_s21, 2  ;;  %690 = vst.msk [vmem:[#allocation3 + $0x50] sm:$0xff] %vm463_vm0, %v3195_v13  ;;  %v2489_v56 = vld [vmem:[%s3184_s3] ss:$0 sm:$0xff]  ;;  %v2552_v50 = vld [vmem:[%s3184_s3 + $0x3] ss:$0 sm:$0xff] }
  0x10   : > { %481 = vmatpush.bf16.msra.mxu1 %v2161_v1  ;;  %2180 = vmatpush.bf16.msra.mxu3 %v2161_v1  ;;  %s2375_s12 = scalar_lea.vmem %s3181_s0, %s2010_s26  ;;  %691 = vst.msk [vmem:[#allocation3 + $0x58] sm:$0x1] %vm688_vm1, %v3195_v13  ;;  %v745_v52 = vand.u32 7, %v2473_v51  ;;  %s3146_s19 = scalar_lea.vmem %s3192_s11, %s2010_s26 }
  0x11   : > { %v2155_v4 = vld [vmem:[%s2375_s12] sm:$0xff]  ;;  %v2156_v5 = vld [vmem:[%s2375_s12 + $0x8] sm:$0xff]  ;;  %v2157_v6 = vld [vmem:[%s2375_s12 + $0x10] sm:$0xff] }
  0x12   : > { %v2158_v7 = vld [vmem:[%s2375_s12 + $0x18] sm:$0xff]  ;;  %vm837_vm2 = vcmp.ge.s32.totalorder %v745_v52, 1  ;;  %vm861_vm6 = vcmp.le.s32.totalorder %v745_v52, 6 }
  0x13   : > { %v2481_v53 = vsel %vm837_vm2, 1.0, %v3195_v13 }
  0x14   : > { %482 = vmatpush.bf16.msra.mxu1 %v2160_v2  ;;  %2181 = vmatpush.bf16.msra.mxu3 %v2160_v2  ;;  %v899_v54 = vld [vmem:[#allocation3 + $0x7] sm:$0xff] }
  0x15   : > { %v965_v34 = vld [vmem:[#allocation3 + $0x8] sm:$0xff]  ;;  %v907_v55 = vmul.f32 %v2481_v53, %v899_v54 }
  0x16   : > { %v975_v36 = vmul.f32 %v2435_v33, %v965_v34 }
  0x17   : > { %v917_v58 = vmul.f32 %v2489_v56, %v907_v55  ;;  %v737_v55 = vadd.s32 32, %v2473_v51 }
  0x18   : > { %483 = vmatpush.bf16.msra.mxu1 %v2159_v3  ;;  %2182 = vmatpush.bf16.msra.mxu3 %v2159_v3 }
  0x1b   : > { %2045 = vmatmul.msk.bf16.vlgmr.msra.gmra.mxu1 %vm463_vm0, %v2155_v4  ;;  %2046 = vmatmul.msk.bf16.vlgmr.msra.gmra.mxu3 %vm463_vm0, %v2156_v5  ;;  %v2202_v4 = vld [vmem:[%s3185_s4] ss:$0 sm:$0xff] }
  0x2b   : > { %2047 = vmatmul.msk.bf16.gmra.mxu3 %vm463_vm0, %v2157_v6 }
  0x3b   : > { %2048 = vmatmul.msk.bf16.gmra.mxu3 %vm463_vm0, %v2158_v7 }
  0x98   : > { %v485_v8 = vpop.f32.mrf.mxu1 }
  0x99   : > { %v2388_v10 = vadd.f32 %v2198_v9, %v485_v8 }
  0x9b   : > { %v505_v12 = vpack.c.bf16 %v2388_v10, %v2388_v10 }
  0x9d   : > { %v521_v16 = vunpack.c.l.b16 %v505_v12 }
  0x9e   : > { %v490_v11 = vpop.f32.mrf.mxu3 }
  0x9f   : > { %v2400_v17 = vadd.f32 %v2198_v9, %v490_v11 }
  0xa0   : > { %v487_v14 = vpop.f32.mrf.mxu1 }
  0xa1   : > { %v2395_v15 = vadd.f32 %v2198_v9, %v487_v14  ;;  %v507_v21 = vpack.c.bf16 %v2400_v17, %v2400_v17 }
  0xa3   : > { %v506_v18 = vpack.c.bf16 %v2395_v15, %v2395_v15  ;;  %v523_v25 = vunpack.c.l.b16 %v507_v21 }
  0xa5   : > { %v522_v19 = vunpack.c.l.b16 %v506_v18  ;;  %v734_v18 = vadd.s32 8, %v2473_v51 }
  0xa6   : > { %v492_v20 = vpop.f32.mrf.mxu3 }
  0xa7   : > { %v2406_v22 = vadd.f32 %v2198_v9, %v492_v20  ;;  %v2408_v23 = vpack.c.b16 %v522_v19, %v521_v16  ;;  %v752_v21 = vand.u32 7, %v734_v18 }
  0xa9   : > { %v508_v24 = vpack.c.bf16 %v2406_v22, %v2406_v22  ;;  %1391 = vrot.lane.b32.xlu2 %v2408_v23, %s2285_s15  ;;  %vm838_vm4 = vcmp.ge.s32.totalorder %v752_v21, 1  ;;  %vm862_vm5 = vcmp.le.s32.totalorder %v752_v21, 6 }
  0xab   : > { %v524_v26 = vunpack.c.l.b16 %v508_v24  ;;  %v735_v24 = vadd.s32 16, %v2473_v51 }
  0xad   : > { %v2414_v27 = vpack.c.b16 %v524_v26, %v523_v25 }
  0xae   : > { %v495_v28 = vpop.f32.mrf.mxu3 }
  0xaf   : > { %535 = vrot.lane.b32.xlu1 %v2414_v27, %s2286_s16  ;;  %v2449_v41 = vadd.f32 %v2198_v9, %v495_v28  ;;  %v2518_v28 = vsel %vm838_vm4, 1.0, %v3195_v13 }
  0xb1   : > { %702 = vrot.lane.b32.xlu2 %v2395_v15, %s2285_s15  ;;  %3206 = vst [vmem:[#allocation7_spill] sm:$0xff] %v2449_v41  ;;  %v509_v46 = vpack.c.bf16 %v2449_v41, %v2449_v41 }
  0xb3   : > { %v525_v48 = vunpack.c.l.b16 %v509_v46  ;;  %v2543_v46 = vadd.s32 24, %v2473_v51 }
  0xb6   : > { %v497_v29 = vpop.f32.mrf.mxu3 }
  0xb7   : > { %v2420_v30 = vadd.f32 %v2198_v9, %v497_v29  ;;  %533 = vrot.lane.b32.xlu1 %v2408_v23, %s2286_s16 }
  0xb9   : > { %3203 = vst [vmem:[#allocation4_spill] sm:$0xff] %v2420_v30  ;;  %710 = vrot.lane.b32.xlu2 %v2420_v30, %s2285_s15  ;;  %v510_v44 = vpack.c.bf16 %v2420_v30, %v2420_v30 }
  0xbb   : > { %v526_v47 = vunpack.c.l.b16 %v510_v44 }
  0xbd   : > { %v2463_v49 = vpack.c.b16 %v526_v47, %v525_v48  ;;  %v2546_v47 = vsel %vm861_vm6, 1.0, %v3195_v13  ;;  %v738_v48 = vadd.s32 40, %v2473_v51 }
  0xbe   : > { %v500_v32 = vpop.f32.mrf.mxu3 }
  0xbf   : > { %1393 = vrot.lane.b32.xlu1 %v2414_v27, %s2285_s15  ;;  %v2437_v35 = vadd.f32 %v2198_v9, %v500_v32 }
  0xc1   : > { %888 = vrot.lane.b32.xlu2 %v2199_v31, %s2285_s15  ;;  %3204 = vst [vmem:[#allocation5_spill] sm:$0xff] %v2437_v35  ;;  %v511_v38 = vpack.c.bf16 %v2437_v35, %v2437_v35  ;;  %v2521_v31 = vsel %vm862_vm5, 1.0, %v3195_v13 }
  0xc3   : > { %v527_v42 = vunpack.c.l.b16 %v511_v38  ;;  %v2532_v38 = vld [vmem:[%s3184_s3 + $0x2] ss:$0 sm:$0xff] }
  0xc6   : > { %v502_v37 = vpop.f32.mrf.mxu3 }
  0xc7   : > { %v2442_v39 = vadd.f32 %v2198_v9, %v502_v37  ;;  %704 = vrot.lane.b32.xlu1 %v2400_v17, %s2285_s15 }
  0xc9   : > { %3205 = vst [vmem:[#allocation6_spill] sm:$0xff] %v2442_v39  ;;  %v512_v40 = vpack.c.bf16 %v2442_v39, %v2442_v39  ;;  %991 = vrot.lane.b32.xlu2 %v975_v36, %s2285_s15 }
  0xcb   : > { %v528_v43 = vunpack.c.l.b16 %v512_v40  ;;  %v759_v40 = vand.u32 7, %v735_v24 }
  0xcd   : > { %v2453_v45 = vpack.c.b16 %v528_v43, %v527_v42  ;;  %vm839_vm7 = vcmp.ge.s32.totalorder %v759_v40, 1  ;;  %vm863_vm8 = vcmp.le.s32.totalorder %v759_v40, 6 }
  0xcf   : > { %539 = vrot.lane.b32.xlu0 %v2453_v45, %s2286_s16  ;;  %714 = vrot.lane.b32.xlu1 %v2442_v39, %s2285_s15 }
  0xd1   : > { %1397 = vrot.lane.b32.xlu2 %v2453_v45, %s2285_s15 }
  0xd7   : > { %537 = vrot.lane.b32.xlu0 %v2463_v49, %s2286_s16 }
  0xdf   : > { %1395 = vrot.lane.b32.xlu0 %v2463_v49, %s2285_s15 }
  0xe7   : > { %700 = vrot.lane.b32.xlu0 %v2388_v10, %s2285_s15 }
  0xef   : > { %706 = vrot.lane.b32.xlu0 %v2406_v22, %s2285_s15 }
  0xf7   : > { %708 = vrot.lane.b32.xlu0 %v2449_v41, %s2285_s15 }
  0xff   : > { %712 = vrot.lane.b32.xlu0 %v2437_v35, %s2285_s15 }
 0x103   : > { %v1392_v57 = vpop.permute.xlu2 %1391 }
 0x107   : > { %933 = vrot.lane.b32.xlu0 %v917_v58, %s2285_s15 }
 0x10b   : > { %v703_v59 = vpop.permute.xlu2 %702 }
 0x10c   : > { %725 = vst.msk [vmem:[#allocation3 + $0x18] sm:$0xff] %vm463_vm0, %v703_v59 }
 0x10f   : > { %1380 = vrot.lane.b32.xlu0 %v2202_v4, %s2285_s15 }
 0x113   : > { %v711_v60 = vpop.permute.xlu2 %710 }
 0x114   : > { %729 = vst.msk [vmem:[#allocation3 + $0x38] sm:$0xff] %vm463_vm0, %v711_v60  ;;  %v2564_v60 = vld [vmem:[%s3184_s3 + $0x5] ss:$0 sm:$0xff] }
 0x11b   : > { %v2495_v61 = vpop.permute.xlu2 %888 }
 0x121   : > { %v536_v62 = vpop.permute.xlu1 %535 }
 0x122   : > { %v558_v16 = vsel %vm541_vm3, %v536_v62, 0  ;;  %v3193_v62 = vand.u32 7, %v2543_v46 }
 0x123   : > { %v2497_v63 = vpop.permute.xlu2 %991 }
 0x124   : > { %vm840_vm9 = vcmp.ge.s32.totalorder %v3193_v62, 1 }
 0x129   : > { %v534_v0 = vpop.permute.xlu1 %533 }
 0x12a   : > { %v555_v20 = vsel %vm541_vm3, %v534_v0, 0  ;;  %v2568_v0 = vsel %vm839_vm7, 1.0, %v3195_v13 }
 0x12b   : > { %v1398_v1 = vpop.permute.xlu2 %1397 }
 0x12c   : > { %1451 = vmatpush.bf16.msra.mxu0 %v1398_v1  ;;  %2183 = vmatpush.bf16.msra.mxu2 %v1398_v1  ;;  %v2573_v1 = vld [vmem:[%s3184_s3 + $0x6] ss:$0 sm:$0xff] }
 0x12d   : > { %3207 = vst [vmem:[#allocation8_spill] sm:$0xff] %v2573_v1 }
 0x131   : > { %v1394_v2 = vpop.permute.xlu1 %1393 }
 0x139   : > { %v705_v3 = vpop.permute.xlu1 %704 }
 0x13a   : > { %726 = vst.msk [vmem:[#allocation3 + $0x20] sm:$0xff] %vm463_vm0, %v705_v3  ;;  %v780_v3 = vand.u32 7, %v738_v48 }
 0x13c   : > { %vm2594_vm10 = vcmp.le.s32.totalorder %v780_v3, 6  ;;  %vm2608_vm13 = vcmp.ge.s32.totalorder %v780_v3, 1 }
 0x141   : > { %v540_v5 = vpop.permute.xlu0 %539  ;;  %v715_v6 = vpop.permute.xlu1 %714  ;;  %v2504_v7 = vld [vmem:[#allocation3 + $0x20] sm:$0xff] }
 0x142   : > { %731 = vst.msk [vmem:[#allocation3 + $0x48] sm:$0xff] %vm463_vm0, %v715_v6  ;;  %v564_v8 = vsel %vm541_vm3, %v540_v5, 0  ;;  %v978_v9 = vmul.f32 %v2435_v33, %v2504_v7  ;;  %v773_v6 = vand.u32 7, %v737_v55 }
 0x143   : > { %570 = vmatpush.bf16.xpose.msrb.mxu1 %v564_v8  ;;  %v2580_v8 = vld [vmem:[#allocation3 + $0x1f] sm:$0xff] }
 0x144   : > { %997 = vrot.lane.b32.xlu2 %v978_v9, %s2285_s15  ;;  %vm2598_vm11 = vcmp.le.s32.totalorder %v773_v6, 6  ;;  %v1209_v18 = vmul.f32 %v2518_v28, %v2580_v8  ;;  %vm2604_vm12 = vcmp.ge.s32.totalorder %v773_v6, 1 }
 0x149   : > { %v538_v11 = vpop.permute.xlu0 %537 }
 0x14a   : > { %v561_v12 = vsel %vm541_vm3, %v538_v11, 0  ;;  %v967_v11 = vld [vmem:[#allocation3 + $0x18] sm:$0xff] }
 0x14b   : > { %571 = vmatpush.bf16.xpose.msrb.mxu1 %v561_v12  ;;  %v2592_v12 = vld [vmem:[%s3184_s3 + $0x7] ss:$0 sm:$0xff] }
 0x14c   : > { %v1270_v24 = vmul.f32 %v2592_v12, %v967_v11 }
 0x151   : > { %v1396_v14 = vpop.permute.xlu0 %1395 }
 0x152   : > { %1452 = vmatpush.bf16.msra.mxu0 %v1396_v14  ;;  %2184 = vmatpush.bf16.msra.mxu2 %v1396_v14 }
 0x153   : > { %572 = vmatpush.bf16.xpose.msrb.mxu1 %v558_v16 }
 0x156   : > { %1453 = vmatpush.bf16.msra.mxu0 %v1394_v2  ;;  %2185 = vmatpush.bf16.msra.mxu2 %v1394_v2 }
 0x159   : > { %v701_v19 = vpop.permute.xlu0 %700 }
 0x15a   : > { %724 = vst.msk [vmem:[#allocation3 + $0x10] sm:$0xff] %vm463_vm0, %v701_v19  ;;  %1454 = vmatpush.bf16.msra.mxu0 %v1392_v57  ;;  %2186 = vmatpush.bf16.msra.mxu2 %v1392_v57  ;;  %v891_v19 = vmul.f32 %v2495_v61, %v2388_v10 }
 0x15b   : > { %573 = vmatpush.bf16.xpose.msrb.mxu1 %v555_v20 }
 0x161   : > { %v707_v25 = vpop.permute.xlu0 %706  ;;  %v966_v26 = vld [vmem:[#allocation3 + $0x10] sm:$0xff] }
 0x162   : > { %v900_v29 = vld [vmem:[#allocation3 + $0xf] sm:$0xff]  ;;  %727 = vst.msk [vmem:[#allocation3 + $0x28] sm:$0xff] %vm463_vm0, %v707_v25  ;;  %2049 = vmatmul.msk.bf16.vlgmr.msrb.gmra.mxu1 %vm541_vm3, %v2408_v23  ;;  %v976_v34 = vmul.f32 %v2435_v33, %v966_v26  ;;  %v2614_v25 = vsel %vm863_vm8, 1.0, %v3195_v13  ;;  %v2617_v26 = vsel %vm840_vm9, 1.0, %v3195_v13  ;;  %v901_v62 = vld [vmem:[#allocation3 + $0x17] sm:$0xff] }
 0x163   : > { %v1024_v32 = vld [vmem:[#allocation3 + $0x11] sm:$0xff]  ;;  %v908_v36 = vmul.f32 %v2518_v28, %v900_v29  ;;  %v1023_v23 = vld [vmem:[#allocation3 + $0x9] sm:$0xff]  ;;  %v1090_v44 = vmul.f32 %v2481_v53, %v900_v29 }
 0x164   : > { %v1032_v37 = vmul.f32 %v2521_v31, %v1024_v32  ;;  %993 = vrot.lane.b32.xlu0 %v976_v34, %s2285_s15  ;;  %v1031_v52 = vmul.f32 %v2546_v47, %v1023_v23  ;;  %v1149_v54 = vmul.f32 %v2546_v47, %v1024_v32  ;;  %v2624_v34 = vadd.s32 48, %v2473_v51 }
 0x165   : > { %v918_v42 = vmul.f32 %v2489_v56, %v908_v36  ;;  %v1100_v59 = vmul.f32 %v2552_v50, %v1090_v44  ;;  %v1025_v36 = vld [vmem:[#allocation3 + $0x19] sm:$0xff]  ;;  %v2065_v23 = vsel %vm2598_vm11, 1.0, %v3195_v13  ;;  %v2653_v44 = vsel %vm2608_vm13, 1.0, %v3195_v13 }
 0x166   : > { %v1042_v43 = vmul.f32 %v2532_v38, %v1032_v37  ;;  %v1041_v4 = vmul.f32 %v2532_v38, %v1031_v52  ;;  %v1159_v5 = vmul.f32 %v2564_v60, %v1149_v54  ;;  %v1271_v52 = vmul.f32 %v2592_v12, %v2504_v7 }
 0x167   : > { %935 = vrot.lane.b32.xlu1 %v918_v42, %s2285_s15  ;;  %v1219_v54 = vmul.f32 %v2573_v1, %v1209_v18  ;;  %v1319_v20 = vmul.f32 %v2546_v47, %v1025_v36 }
 0x168   : > { %1059 = vrot.lane.b32.xlu2 %v1042_v43, %s2285_s15  ;;  %v2640_v43 = vsel %vm2594_vm10, 1.0, %v3195_v13 }
 0x169   : > { %v709_v57 = vpop.permute.xlu0 %708  ;;  %v2557_v58 = vld [vmem:[#allocation3 + $0x27] sm:$0xff] }
 0x16a   : > { %728 = vst.msk [vmem:[#allocation3 + $0x30] sm:$0xff] %vm463_vm0, %v709_v57  ;;  %v1210_v2 = vmul.f32 %v2568_v0, %v2557_v58 }
 0x16c   : > { %1116 = vrot.lane.b32.xlu0 %v1100_v59, %s2285_s15  ;;  %v2583_v9 = vmul.f32 %v2573_v1, %v1210_v2  ;;  %v1150_v59 = vmul.f32 %v2521_v31, %v1025_v36 }
 0x16f   : > { %1057 = vrot.lane.b32.xlu1 %v1041_v4, %s2285_s15  ;;  %v3194_v4 = vand.u32 7, %v2624_v34 }
 0x170   : > { %1175 = vrot.lane.b32.xlu2 %v1159_v5, %s2285_s15 }
 0x171   : > { %v713_v21 = vpop.permute.xlu0 %712  ;;  %v2619_v29 = vld [vmem:[#allocation3 + $0x29] sm:$0xff]  ;;  %v2635_v42 = vld [vmem:[#allocation3 + $0x31] sm:$0xff]  ;;  %vm867_vm14 = vcmp.le.s32.totalorder %v3194_v4, 6 }
 0x172   : > { %v2621_v32 = vld [vmem:[#allocation3 + $0x2f] sm:$0xff]  ;;  %730 = vst.msk [vmem:[#allocation3 + $0x40] sm:$0xff] %vm463_vm0, %v713_v21  ;;  %2050 = vmatmul.msk.bf16.gmra.mxu1 %vm541_vm3, %v2414_v27  ;;  %v2633_v40 = vmul.f32 %v2614_v25, %v2619_v29  ;;  %v2648_v27 = vsel %vm2604_vm12, 1.0, %v3195_v13  ;;  %v2655_v48 = vld [vmem:[#allocation3 + $0x37] sm:$0xff]  ;;  %v1035_v2 = vmul.f32 %v2065_v23, %v2619_v29  ;;  %v1036_v3 = vmul.f32 %v2640_v43, %v2635_v42  ;;  %v2693_v21 = vld [vmem:[%s3184_s3 + $0x8] ss:$0 sm:$0xff] }
 0x173   : > { %v1211_v37 = vmul.f32 %v2617_v26, %v2621_v32  ;;  %v1094_v57 = vmul.f32 %v2648_v27, %v2621_v32  ;;  %v1095_v5 = vmul.f32 %v2653_v44, %v2655_v48  ;;  %v1153_v6 = vmul.f32 %v2065_v23, %v2635_v42 }
 0x174   : > { %1286 = vrot.lane.b32.xlu0 %v1270_v24, %s2285_s15  ;;  %v2680_v14 = vmul.f32 %v2532_v38, %v1035_v2  ;;  %v2683_v16 = vmul.f32 %v2532_v38, %v1036_v3  ;;  %v1212_v18 = vmul.f32 %v2648_v27, %v2655_v48  ;;  %v1160_v2 = vmul.f32 %v2564_v60, %v1150_v59 }
 0x175   : > { %v2662_v55 = vmul.f32 %v2573_v1, %v1211_v37  ;;  %v2673_v7 = vmul.f32 %v2552_v50, %v1094_v57  ;;  %v2696_v24 = vmul.f32 %v2552_v50, %v1095_v5  ;;  %v2699_v37 = vmul.f32 %v2564_v60, %v1153_v6 }
 0x176   : > { %v2704_v57 = vmul.f32 %v2573_v1, %v1212_v18  ;;  %v977_v6 = vmul.f32 %v2435_v33, %v967_v11  ;;  %v1329_v18 = vmul.f32 %v2693_v21, %v1319_v20  ;;  %v1091_v11 = vmul.f32 %v2518_v28, %v901_v62 }
 0x177   : > { %1288 = vrot.lane.b32.xlu1 %v1271_v52, %s2285_s15  ;;  %v910_v20 = vmul.f32 %v2617_v26, %v2580_v8 }
 0x178   : > { %1236 = vrot.lane.b32.xlu2 %v1219_v54, %s2285_s15 }
 0x179   : > { %v934_v52 = vpop.permute.xlu0 %933  ;;  %v2701_v54 = vld [vmem:[#allocation3 + $0x39] sm:$0xff] }
 0x17a   : > { %v2706_v10 = vld [vmem:[#allocation3 + $0x3f] sm:$0xff]  ;;  %v2708_v47 = vadd.f32 %v934_v52, %v891_v19  ;;  %v2716_v5 = vmul.f32 %v2065_v23, %v2701_v54  ;;  %v2722_v19 = vsel %vm867_vm14, 1.0, %v3195_v13  ;;  %v1033_v23 = vmul.f32 %v2614_v25, %v1025_v36 }
 0x17b   : > { %v1213_v3 = vmul.f32 %v2653_v44, %v2706_v10  ;;  %v1037_v52 = vmul.f32 %v2722_v19, %v2701_v54  ;;  %v1101_v36 = vmul.f32 %v2552_v50, %v1091_v11 }
 0x17c   : > { %1177 = vrot.lane.b32.xlu0 %v1160_v2, %s2285_s15 }
 0x17d   : > { %v2725_v59 = vmul.f32 %v2573_v1, %v1213_v3  ;;  %v2736_v2 = vmul.f32 %v2532_v38, %v1037_v52  ;;  %v1043_v3 = vmul.f32 %v2532_v38, %v1033_v23  ;;  %v1208_v52 = vmul.f32 %v2481_v53, %v901_v62 }
 0x17e   : > { %v1093_v53 = vmul.f32 %v2617_v26, %v2557_v58 }
 0x17f   : > { %995 = vrot.lane.b32.xlu1 %v977_v6, %s2285_s15  ;;  %v1026_v6 = vld [vmem:[#allocation3 + $0x21] sm:$0xff] }
 0x180   : > { %1345 = vrot.lane.b32.xlu2 %v1329_v18, %s2285_s15  ;;  %v920_v18 = vmul.f32 %v2489_v56, %v910_v20  ;;  %v1320_v28 = vmul.f32 %v2521_v31, %v1026_v6  ;;  %v3216_v20 = vand.u32 7, %v2543_v46  ;;  %v1103_v46 = vmul.f32 %v2552_v50, %v1093_v53 }
 0x182   : > { %2051 = vmatmul.msk.bf16.gmra.mxu1 %vm541_vm3, %v2463_v49  ;;  %v1092_v49 = vmul.f32 %v2568_v0, %v2580_v8  ;;  %v1330_v23 = vmul.f32 %v2693_v21, %v1320_v28  ;;  %vm864_vm15 = vcmp.le.s32.totalorder %v3216_v20, 6  ;;  %v909_v8 = vmul.f32 %v2568_v0, %v901_v62 }
 0x183   : > { %v2761_v31 = vsel %vm864_vm15, 1.0, %v3195_v13  ;;  %v892_v20 = vmul.f32 %v2495_v61, %v2395_v15 }
 0x184   : > { %1061 = vrot.lane.b32.xlu0 %v1043_v3, %s2285_s15  ;;  %v1218_v3 = vmul.f32 %v2573_v1, %v1208_v52  ;;  %v1102_v11 = vmul.f32 %v2552_v50, %v1092_v49  ;;  %v1034_v62 = vmul.f32 %v2761_v31, %v1026_v6 }
 0x186   : > { %v1044_v0 = vmul.f32 %v2532_v38, %v1034_v62  ;;  %v1015_v62 = vadd.f32 %v2497_v63, %v2708_v47 }
 0x187   : > { %1118 = vrot.lane.b32.xlu1 %v1101_v36, %s2285_s15  ;;  %v1152_v36 = vmul.f32 %v2761_v31, %v2619_v29 }
 0x188   : > { %939 = vrot.lane.b32.xlu2 %v920_v18, %s2285_s15  ;;  %v919_v18 = vmul.f32 %v2489_v56, %v909_v8 }
 0x189   : > { %v1162_v28 = vmul.f32 %v2564_v60, %v1152_v36 }
 0x18c   : > { %1347 = vrot.lane.b32.xlu0 %v1330_v23, %s2285_s15  ;;  %v2780_v23 = vpop.permute.xlu0 %1380 }
 0x18f   : > { %1234 = vrot.lane.b32.xlu1 %v1218_v3, %s2285_s15 }
 0x190   : > { %1120 = vrot.lane.b32.xlu2 %v1102_v11, %s2285_s15 }
 0x192   : > { %2052 = vmatmul.msk.bf16.gmra.mxu1 %vm541_vm3, %v2453_v45  ;;  %v1151_v45 = vmul.f32 %v2614_v25, %v1026_v6 }
 0x194   : > { %1122 = vrot.lane.b32.xlu0 %v1103_v46, %s2285_s15  ;;  %v1161_v26 = vmul.f32 %v2564_v60, %v1151_v45 }
 0x197   : > { %937 = vrot.lane.b32.xlu1 %v919_v18, %s2285_s15 }
 0x198   : > { %1181 = vrot.lane.b32.xlu2 %v1162_v28, %s2285_s15  ;;  %v894_v28 = vmul.f32 %v2495_v61, %v2406_v22 }
 0x19e   : > { %v998_v29 = vpop.permute.xlu2 %997 }
 0x19f   : > { %1063 = vrot.lane.b32.xlu1 %v1044_v0, %s2285_s15 }
 0x1a7   : > { %1179 = vrot.lane.b32.xlu1 %v1161_v26, %s2285_s15 }
 0x1c2   : > { %v1060_v52 = vpop.permute.xlu2 %1059 }
 0x1ca   : > { %v1176_v49 = vpop.permute.xlu2 %1175 }
 0x1d2   : > { %v1237_v3 = vpop.permute.xlu2 %1236 }
 0x1d6   : > { %v994_v11 = vpop.permute.xlu0 %993 }
 0x1d9   : > { %v936_v8 = vpop.permute.xlu1 %935 }
 0x1da   : > { %v1346_v53 = vpop.permute.xlu2 %1345  ;;  %v958_v36 = vadd.f32 %v936_v8, %v892_v20 }
 0x1dc   : > { %v1016_v46 = vadd.f32 %v994_v11, %v958_v36 }
 0x1de   : > { %v1082_v18 = vadd.f32 %v1060_v52, %v1016_v46  ;;  %v1117_v25 = vpop.permute.xlu0 %1116 }
 0x1df   : > { %v2784_v6 = vpop.f32.mrf.mxu1 }
 0x1e0   : > { %v595_v26 = vsel %vm463_vm0, %v2784_v6, -inf }
 0x1e1   : > { %v1058_v45 = vpop.permute.xlu1 %1057  ;;  %596 = vmax.xlane.f32.xlu2 %v595_v26 }
 0x1e2   : > { %v940_v0 = vpop.permute.xlu2 %939  ;;  %v1081_v4 = vadd.f32 %v1058_v45, %v1015_v62 }
 0x1e3   : > { %v960_v15 = vadd.f32 %v940_v0, %v894_v28 }
 0x1e4   : > { %v1140_v20 = vadd.f32 %v1117_v25, %v1081_v4 }
 0x1e5   : > { %v1018_v11 = vadd.f32 %v998_v29, %v960_v15 }
 0x1e6   : > { %v1199_v52 = vadd.f32 %v1176_v49, %v1140_v20  ;;  %v1287_v8 = vpop.permute.xlu0 %1286 }
 0x1e7   : > { %v577_v36 = vpop.f32.mrf.mxu1 }
 0x1e8   : > { %v598_v13 = vsel %vm463_vm0, %v577_v36, -inf }
 0x1e9   : > { %v1289_v46 = vpop.permute.xlu1 %1288  ;;  %599 = vmax.xlane.f32.xlu2 %v598_v13 }
 0x1ee   : > { %v1178_v22 = vpop.permute.xlu0 %1177 }
 0x1ef   : > { %v580_v39 = vpop.f32.mrf.mxu1 }
 0x1f0   : > { %v601_v47 = vsel %vm463_vm0, %v580_v39, -inf }
 0x1f1   : > { %v996_v63 = vpop.permute.xlu1 %995  ;;  %602 = vmax.xlane.f32.xlu0 %v601_v47 }
 0x1f6   : > { %v1062_v35 = vpop.permute.xlu0 %1061 }
 0x1f7   : > { %v2794_v30 = vpop.f32.mrf.mxu1 }
 0x1f8   : > { %v604_v4 = vsel %vm463_vm0, %v2794_v30, -inf }
 0x1f9   : > { %v1119_v28 = vpop.permute.xlu1 %1118  ;;  %605 = vmax.xlane.f32.xlu1 %v604_v4 }
 0x1fa   : > { %v1141_v29 = vadd.f32 %v1119_v28, %v1082_v18  ;;  %v1121_v28 = vpop.permute.xlu2 %1120 }
 0x1fc   : > { %v1200_v49 = vadd.f32 %v1178_v22, %v1141_v29 }
 0x1fe   : > { %v1259_v25 = vadd.f32 %v1237_v3, %v1200_v49  ;;  %v1348_v13 = vpop.permute.xlu0 %1347  ;;  %v893_v3 = vmul.f32 %v2495_v61, %v2400_v17 }
 0x1ff   : > { %v2798_v0 = vpop.f32.mrf.mxu1 }
 0x200   : > { %v1311_v62 = vadd.f32 %v1289_v46, %v1259_v25  ;;  %v607_v26 = vsel %vm463_vm0, %v2798_v0, -inf }
 0x201   : > { %v1235_v45 = vpop.permute.xlu1 %1234  ;;  %608 = vmax.xlane.f32.xlu2 %v607_v26  ;;  %v2826_v26 = vld [vmem:[#allocation3 + $0x28] sm:$0xff] }
 0x202   : > { %v2802_v15 = vadd.f32 %v1348_v13, %v1311_v62  ;;  %v1258_v20 = vadd.f32 %v1235_v45, %v1199_v52  ;;  %v1182_v13 = vpop.permute.xlu2 %1181 }
 0x204   : > { %v1310_v47 = vadd.f32 %v1287_v8, %v1258_v20 }
 0x206   : > { %v2804_v41 = vadd.f32 %v1346_v53, %v1310_v47  ;;  %v1123_v17 = vpop.permute.xlu0 %1122 }
 0x207   : > { %v2806_v1 = vpop.f32.mrf.mxu1 }
 0x208   : > { %v610_v46 = vsel %vm463_vm0, %v2806_v1, -inf }
 0x209   : > { %v938_v18 = vpop.permute.xlu1 %937  ;;  %611 = vmax.xlane.f32.xlu2 %v610_v46 }
 0x20a   : > { %v959_v22 = vadd.f32 %v938_v18, %v893_v3 }
 0x20c   : > { %v1017_v4 = vadd.f32 %v996_v63, %v959_v22 }
 0x20e   : > { %v1083_v29 = vadd.f32 %v1062_v35, %v1017_v4 }
 0x20f   : > { %v2812_v49 = vpop.f32.mrf.mxu1 }
 0x210   : > { %v2814_v52 = vadd.f32 %v1121_v28, %v1083_v29  ;;  %v613_v8 = vsel %vm463_vm0, %v2812_v49, -inf }
 0x211   : > { %v1064_v53 = vpop.permute.xlu1 %1063  ;;  %614 = vmax.xlane.f32.xlu2 %v613_v8 }
 0x212   : > { %v1084_v25 = vadd.f32 %v1064_v53, %v1018_v11  ;;  %1240 = vrot.lane.b32.xlu1 %v2662_v55, %s2285_s15  ;;  %v1272_v11 = vmul.f32 %v2592_v12, %v2826_v26 }
 0x214   : > { %v1143_v62 = vadd.f32 %v1123_v17, %v1084_v25 }
 0x216   : > { %v2820_v45 = vadd.f32 %v1182_v13, %v1143_v62  ;;  %v1322_v62 = vmul.f32 %v2761_v31, %v2635_v42 }
 0x217   : > { %v2822_v63 = vpop.f32.mrf.mxu1 }
 0x218   : > { %v616_v35 = vsel %vm463_vm0, %v2822_v63, -inf  ;;  %v1332_v13 = vmul.f32 %v2693_v21, %v1322_v62  ;;  %v979_v62 = vmul.f32 %v2435_v33, %v2826_v26 }
 0x219   : > { %617 = vmax.xlane.f32.xlu2 %v616_v35  ;;  %v2848_v17 = vpop.permute.xlu1 %1179 }
 0x231   : > { %1290 = vrot.lane.b32.xlu2 %v1272_v11, %s2285_s15 }
 0x254   : > { %v597_v20 = vpop.xlane.xlu2 %596 }
 0x255   : > { %v619_v55 = vsub.f32 %v2784_v6, %v597_v20 }
 0x257   : > { %v627_v47 = vmul.f32 1.442695, %v619_v55 }
 0x259   : > { %2212 = vpow2.f32 %v627_v47 }
 0x25c   : > { %v600_v3 = vpop.xlane.xlu2 %599 }
 0x25d   : > { %v620_v18 = vsub.f32 %v577_v36, %v600_v3 }
 0x25f   : > { %v2832_v46 = vpop.eup %2212  ;;  %v629_v22 = vmul.f32 1.442695, %v620_v18 }
 0x260   : > { %v643_v28 = vsel %vm463_vm0, %v2832_v46, 0.0 }
 0x261   : > { %2214 = vpow2.f32 %v629_v22  ;;  %644 = vadd.xlane.f32.xlu0 %v643_v28  ;;  %v970_v28 = vld [vmem:[#allocation3 + $0x30] sm:$0xff] }
 0x264   : > { %v603_v4 = vpop.xlane.xlu0 %602 }
 0x265   : > { %v621_v29 = vsub.f32 %v580_v39, %v603_v4  ;;  %v1331_v39 = vmul.f32 %v2693_v21, %v2633_v40 }
 0x267   : > { %v2836_v53 = vpop.eup %2214  ;;  %v631_v8 = vmul.f32 1.442695, %v621_v29  ;;  %v1273_v29 = vmul.f32 %v2592_v12, %v970_v28 }
 0x268   : > { %v646_v6 = vsel %vm463_vm0, %v2836_v53, 0.0 }
 0x269   : > { %2216 = vpow2.f32 %v631_v8  ;;  %647 = vadd.xlane.f32.xlu1 %v646_v6  ;;  %v912_v6 = vmul.f32 %v2653_v44, %v2621_v32 }
 0x26c   : > { %v606_v35 = vpop.xlane.xlu1 %605 }
 0x26d   : > { %v622_v11 = vsub.f32 %v2794_v30, %v606_v35 }
 0x26f   : > { %v2840_v25 = vpop.eup %2216  ;;  %v633_v20 = vmul.f32 1.442695, %v622_v11 }
 0x270   : > { %v649_v36 = vsel %vm463_vm0, %v2840_v25, 0.0 }
 0x271   : > { %650 = vadd.xlane.f32.xlu2 %v649_v36  ;;  %2218 = vpow2.f32 %v633_v20  ;;  %v980_v36 = vmul.f32 %v2435_v33, %v970_v28  ;;  %v1030_v20 = vld [vmem:[#allocation3 + $0x41] sm:$0xff] }
 0x274   : > { %v609_v55 = vpop.xlane.xlu2 %608 }
 0x275   : > { %1238 = vrot.lane.b32.xlu0 %v2583_v9, %s2285_s15  ;;  %v623_v9 = vsub.f32 %v2798_v0, %v609_v55 }
 0x277   : > { %v2857_v40 = vpop.eup %2218  ;;  %v635_v3 = vmul.f32 1.442695, %v623_v9 }
 0x278   : > { %v652_v18 = vsel %vm463_vm0, %v2857_v40, 0.0 }
 0x279   : > { %2220 = vpow2.f32 %v635_v3 }
 0x27c   : > { %v612_v47 = vpop.xlane.xlu2 %611 }
 0x27d   : > { %v624_v42 = vsub.f32 %v2806_v1, %v612_v47  ;;  %v911_v1 = vmul.f32 %v2648_v27, %v2557_v58  ;;  %v1154_v58 = vmul.f32 %v2640_v43, %v2701_v54  ;;  %v1324_v54 = vmul.f32 %v2640_v43, %v1030_v20 }
 0x27e   : > { %v1201_v43 = vadd.f32 %v2848_v17, %v2814_v52 }
 0x27f   : > { %v637_v31 = vmul.f32 1.442695, %v624_v42  ;;  %v2862_v22 = vpop.eup %2220  ;;  %v921_v8 = vmul.f32 %v2489_v56, %v911_v1  ;;  %v1164_v27 = vmul.f32 %v2564_v60, %v1154_v58  ;;  %v740_v42 = vadd.s32 56, %v2473_v51 }
 0x280   : > { %v655_v30 = vsel %vm463_vm0, %v2862_v22, 0.0 }
 0x281   : > { %2222 = vpow2.f32 %v637_v31 }
 0x282   : > { %1349 = vrot.lane.b32.xlu1 %v1331_v39, %s2285_s15  ;;  %v922_v39 = vmul.f32 %v2489_v56, %v912_v6 }
 0x284   : > { %v615_v32 = vpop.xlane.xlu2 %614  ;;  %v2891_v44 = vpop.permute.xlu1 %1240 }
 0x285   : > { %v625_v47 = vsub.f32 %v2812_v49, %v615_v32  ;;  %v1155_v32 = vmul.f32 %v2722_v19, %v1030_v20 }
 0x287   : > { %v2866_v0 = vpop.eup %2222 }
 0x288   : > { %v658_v4 = vsel %vm463_vm0, %v2866_v0, 0.0 }
 0x289   : > { %1351 = vrot.lane.b32.xlu2 %v1332_v13, %s2285_s15  ;;  %v971_v13 = vld [vmem:[#allocation3 + $0x38] sm:$0xff] }
 0x28a   : > { %v1274_v11 = vmul.f32 %v2592_v12, %v971_v13 }
 0x28c   : > { %v618_v26 = vpop.xlane.xlu2 %617 }
 0x28d   : > { %v626_v55 = vsub.f32 %v2822_v63, %v618_v26  ;;  %v794_v63 = vand.u32 7, %v740_v42 }
 0x28f   : > { %v641_v3 = vmul.f32 1.442695, %v626_v55  ;;  %vm868_vm1 = vcmp.le.s32.totalorder %v794_v63, 6  ;;  %vm844_vm3 = vcmp.ge.s32.totalorder %v794_v63, 1  ;;  %v1318_v63 = vld [vmem:[#allocation3 + $0x51] sm:$0xff] }
 0x294   : > { %v1291_v51 = vpop.permute.xlu2 %1290 }
 0x29f   : > { %653 = vadd.xlane.f32.xlu0 %v652_v18  ;;  %v1334_v18 = vmul.f32 %v2693_v21, %v1324_v54  ;;  %v3218_v54 = vand.u32 7, %v2624_v34 }
 0x2a1   : > { %vm843_vm2 = vcmp.ge.s32.totalorder %v3218_v54, 1 }
 0x2ac   : > { %656 = vadd.xlane.f32.xlu1 %v655_v30 }
 0x2b2   : > { %659 = vadd.xlane.f32.xlu2 %v658_v4  ;;  %v639_v4 = vmul.f32 1.442695, %v625_v47 }
 0x2b3   : > { %1292 = vrot.lane.b32.xlu0 %v1273_v29, %s2285_s15 }
 0x2bb   : > { %941 = vrot.lane.b32.xlu0 %v921_v8, %s2285_s15  ;;  %v981_v8 = vmul.f32 %v2435_v33, %v971_v13  ;;  %v1384_v13 = vadd.f32 %v2780_v23, %v2802_v15 }
 0x2c3   : > { %1001 = vrot.lane.b32.xlu0 %v980_v36, %s2285_s15 }
 0x2c5   : > { %943 = vrot.lane.b32.xlu1 %v922_v39, %s2285_s15 }
 0x2ca   : > { %999 = vrot.lane.b32.xlu2 %v979_v62, %s2285_s15 }
 0x2cb   : > { %1124 = vrot.lane.b32.xlu0 %v2673_v7, %s2285_s15 }
 0x2d3   : > { %1185 = vrot.lane.b32.xlu0 %v1164_v27, %s2285_s15  ;;  %v1165_v27 = vmul.f32 %v2564_v60, %v1155_v32 }
 0x2d4   : > { %v645_v35 = vpop.xlane.xlu0 %644 }
 0x2d5   : > { %2224 = vrcp.f32 %v645_v35  ;;  %v1266_v35 = vld [vmem:[#allocation3 + $0x48] sm:$0xff] }
 0x2db   : > { %1294 = vrot.lane.b32.xlu0 %v1274_v11, %s2285_s15  ;;  %v2225_v9 = vpop.eup %2224 }
 0x2dc   : > { %v648_v7 = vpop.xlane.xlu1 %647  ;;  %v675_v30 = vmul.f32 %v2225_v9, %v2832_v46 }
 0x2dd   : > { %2226 = vrcp.f32 %v648_v7 }
 0x2de   : > { %2228 = vpow2.f32 %v641_v3 }
 0x2df   : > { %2230 = vpow2.f32 %v639_v4 }
 0x2e3   : > { %v2227_v31 = vpop.eup %2226  ;;  %1355 = vrot.lane.b32.xlu0 %v1334_v18, %s2285_s15 }
 0x2e4   : > { %v676_v28 = vmul.f32 %v2227_v31, %v2836_v53  ;;  %v2909_v46 = vpop.eup %2228  ;;  %v3217_v53 = vmov 0.0   ;;  %v651_v11 = vpop.xlane.xlu2 %650 }
 0x2e5   : > { %v2913_v36 = vsel %vm868_vm1, 1.0, %v3217_v53  ;;  %v664_v17 = vsel %vm463_vm0, %v2909_v46, 0.0  ;;  %v2918_v39 = vpop.eup %2230  ;;  %2232 = vrcp.f32 %v651_v11  ;;  %v2059_v9 = vsel %vm843_vm2, 1.0, %v3217_v53 }
 0x2e6   : > { %v683_v29 = vpack.c.bf16 %v676_v28, %v675_v30  ;;  %v1038_v52 = vmul.f32 %v2913_v36, %v1030_v20  ;;  %v661_v58 = vsel %vm463_vm0, %v2918_v39, 0.0  ;;  %v2060_v34 = vsel %vm844_vm3, 1.0, %v3217_v53 }
 0x2e7   : > { %v1239_v49 = vpop.permute.xlu0 %1238  ;;  %v914_v3 = vmul.f32 %v2060_v34, %v2706_v10 }
 0x2e8   : > { %v1260_v1 = vadd.f32 %v1239_v49, %v1201_v43  ;;  %2069 = vmatmul.msk.bf16.vlgmr.msra.gmra.mxu0 %vm463_vm0, %v683_v29  ;;  %v1048_v62 = vmul.f32 %v2532_v38, %v1038_v52  ;;  %v1276_v38 = vmul.f32 %v2592_v12, %v1266_v35  ;;  %v1326_v43 = vmul.f32 %v2913_v36, %v1318_v63  ;;  %v1089_v29 = vld [vmem:[#allocation3 + $0x47] sm:$0xff]  ;;  %v1207_v52 = vld [vmem:[#allocation3 + $0x4f] sm:$0xff] }
 0x2e9   : > { %v924_v42 = vmul.f32 %v2489_v56, %v914_v3  ;;  %v1097_v49 = vmul.f32 %v2060_v34, %v1089_v29  ;;  %v1214_v53 = vmul.f32 %v2059_v9, %v1089_v29 }
 0x2ea   : > { %v2907_v6 = vadd.f32 %v1291_v51, %v1260_v1 }
 0x2eb   : > { %1003 = vrot.lane.b32.xlu0 %v981_v8, %s2285_s15  ;;  %v2233_v15 = vpop.eup %2232  ;;  %v1107_v1 = vmul.f32 %v2552_v50, %v1097_v49  ;;  %v2163_v49 = vld [vmem:[%s3186_s5] sm:$0xff] }
 0x2ef   : > { %665 = vadd.xlane.f32.xlu1 %v664_v17  ;;  %v1215_v17 = vmul.f32 %v2060_v34, %v1207_v52 }
 0x2f3   : > { %662 = vadd.xlane.f32.xlu2 %v661_v58  ;;  %1071 = vrot.lane.b32.xlu0 %v1048_v62, %s2285_s15  ;;  %v3219_v62 = vld [vmem:[#allocation8_spill] sm:$0xff] }
 0x2f4   : > { %v2942_v20 = vpop.permute.xlu1 %1349  ;;  %v1224_v58 = vmul.f32 %v3219_v62, %v1214_v53 }
 0x2fb   : > { %1187 = vrot.lane.b32.xlu0 %v1165_v27, %s2285_s15 }
 0x303   : > { %1413 = vrot.lane.b32.xlu0 %v1384_v13, %s2285_s15 }
 0x308   : > { %1065 = vrot.lane.b32.xlu1 %v2680_v14, %s2285_s15 }
 0x30b   : > { %1067 = vrot.lane.b32.xlu2 %v2683_v16, %s2285_s15  ;;  %1298 = vrot.lane.b32.xlu0 %v1276_v38, %s2285_s15  ;;  %v677_v16 = vmul.f32 %v2233_v15, %v2840_v25  ;;  %v1371_v38 = vadd.f32 %v2942_v20, %v2907_v6 }
 0x310   : > { %1126 = vrot.lane.b32.xlu1 %v2696_v24, %s2285_s15  ;;  %v972_v24 = vld [vmem:[#allocation3 + $0x40] sm:$0xff] }
 0x311   : > { %v982_v28 = vmul.f32 %v2435_v33, %v972_v24 }
 0x312   : > { %v654_v26 = vpop.xlane.xlu0 %653 }
 0x313   : > { %2234 = vrcp.f32 %v654_v26  ;;  %1183 = vrot.lane.b32.xlu2 %v2699_v37, %s2285_s15  ;;  %v2950_v37 = vpop.permute.xlu2 %1351 }
 0x318   : > { %1242 = vrot.lane.b32.xlu1 %v2704_v57, %s2285_s15  ;;  %v1275_v57 = vmul.f32 %v2592_v12, %v972_v24 }
 0x319   : > { %v2235_v14 = vpop.eup %2234 }
 0x31a   : > { %v678_v7 = vmul.f32 %v2235_v14, %v2857_v40  ;;  %v1333_v40 = vmul.f32 %v2693_v21, %v2716_v5 }
 0x31b   : > { %1244 = vrot.lane.b32.xlu2 %v2725_v59, %s2285_s15  ;;  %v913_v59 = vmul.f32 %v2059_v9, %v2655_v48 }
 0x31c   : > { %v684_v55 = vpack.c.bf16 %v678_v7, %v677_v16 }
 0x31d   : > { %v923_v18 = vmul.f32 %v2489_v56, %v913_v59  ;;  %v1096_v56 = vmul.f32 %v2059_v9, %v2706_v10  ;;  %v3220_v9 = vld [vmem:[#allocation7_spill] sm:$0xff] }
 0x31e   : > { %2070 = vmatmul.msk.bf16.gmra.mxu0 %vm463_vm0, %v684_v55 }
 0x31f   : > { %v657_v25 = vpop.xlane.xlu1 %656  ;;  %v1106_v33 = vmul.f32 %v2552_v50, %v1096_v56  ;;  %v1225_v50 = vmul.f32 %v3219_v62, %v1215_v17 }
 0x320   : > { %1296 = vrot.lane.b32.xlu1 %v1275_v57, %s2285_s15  ;;  %2236 = vrcp.f32 %v657_v25  ;;  %v895_v25 = vmul.f32 %v2495_v61, %v3220_v9 }
 0x323   : > { %1353 = vrot.lane.b32.xlu2 %v1333_v40, %s2285_s15 }
 0x325   : > { %v660_v47 = vpop.xlane.xlu2 %659  ;;  %v1293_v8 = vpop.permute.xlu0 %1292 }
 0x326   : > { %2238 = vrcp.f32 %v660_v47  ;;  %v2237_v31 = vpop.eup %2236  ;;  %v2166_v47 = vld [vmem:[%s3186_s5 + $0x18] sm:$0xff] }
 0x327   : > { %v679_v48 = vmul.f32 %v2237_v31, %v2862_v22  ;;  %v1336_v22 = vmul.f32 %v2693_v21, %v1326_v43  ;;  %1528 = vmatpush.bf16.msrb.mxu3 %v2166_v47 }
 0x328   : > { %945 = vrot.lane.b32.xlu1 %v923_v18, %s2285_s15  ;;  %v3221_v18 = vld [vmem:[#allocation4_spill] sm:$0xff] }
 0x329   : > { %1359 = vrot.lane.b32.xlu0 %v1336_v22, %s2285_s15 }
 0x32b   : > { %947 = vrot.lane.b32.xlu2 %v924_v42, %s2285_s15  ;;  %v2165_v42 = vld [vmem:[%s3186_s5 + $0x10] sm:$0xff] }
 0x32c   : > { %v2239_v5 = vpop.eup %2238  ;;  %1529 = vmatpush.bf16.msrb.mxu3 %v2165_v42 }
 0x32d   : > { %v680_v30 = vmul.f32 %v2239_v5, %v2866_v0  ;;  %v1148_v0 = vld [vmem:[#allocation3 + $0x49] sm:$0xff]  ;;  %v942_v32 = vpop.permute.xlu0 %941 }
 0x32e   : > { %v1156_v51 = vmul.f32 %v2913_v36, %v1148_v0  ;;  %v1267_v36 = vld [vmem:[#allocation3 + $0x50] sm:$0xff]  ;;  %v1325_v27 = vmul.f32 %v2722_v19, %v1148_v0  ;;  %v961_v59 = vadd.f32 %v942_v32, %v895_v25 }
 0x32f   : > { %v685_v4 = vpack.c.bf16 %v680_v30, %v679_v48 }
 0x330   : > { %1005 = vrot.lane.b32.xlu1 %v982_v28, %s2285_s15  ;;  %v1166_v10 = vmul.f32 %v2564_v60, %v1156_v51  ;;  %v1277_v60 = vmul.f32 %v2592_v12, %v1267_v36  ;;  %v1335_v35 = vmul.f32 %v2693_v21, %v1325_v27  ;;  %v1385_v12 = vadd.f32 %v2780_v23, %v1371_v38 }
 0x331   : > { %2071 = vmatmul.msk.bf16.vlgmr.msra.gmra.mxu2 %vm463_vm0, %v685_v4  ;;  %v2164_v4 = vld [vmem:[%s3186_s5 + $0x8] sm:$0xff] }
 0x332   : > { %1530 = vmatpush.bf16.msrb.mxu3 %v2164_v4 }
 0x333   : > { %1069 = vrot.lane.b32.xlu2 %v2736_v2, %s2285_s15  ;;  %v1383_v2 = vadd.f32 %v2780_v23, %v2804_v41  ;;  %v1261_v41 = vadd.f32 %v2891_v44, %v2820_v45  ;;  %v1000_v44 = vpop.permute.xlu2 %999 }
 0x335   : > { %v1313_v13 = vadd.f32 %v1293_v8, %v1261_v41  ;;  %v1002_v11 = vpop.permute.xlu0 %1001 }
 0x336   : > { %1531 = vmatpush.bf16.msrb.mxu3 %v2163_v49 }
 0x337   : > { %v1372_v26 = vadd.f32 %v2950_v37, %v1313_v13  ;;  %v944_v45 = vpop.permute.xlu1 %943 }
 0x338   : > { %1128 = vrot.lane.b32.xlu1 %v1106_v33, %s2285_s15 }
 0x339   : > { %v1386_v19 = vadd.f32 %v2780_v23, %v1372_v26 }
 0x33b   : > { %1130 = vrot.lane.b32.xlu2 %v1107_v1, %s2285_s15 }
 0x33d   : > { %v1125_v15 = vpop.permute.xlu0 %1124 }
 0x340   : > { %1189 = vrot.lane.b32.xlu1 %v1166_v10, %s2285_s15 }
 0x343   : > { %1411 = vrot.lane.b32.xlu2 %v1383_v2, %s2285_s15 }
 0x345   : > { %v1186_v6 = vpop.permute.xlu0 %1185 }
 0x348   : > { %1246 = vrot.lane.b32.xlu1 %v1224_v58, %s2285_s15 }
 0x34b   : > { %1248 = vrot.lane.b32.xlu2 %v1225_v50, %s2285_s15 }
 0x34d   : > { %v1295_v37 = vpop.permute.xlu0 %1294 }
 0x350   : > { %1300 = vrot.lane.b32.xlu1 %v1277_v60, %s2285_s15 }
 0x353   : > { %1357 = vrot.lane.b32.xlu2 %v1335_v35, %s2285_s15 }
 0x355   : > { %v1356_v34 = vpop.permute.xlu0 %1355 }
 0x358   : > { %1415 = vrot.lane.b32.xlu1 %v1385_v12, %s2285_s15 }
 0x35b   : > { %1417 = vrot.lane.b32.xlu2 %v1386_v19, %s2285_s15  ;;  %v3222_v19 = vld [vmem:[#allocation5_spill] sm:$0xff] }
 0x35d   : > { %v1004_v63 = vpop.permute.xlu0 %1003 }
 0x362   : > { %v666_v21 = vpop.xlane.xlu1 %665 }
 0x363   : > { %2240 = vrcp.f32 %v666_v21 }
 0x365   : > { %v1072_v2 = vpop.permute.xlu0 %1071  ;;  %v1456_v27 = vpop.f32.mrf.mxu0 }
 0x366   : > { %v663_v14 = vpop.xlane.xlu2 %662 }
 0x367   : > { %2242 = vrcp.f32 %v663_v14  ;;  %v3223_v14 = vld [vmem:[#allocation6_spill] sm:$0xff] }
 0x369   : > { %v2241_v20 = vpop.eup %2240 }
 0x36a   : > { %v682_v55 = vmul.f32 %v2241_v20, %v2909_v46  ;;  %v1019_v46 = vadd.f32 %v1000_v44, %v961_v59 }
 0x36d   : > { %v2243_v16 = vpop.eup %2242  ;;  %v1188_v32 = vpop.permute.xlu0 %1187 }
 0x36e   : > { %v1068_v7 = vpop.permute.xlu2 %1067  ;;  %v681_v24 = vmul.f32 %v2243_v16, %v2918_v39  ;;  %v896_v39 = vmul.f32 %v2495_v61, %v3221_v18  ;;  %v1458_v38 = vpop.f32.mrf.mxu0 }
 0x370   : > { %v686_v54 = vpack.c.bf16 %v682_v55, %v681_v24  ;;  %v962_v31 = vadd.f32 %v944_v45, %v896_v39  ;;  %v897_v45 = vmul.f32 %v2495_v61, %v3222_v19 }
 0x372   : > { %2072 = vmatmul.msk.bf16.gmra.mxu2 %vm463_vm0, %v686_v54  ;;  %v1020_v30 = vadd.f32 %v1002_v11, %v962_v31 }
 0x374   : > { %v1086_v56 = vadd.f32 %v1068_v7, %v1020_v30 }
 0x375   : > { %v1414_v35 = vpop.permute.xlu0 %1413 }
 0x376   : > { %v1184_v57 = vpop.permute.xlu2 %1183  ;;  %v1459_v26 = vadd.f32 %v1458_v38, %v1414_v35 }
 0x37a   : > { %v1066_v40 = vpop.permute.xlu1 %1065 }
 0x37b   : > { %v1085_v5 = vadd.f32 %v1066_v40, %v1019_v46 }
 0x37d   : > { %v1144_v28 = vadd.f32 %v1125_v15, %v1085_v5  ;;  %v1299_v25 = vpop.permute.xlu0 %1298 }
 0x37e   : > { %v1245_v3 = vpop.permute.xlu2 %1244 }
 0x37f   : > { %v1203_v22 = vadd.f32 %v1184_v57, %v1144_v28 }
 0x382   : > { %v1127_v48 = vpop.permute.xlu1 %1126 }
 0x383   : > { %v1145_v29 = vadd.f32 %v1127_v48, %v1086_v56 }
 0x385   : > { %v1204_v1 = vadd.f32 %v1186_v6, %v1145_v29  ;;  %v898_v6 = vmul.f32 %v2495_v61, %v3223_v14 }
 0x386   : > { %v1354_v43 = vpop.permute.xlu2 %1353 }
 0x387   : > { %v1263_v53 = vadd.f32 %v1245_v3, %v1204_v1 }
 0x38a   : > { %v1243_v33 = vpop.permute.xlu1 %1242 }
 0x38b   : > { %v1262_v0 = vadd.f32 %v1243_v33, %v1203_v22 }
 0x38d   : > { %v1314_v51 = vadd.f32 %v1295_v37, %v1262_v0 }
 0x38e   : > { %v948_v10 = vpop.permute.xlu2 %947 }
 0x38f   : > { %v1373_v8 = vadd.f32 %v1354_v43, %v1314_v51  ;;  %v964_v16 = vadd.f32 %v948_v10, %v898_v6 }
 0x391   : > { %v1387_v52 = vadd.f32 %v2780_v23, %v1373_v8 }
 0x392   : > { %v1297_v17 = vpop.permute.xlu1 %1296 }
 0x393   : > { %v1315_v62 = vadd.f32 %v1297_v17, %v1263_v53  ;;  %1419 = vrot.lane.b32.xlu0 %v1387_v52, %s2285_s15  ;;  %v2168_v53 = vld [vmem:[%s3188_s7 + $0x8] sm:$0xff]  ;;  %v2167_v52 = vld [vmem:[%s3188_s7] sm:$0xff] }
 0x394   : > { %v391_v17 = vld [vmem:[%s2375_s12] sm:$0xff]  }
 0x395   : > { %v1374_v58 = vadd.f32 %v1356_v34, %v1315_v62 }
 0x396   : > { %v1070_v50 = vpop.permute.xlu2 %1069 }
 0x397   : > { %v1388_v36 = vadd.f32 %v2780_v23, %v1374_v58 }
 0x399   : > { %1421 = vrot.lane.b32.xlu1 %v1388_v36, %s2285_s15  ;;  %v400_v36 = vunpack.c.h.bf16 %v391_v17 }
 0x39a   : > { %v946_v60 = vpop.permute.xlu1 %945 }
 0x39b   : > { %v963_v21 = vadd.f32 %v946_v60, %v897_v45  ;;  %v1461_v46 = vpop.f32.mrf.mxu0  ;;  %v1360_v5 = vpop.permute.xlu0 %1359  ;;  %v3055_v60 = vld [vmem:[%s3187_s6] ss:$0 sm:$0xff] }
 0x39d   : > { %v1021_v20 = vadd.f32 %v1004_v63, %v963_v21 }
 0x39e   : > { %v1131_v41 = vpop.permute.xlu2 %1130 }
 0x39f   : > { %v1087_v55 = vadd.f32 %v1070_v50, %v1021_v20  ;;  %v399_v50 = vunpack.c.l.bf16 %v391_v17 }
 0x3a2   : > { %v1006_v13 = vpop.permute.xlu1 %1005 }
 0x3a3   : > { %v1022_v24 = vadd.f32 %v1006_v13, %v964_v16  ;;  %v1463_v63 = vpop.f32.mrf.mxu0 }
 0x3a5   : > { %v1088_v57 = vadd.f32 %v1072_v2, %v1022_v24  ;;  %v2169_v2 = vld [vmem:[%s3188_s7 + $0x10] sm:$0xff] }
 0x3a6   : > { %v1412_v11 = vpop.permute.xlu2 %1411 }
 0x3a7   : > { %v1457_v12 = vadd.f32 %v1456_v27, %v1412_v11  ;;  %v1147_v59 = vadd.f32 %v1131_v41, %v1088_v57 }
 0x3a9   : > { %v1476_v44 = vpack.c.bf16 %v1459_v26, %v1457_v12 }
 0x3aa   : > { %v1129_v15 = vpop.permute.xlu1 %1128 }
 0x3ab   : > { %2089 = vmatmul.msk.bf16.vlgmr.msrb.gmra.mxu3 %vm463_vm0, %v1476_v44  ;;  %v1146_v37 = vadd.f32 %v1129_v15, %v1087_v55  ;;  %v393_v15 = vld [vmem:[%s2375_s12 + $0x8] sm:$0xff]  }
 0x3ac   : > { %v401_v14 = vunpack.c.l.bf16 %v393_v15  ;;  %v402_v6 = vunpack.c.h.bf16 %v393_v15 }
 0x3ad   : > { %v1205_v9 = vadd.f32 %v1188_v32, %v1146_v37  ;;  %v395_v37 = vld [vmem:[%s2375_s12 + $0x10] sm:$0xff]  }
 0x3ae   : > { %v1249_v54 = vpop.permute.xlu2 %1248 }
 0x3b2   : > { %v1190_v7 = vpop.permute.xlu1 %1189 }
 0x3b3   : > { %v1206_v47 = vadd.f32 %v1190_v7, %v1147_v59 }
 0x3b4   : > { %v1466_v49 = vpop.f32.mrf.mxu2 }
 0x3b5   : > { %v1265_v42 = vadd.f32 %v1249_v54, %v1206_v47 }
 0x3b6   : > { %v1358_v18 = vpop.permute.xlu2 %1357 }
 0x3ba   : > { %v1247_v40 = vpop.permute.xlu1 %1246 }
 0x3bb   : > { %v1264_v34 = vadd.f32 %v1247_v40, %v1205_v9  ;;  %v403_v9 = vunpack.c.l.bf16 %v395_v37 }
 0x3bc   : > { %v1468_v0 = vpop.f32.mrf.mxu2 }
 0x3bd   : > { %v1316_v3 = vadd.f32 %v1299_v25, %v1264_v34  ;;  %v404_v25 = vunpack.c.h.bf16 %v395_v37 }
 0x3be   : > { %v1418_v4 = vpop.permute.xlu2 %1417 }
 0x3bf   : > { %v1375_v39 = vadd.f32 %v1358_v18, %v1316_v3  ;;  %v1464_v56 = vadd.f32 %v1463_v63, %v1418_v4  ;;  %v2173_v4 = vld [vmem:[%s3190_s9 + $0x10] sm:$0xff]  ;;  %v2172_v63 = vld [vmem:[%s3190_s9 + $0x8] sm:$0xff] }
 0x3c1   : > { %v1389_v61 = vadd.f32 %v2780_v23, %v1375_v39  ;;  %v2178_v39 = vld [vmem:[%s3190_s9 + $0x38] sm:$0xff] }
 0x3c2   : > { %v1301_v31 = vpop.permute.xlu1 %1300  ;;  %1882 = vmatpush.bf16.msrb.mxu2 %v2178_v39 }
 0x3c3   : > { %v1317_v48 = vadd.f32 %v1301_v31, %v1265_v42  ;;  %1423 = vrot.lane.b32.xlu2 %v1389_v61, %s2285_s15  ;;  %v2176_v42 = vld [vmem:[%s3190_s9 + $0x28] sm:$0xff]  ;;  %v2175_v61 = vld [vmem:[%s3190_s9 + $0x20] sm:$0xff] }
 0x3c4   : > { %v3102_v31 = vld [vmem:[%s3189_s8] ss:$0 sm:$0xff] }
 0x3c5   : > { %v1376_v30 = vadd.f32 %v1360_v5, %v1317_v48  ;;  %v2174_v5 = vld [vmem:[%s3190_s9 + $0x18] sm:$0xff] }
 0x3c7   : > { %v1390_v28 = vadd.f32 %v2780_v23, %v1376_v30  ;;  %v2170_v23 = vld [vmem:[%s3188_s7 + $0x18] sm:$0xff] }
 0x3c8   : > { %1629 = vmatpush.bf16.msrb.mxu0 %v2170_v23 }
 0x3c9   : > { %1425 = vrot.lane.b32.xlu0 %v1390_v28, %s2285_s15 }
 0x3ca   : > { %v1416_v43 = vpop.permute.xlu1 %1415 }
 0x3cb   : > { %v1462_v29 = vadd.f32 %v1461_v46, %v1416_v43  ;;  %v2177_v46 = vld [vmem:[%s3190_s9 + $0x30] sm:$0xff] }
 0x3cc   : > { %1630 = vmatpush.bf16.msrb.mxu0 %v2169_v2  ;;  %1883 = vmatpush.bf16.msrb.mxu2 %v2177_v46 }
 0x3cd   : > { %v1477_v22 = vpack.c.bf16 %v1464_v56, %v1462_v29 }
 0x3cf   : > { %2090 = vmatmul.msk.bf16.gmra.mxu3 %vm463_vm0, %v1477_v22  ;;  %v397_v22 = vld [vmem:[%s2375_s12 + $0x18] sm:$0xff]  }
 0x3d0   : > { %1631 = vmatpush.bf16.msrb.mxu0 %v2168_v53  ;;  %1884 = vmatpush.bf16.msrb.mxu2 %v2176_v42 }
 0x3d4   : > { %1632 = vmatpush.bf16.msrb.mxu0 %v2167_v52  ;;  %1885 = vmatpush.bf16.msrb.mxu2 %v2175_v61 }
 0x3d8   : > { %1886 = vmatpush.bf16.msrb.mxu2 %v2174_v5 }
 0x3dc   : > { %1887 = vmatpush.bf16.msrb.mxu2 %v2173_v4 }
 0x3e0   : > { %1888 = vmatpush.bf16.msrb.mxu2 %v2172_v63 }
 0x3f5   : > { %v1471_v58 = vpop.f32.mrf.mxu2 }
 0x3fd   : > { %v1473_v11 = vpop.f32.mrf.mxu2 }
 0x405   : > { %v1420_v33 = vpop.permute.xlu0 %1419 }
 0x406   : > { %v1467_v51 = vadd.f32 %v1466_v49, %v1420_v33 }
 0x40b   : > { %v1422_v1 = vpop.permute.xlu1 %1421 }
 0x40c   : > { %v1469_v10 = vadd.f32 %v1468_v0, %v1422_v1  ;;  %v2171_v0 = vld [vmem:[%s3190_s9] sm:$0xff] }
 0x40d   : > { %1889 = vmatpush.bf16.msrb.mxu2 %v2171_v0 }
 0x40e   : > { %v1478_v8 = vpack.c.bf16 %v1469_v10, %v1467_v51  ;;  %v405_v51 = vunpack.c.l.bf16 %v397_v22  ;;  %v406_v10 = vunpack.c.h.bf16 %v397_v22 }
 0x410   : > { %2091 = vmatmul.msk.bf16.gmra.mxu3 %vm463_vm0, %v1478_v8 }
 0x41d   : > { %v1424_v13 = vpop.permute.xlu2 %1423 }
 0x41e   : > { %v1472_v19 = vadd.f32 %v1471_v58, %v1424_v13 }
 0x42e   : > { %v1533_v62 = vpop.f32.mrf.mxu3 }
 0x42f   : > { %v1553_v32 = vadd.f32 %v1533_v62, %v399_v50 }
 0x431   : > { %v3058_v35 = vadd.f32 %v3055_v60, %v1553_v32 }
 0x436   : > { %v1535_v27 = vpop.f32.mrf.mxu3 }
 0x437   : > { %v1554_v41 = vadd.f32 %v1535_v27, %v400_v36 }
 0x439   : > { %v3061_v38 = vadd.f32 %v3055_v60, %v1554_v41 }
 0x43b   : > { %v1573_v26 = vpack.c.bf16 %v3061_v38, %v3058_v35  ;;  %v1426_v12 = vpop.permute.xlu0 %1425 }
 0x43c   : > { %v1474_v45 = vadd.f32 %v1473_v11, %v1426_v12 }
 0x43d   : > { %2109 = vmatmul.msk.bf16.vlgmr.msrb.gmra.mxu0 %vm463_vm0, %v1573_v26 }
 0x43e   : > { %v1479_v44 = vpack.c.bf16 %v1474_v45, %v1472_v19 }
 0x440   : > { %2092 = vmatmul.msk.bf16.gmra.mxu3 %vm463_vm0, %v1479_v44 }
 0x452   : > { %v1538_v21 = vpop.f32.mrf.mxu3 }
 0x453   : > { %v1555_v20 = vadd.f32 %v1538_v21, %v401_v14 }
 0x455   : > { %v3069_v24 = vadd.f32 %v3055_v60, %v1555_v20 }
 0x45a   : > { %v1540_v16 = vpop.f32.mrf.mxu3 }
 0x45b   : > { %v1556_v7 = vadd.f32 %v1540_v16, %v402_v6 }
 0x45d   : > { %v3072_v55 = vadd.f32 %v3055_v60, %v1556_v7 }
 0x45f   : > { %v1574_v54 = vpack.c.bf16 %v3072_v55, %v3069_v24 }
 0x461   : > { %2110 = vmatmul.msk.bf16.gmra.mxu0 %vm463_vm0, %v1574_v54 }
 0x493   : > { %v1543_v57 = vpop.f32.mrf.mxu3 }
 0x494   : > { %v1557_v40 = vadd.f32 %v1543_v57, %v403_v9 }
 0x496   : > { %v3079_v47 = vadd.f32 %v3055_v60, %v1557_v40 }
 0x49b   : > { %v1545_v59 = vpop.f32.mrf.mxu3 }
 0x49c   : > { %v1558_v34 = vadd.f32 %v1545_v59, %v404_v25 }
 0x49e   : > { %v3082_v3 = vadd.f32 %v3055_v60, %v1558_v34 }
 0x4a0   : > { %v1575_v18 = vpack.c.bf16 %v3082_v3, %v3079_v47 }
 0x4a2   : > { %2111 = vmatmul.msk.bf16.gmra.mxu0 %vm463_vm0, %v1575_v18 }
 0x4ba   : > { %v1634_v48 = vpop.f32.mrf.mxu0 }
 0x4bb   : > { %v1635_v30 = vadd.f32 %v3102_v31, %v1634_v48 }
 0x4bd   : > { %v2113_v28 = vmul.f32 -1.442695, %v1635_v30 }
 0x4bf   : > { %2244 = vpow2.f32 %v2113_v28 }
 0x4c2   : > { %v1636_v43 = vpop.f32.mrf.mxu0 }
 0x4c3   : > { %v1637_v56 = vadd.f32 %v3102_v31, %v1636_v43  ;;  %v1548_v29 = vpop.f32.mrf.mxu3 }
 0x4c4   : > { %v1559_v8 = vadd.f32 %v1548_v29, %v405_v51 }
 0x4c5   : > { %v2245_v49 = vpop.eup %2244  ;;  %v2114_v33 = vmul.f32 -1.442695, %v1637_v56 }
 0x4c6   : > { %v1678_v1 = vadd.f32 1.0, %v2245_v49  ;;  %v3123_v50 = vadd.f32 %v3055_v60, %v1559_v8 }
 0x4c7   : > { %2246 = vpow2.f32 %v2114_v33 }
 0x4c8   : > { %2248 = vrcp.f32 %v1678_v1  ;;  %v1697_v26 = vand.u32 2147483648, %v1678_v1  ;;  %vm1691_vm5 = vweird.f32 %v1678_v1  ;;  %v1695_v12 = vand.u32 2147483647, %v1678_v1 }
 0x4ca   : > { %v1698_v21 = vor.u32 1.1754944e-38, %v1697_v26  ;;  %vm1696_vm8 = vcmp.eq.f32.partialorder %v1695_v12, 8.507059e+37 }
 0x4cb   : > { %v1550_v23 = vpop.f32.mrf.mxu3 }
 0x4cc   : > { %v1560_v2 = vadd.f32 %v1550_v23, %v406_v10 }
 0x4cd   : > { %v2247_v53 = vpop.eup %2246 }
 0x4ce   : > { %v2249_v52 = vpop.eup %2248  ;;  %v1679_v17 = vadd.f32 1.0, %v2247_v53  ;;  %v3120_v62 = vadd.f32 %v3055_v60, %v1560_v2 }
 0x4cf   : > { %v1687_v58 = vmul.f32 %v2249_v52, %v1678_v1  ;;  %vm1692_vm4 = vweird.f32 %v2249_v52 }
 0x4d0   : > { %2250 = vrcp.f32 %v1679_v17  ;;  %v1576_v32 = vpack.c.bf16 %v3120_v62, %v3123_v50  ;;  %vm1693_vm6 = vmor %vm1691_vm5, %vm1692_vm4  ;;  %v1712_v45 = vand.u32 2147483648, %v1679_v17  ;;  %v1710_v15 = vand.u32 2147483647, %v1679_v17 }
 0x4d1   : > { %v1688_v36 = vsub.f32 1.0, %v1687_v58  ;;  %vm1706_vm9 = vweird.f32 %v1679_v17 }
 0x4d2   : > { %2112 = vmatmul.msk.bf16.gmra.mxu0 %vm463_vm0, %v1576_v32  ;;  %v1713_v20 = vor.u32 1.1754944e-38, %v1712_v45  ;;  %vm1711_vm10 = vcmp.eq.f32.partialorder %v1710_v15, 8.507059e+37 }
 0x4d3   : > { %v1689_v27 = vmul.f32 %v2249_v52, %v1688_v36 }
 0x4d5   : > { %v1690_v13 = vadd.f32 %v2249_v52, %v1689_v27 }
 0x4d6   : > { %v2251_v41 = vpop.eup %2250 }
 0x4d7   : > { %v1702_v11 = vmul.f32 %v2251_v41, %v1679_v17  ;;  %v1694_v60 = vsel %vm1693_vm6, %v2249_v52, %v1690_v13  ;;  %vm1707_vm7 = vweird.f32 %v2251_v41 }
 0x4d8   : > { %v1699_v6 = vsel %vm1696_vm8, %v1698_v21, %v1694_v60  ;;  %vm1708_vm0 = vmor %vm1706_vm9, %vm1707_vm7 }
 0x4d9   : > { %v1703_v19 = vsub.f32 1.0, %v1702_v11  ;;  %v1806_v57 = vmul.f32 %v1699_v6, %v1635_v30 }
 0x4db   : > { %v1704_v44 = vmul.f32 %v2251_v41, %v1703_v19 }
 0x4dd   : > { %v1705_v14 = vadd.f32 %v2251_v41, %v1704_v44 }
 0x4de   : > { %v1639_v16 = vpop.f32.mrf.mxu0 }
 0x4df   : > { %v1709_v7 = vsel %vm1708_vm0, %v2251_v41, %v1705_v14  ;;  %v1640_v54 = vadd.f32 %v3102_v31, %v1639_v16 }
 0x4e0   : > { %v1714_v37 = vsel %vm1711_vm10, %v1713_v20, %v1709_v7 }
 0x4e1   : > { %v1807_v9 = vmul.f32 %v1714_v37, %v1637_v56  ;;  %v2115_v25 = vmul.f32 -1.442695, %v1640_v54 }
 0x4e3   : > { %2252 = vpow2.f32 %v2115_v25  ;;  %v1814_v40 = vpack.c.bf16 %v1807_v9, %v1806_v57 }
 0x4e5   : > { %1890 = vmatmul.bf16.vlgmr.msrb.gmra.mxu2 %v1814_v40 }
 0x4e6   : > { %v1641_v59 = vpop.f32.mrf.mxu0 }
 0x4e7   : > { %v1642_v34 = vadd.f32 %v3102_v31, %v1641_v59 }
 0x4e9   : > { %v2253_v18 = vpop.eup %2252  ;;  %v2116_v39 = vmul.f32 -1.442695, %v1642_v34 }
 0x4ea   : > { %v1680_v46 = vadd.f32 1.0, %v2253_v18 }
 0x4eb   : > { %2254 = vpow2.f32 %v2116_v39 }
 0x4ec   : > { %2256 = vrcp.f32 %v1680_v46  ;;  %v1727_v56 = vand.u32 2147483648, %v1680_v46  ;;  %vm1721_vm12 = vweird.f32 %v1680_v46  ;;  %v1725_v29 = vand.u32 2147483647, %v1680_v46 }
 0x4ee   : > { %v1728_v51 = vor.u32 1.1754944e-38, %v1727_v56  ;;  %vm1726_vm15 = vcmp.eq.f32.partialorder %v1725_v29, 8.507059e+37 }
 0x4f1   : > { %v2255_v42 = vpop.eup %2254 }
 0x4f2   : > { %v2257_v61 = vpop.eup %2256  ;;  %v1681_v5 = vadd.f32 1.0, %v2255_v42 }
 0x4f3   : > { %v1717_v48 = vmul.f32 %v2257_v61, %v1680_v46  ;;  %vm1722_vm11 = vweird.f32 %v2257_v61 }
 0x4f4   : > { %2258 = vrcp.f32 %v1681_v5  ;;  %vm1723_vm13 = vmor %vm1721_vm12, %vm1722_vm11  ;;  %v1742_v49 = vand.u32 2147483648, %v1681_v5  ;;  %v1740_v1 = vand.u32 2147483647, %v1681_v5  ;;  %vm1736_vm1 = vweird.f32 %v1681_v5 }
 0x4f5   : > { %v1718_v28 = vsub.f32 1.0, %v1717_v48  ;;  %vm1939_vm11 = vcmask 519168  }
 0x4f6   : > { %v1743_v23 = vor.u32 1.1754944e-38, %v1742_v49  ;;  %vm1741_vm3 = vcmp.eq.f32.partialorder %v1740_v1, 8.507059e+37 }
 0x4f7   : > { %v1719_v30 = vmul.f32 %v2257_v61, %v1718_v28 }
 0x4f9   : > { %v1720_v63 = vadd.f32 %v2257_v61, %v1719_v30 }
 0x4fa   : > { %v2259_v4 = vpop.eup %2258 }
 0x4fb   : > { %v1732_v43 = vmul.f32 %v2259_v4, %v1681_v5  ;;  %v1724_v33 = vsel %vm1723_vm13, %v2257_v61, %v1720_v63  ;;  %vm1737_vm14 = vweird.f32 %v2259_v4 }
 0x4fc   : > { %v1729_v8 = vsel %vm1726_vm15, %v1728_v51, %v1724_v33  ;;  %vm1738_vm2 = vmor %vm1736_vm1, %vm1737_vm14  ;;  %v3137_v51 = vld [vmem:[%s3191_s10] ss:$0 sm:$0xff] }
 0x4fd   : > { %v1733_v22 = vsub.f32 1.0, %v1732_v43  ;;  %v1808_v52 = vmul.f32 %v1729_v8, %v1640_v54 }
 0x4ff   : > { %v1734_v0 = vmul.f32 %v2259_v4, %v1733_v22 }
 0x501   : > { %v1735_v10 = vadd.f32 %v2259_v4, %v1734_v0 }
 0x503   : > { %v1739_v2 = vsel %vm1738_vm2, %v2259_v4, %v1735_v10 }
 0x504   : > { %v1744_v53 = vsel %vm1741_vm3, %v1743_v23, %v1739_v2 }
 0x505   : > { %v1809_v17 = vmul.f32 %v1744_v53, %v1642_v34 }
 0x507   : > { %v1815_v58 = vpack.c.bf16 %v1809_v17, %v1808_v52 }
 0x509   : > { %1895 = vmatmul.bf16.gmra.mxu2 %v1815_v58 }
 0x51f   : > { %v1644_v36 = vpop.f32.mrf.mxu0 }
 0x520   : > { %v1645_v32 = vadd.f32 %v3102_v31, %v1644_v36 }
 0x522   : > { %v2117_v27 = vmul.f32 -1.442695, %v1645_v32 }
 0x524   : > { %2260 = vpow2.f32 %v2117_v27 }
 0x527   : > { %v1646_v41 = vpop.f32.mrf.mxu0 }
 0x528   : > { %v1647_v13 = vadd.f32 %v3102_v31, %v1646_v41 }
 0x52a   : > { %v2261_v11 = vpop.eup %2260  ;;  %v2118_v26 = vmul.f32 -1.442695, %v1647_v13 }
 0x52b   : > { %v1682_v12 = vadd.f32 1.0, %v2261_v11 }
 0x52c   : > { %2262 = vpow2.f32 %v2118_v26 }
 0x52d   : > { %2264 = vrcp.f32 %v1682_v12  ;;  %v1757_v16 = vand.u32 2147483648, %v1682_v12  ;;  %vm1751_vm5 = vweird.f32 %v1682_v12  ;;  %v1755_v7 = vand.u32 2147483647, %v1682_v12 }
 0x52f   : > { %v1758_v40 = vor.u32 1.1754944e-38, %v1757_v16  ;;  %vm1756_vm8 = vcmp.eq.f32.partialorder %v1755_v7, 8.507059e+37 }
 0x532   : > { %v2263_v19 = vpop.eup %2262 }
 0x533   : > { %v2265_v45 = vpop.eup %2264  ;;  %v1683_v60 = vadd.f32 1.0, %v2263_v19 }
 0x534   : > { %v1747_v44 = vmul.f32 %v2265_v45, %v1682_v12  ;;  %vm1752_vm4 = vweird.f32 %v2265_v45 }
 0x535   : > { %2266 = vrcp.f32 %v1683_v60  ;;  %vm1753_vm6 = vmor %vm1751_vm5, %vm1752_vm4  ;;  %v1772_v37 = vand.u32 2147483648, %v1683_v60  ;;  %v1770_v25 = vand.u32 2147483647, %v1683_v60  ;;  %vm1766_vm9 = vweird.f32 %v1683_v60 }
 0x536   : > { %v1748_v15 = vsub.f32 1.0, %v1747_v44 }
 0x537   : > { %v1773_v18 = vor.u32 1.1754944e-38, %v1772_v37  ;;  %vm1771_vm10 = vcmp.eq.f32.partialorder %v1770_v25, 8.507059e+37 }
 0x538   : > { %v1749_v21 = vmul.f32 %v2265_v45, %v1748_v15 }
 0x53a   : > { %v1750_v6 = vadd.f32 %v2265_v45, %v1749_v21 }
 0x53b   : > { %v2267_v14 = vpop.eup %2266 }
 0x53c   : > { %v1762_v20 = vmul.f32 %v2267_v14, %v1683_v60  ;;  %v1754_v57 = vsel %vm1753_vm6, %v2265_v45, %v1750_v6  ;;  %vm1767_vm7 = vweird.f32 %v2267_v14 }
 0x53d   : > { %v1759_v34 = vsel %vm1756_vm8, %v1758_v40, %v1754_v57  ;;  %vm1768_vm0 = vmor %vm1766_vm9, %vm1767_vm7 }
 0x53e   : > { %v1763_v54 = vsub.f32 1.0, %v1762_v20  ;;  %v1810_v42 = vmul.f32 %v1759_v34, %v1645_v32 }
 0x540   : > { %v1764_v9 = vmul.f32 %v2267_v14, %v1763_v54 }
 0x542   : > { %v1765_v59 = vadd.f32 %v2267_v14, %v1764_v9 }
 0x544   : > { %v1769_v39 = vsel %vm1768_vm0, %v2267_v14, %v1765_v59 }
 0x545   : > { %v1774_v46 = vsel %vm1771_vm10, %v1773_v18, %v1769_v39 }
 0x546   : > { %v1811_v61 = vmul.f32 %v1774_v46, %v1647_v13 }
 0x548   : > { %v1816_v5 = vpack.c.bf16 %v1811_v61, %v1810_v42 }
 0x54a   : > { %1900 = vmatmul.bf16.gmra.mxu2 %v1816_v5 }
 0x54f   : > { %v1649_v48 = vpop.f32.mrf.mxu0 }
 0x550   : > { %v1650_v28 = vadd.f32 %v3102_v31, %v1649_v48 }
 0x552   : > { %v2119_v30 = vmul.f32 -1.442695, %v1650_v28 }
 0x554   : > { %2268 = vpow2.f32 %v2119_v30 }
 0x557   : > { %v1651_v4 = vpop.f32.mrf.mxu0 }
 0x558   : > { %v1652_v63 = vadd.f32 %v3102_v31, %v1651_v4 }
 0x55a   : > { %v2269_v43 = vpop.eup %2268  ;;  %v2120_v56 = vmul.f32 -1.442695, %v1652_v63 }
 0x55b   : > { %v1684_v29 = vadd.f32 1.0, %v2269_v43 }
 0x55c   : > { %2270 = vpow2.f32 %v2120_v56 }
 0x55d   : > { %2272 = vrcp.f32 %v1684_v29  ;;  %v1787_v58 = vand.u32 2147483648, %v1684_v29  ;;  %vm1781_vm13 = vweird.f32 %v1684_v29  ;;  %v1785_v36 = vand.u32 2147483647, %v1684_v29 }
 0x55f   : > { %v1788_v12 = vor.u32 1.1754944e-38, %v1787_v58  ;;  %vm1786_vm1 = vcmp.eq.f32.partialorder %v1785_v36, 8.507059e+37 }
 0x562   : > { %v2271_v22 = vpop.eup %2270 }
 0x563   : > { %v2273_v49 = vpop.eup %2272  ;;  %v1685_v33 = vadd.f32 1.0, %v2271_v22 }
 0x564   : > { %v1777_v0 = vmul.f32 %v2273_v49, %v1684_v29  ;;  %vm1782_vm12 = vweird.f32 %v2273_v49 }
 0x565   : > { %2274 = vrcp.f32 %v1685_v33  ;;  %vm1783_vm14 = vmor %vm1781_vm13, %vm1782_vm12  ;;  %v1802_v27 = vand.u32 2147483648, %v1685_v33  ;;  %vm1796_vm2 = vweird.f32 %v1685_v33 }
 0x566   : > { %v1778_v1 = vsub.f32 1.0, %v1777_v0 }
 0x567   : > { %v1803_v44 = vor.u32 1.1754944e-38, %v1802_v27 }
 0x568   : > { %v1891_v10 = vpop.f32.mrf.mxu2  ;;  %v1779_v8 = vmul.f32 %v2273_v49, %v1778_v1 }
 0x569   : > { %v1911_v31 = vadd.f32 %v1891_v10, %v3058_v35  ;;  %v1800_v35 = vand.u32 2147483647, %v1685_v33 }
 0x56a   : > { %v1780_v53 = vadd.f32 %v2273_v49, %v1779_v8 }
 0x56b   : > { %v1923_v23 = vadd.f32 %v3137_v51, %v1911_v31  ;;  %v2275_v2 = vpop.eup %2274  ;;  %vm1801_vm4 = vcmp.eq.f32.partialorder %v1800_v35, 8.507059e+37 }
 0x56c   : > { %v1792_v52 = vmul.f32 %v2275_v2, %v1685_v33  ;;  %v1784_v13 = vsel %vm1783_vm14, %v2273_v49, %v1780_v53  ;;  %vm1797_vm15 = vweird.f32 %v2275_v2 }
 0x56d   : > { %v1931_v17 = vpack.c.bf16 %v1923_v23, %v1923_v23  ;;  %v1789_v60 = vsel %vm1786_vm1, %v1788_v12, %v1784_v13  ;;  %vm1798_vm3 = vmor %vm1796_vm2, %vm1797_vm15 }
 0x56e   : > { %v1793_v32 = vsub.f32 1.0, %v1792_v52  ;;  %v1812_v6 = vmul.f32 %v1789_v60, %v1650_v28 }
 0x56f   : > { %1940 = vst.msk [vmem:[%s3146_s19] sm:$0xf] %vm1939_vm11, %v1931_v17 }
 0x570   : > { %v1893_v41 = vpop.f32.mrf.mxu2  ;;  %v1794_v11 = vmul.f32 %v2275_v2, %v1793_v32 }
 0x571   : > { %v1912_v26 = vadd.f32 %v1893_v41, %v3061_v38 }
 0x572   : > { %v1795_v19 = vadd.f32 %v2275_v2, %v1794_v11 }
 0x573   : > { %v1924_v45 = vadd.f32 %v3137_v51, %v1912_v26 }
 0x574   : > { %v1799_v15 = vsel %vm1798_vm3, %v2275_v2, %v1795_v19 }
 0x575   : > { %v1932_v21 = vpack.c.bf16 %v1924_v45, %v1924_v45  ;;  %v1804_v14 = vsel %vm1801_vm4, %v1803_v44, %v1799_v15 }
 0x576   : > { %v1813_v20 = vmul.f32 %v1804_v14, %v1652_v63 }
 0x577   : > { %1941 = vst.msk [vmem:[%s3146_s19 + $0x4] sm:$0xf] %vm1939_vm11, %v1932_v21 }
 0x578   : > { %v1817_v38 = vpack.c.bf16 %v1813_v20, %v1812_v6 }
 0x57a   : > { %1905 = vmatmul.bf16.gmra.mxu2 %v1817_v38 }
 0x58c   : > { %v1896_v16 = vpop.f32.mrf.mxu2 }
 0x58d   : > { %v1913_v7 = vadd.f32 %v1896_v16, %v3069_v24 }
 0x58f   : > { %v1925_v54 = vadd.f32 %v3137_v51, %v1913_v7 }
 0x591   : > { %v1933_v37 = vpack.c.bf16 %v1925_v54, %v1925_v54 }
 0x593   : > { %1942 = vst.msk [vmem:[%s3146_s19 + $0x8] sm:$0xf] %vm1939_vm11, %v1933_v37 }
 0x594   : > { %v1898_v57 = vpop.f32.mrf.mxu2 }
 0x595   : > { %v1914_v9 = vadd.f32 %v1898_v57, %v3072_v55 }
 0x597   : > { %v1926_v25 = vadd.f32 %v3137_v51, %v1914_v9 }
 0x599   : > { %v1934_v40 = vpack.c.bf16 %v1926_v25, %v1926_v25 }
 0x59b   : > { %1943 = vst.msk [vmem:[%s3146_s19 + $0xc] sm:$0xf] %vm1939_vm11, %v1934_v40 }
 0x5cd   : > { %v1901_v59 = vpop.f32.mrf.mxu2 }
 0x5ce   : > { %v1915_v34 = vadd.f32 %v1901_v59, %v3079_v47 }
 0x5d0   : > { %v1927_v24 = vadd.f32 %v3137_v51, %v1915_v34 }
 0x5d2   : > { %v1935_v18 = vpack.c.bf16 %v1927_v24, %v1927_v24 }
 0x5d4   : > { %1944 = vst.msk [vmem:[%s3146_s19 + $0x10] sm:$0xf] %vm1939_vm11, %v1935_v18 }
 0x5d5   : > { %v1903_v39 = vpop.f32.mrf.mxu2 }
 0x5d6   : > { %v1916_v46 = vadd.f32 %v1903_v39, %v3082_v3 }
 0x5d8   : > { %v1928_v55 = vadd.f32 %v3137_v51, %v1916_v46 }
 0x5da   : > { %v1936_v42 = vpack.c.bf16 %v1928_v55, %v1928_v55 }
 0x5dc   : > { %1945 = vst.msk [vmem:[%s3146_s19 + $0x14] sm:$0xf] %vm1939_vm11, %v1936_v42 }
 0x5fd   : > { %v1906_v61 = vpop.f32.mrf.mxu2 }
 0x5fe   : > { %v1917_v5 = vadd.f32 %v1906_v61, %v3123_v50 }
 0x600   : > { %v1929_v48 = vadd.f32 %v3137_v51, %v1917_v5 }
 0x602   : > { %v1937_v47 = vpack.c.bf16 %v1929_v48, %v1929_v48 }
 0x604   : > { %1946 = vst.msk [vmem:[%s3146_s19 + $0x18] sm:$0xf] %vm1939_vm11, %v1937_v47 }
 0x605   : > { %v1908_v28 = vpop.f32.mrf.mxu2 }
 0x606   : > { %v1918_v30 = vadd.f32 %v1908_v28, %v3120_v62 }
 0x608   : > { %v1930_v4 = vadd.f32 %v3137_v51, %v1918_v30 }
 0x60a   : > { %v1938_v63 = vpack.c.bf16 %v1930_v4, %v1930_v4 }
 0x60c   : > { %1947 = vst.msk [vmem:[%s3146_s19 + $0x1c] sm:$0xf] %vm1939_vm11, %v1938_v63 }
 0x60d PF: > { %s21_s17 = sadd.s32 1, %s2282_s17  }
 0x60e   : > { %p18_p4 = scmp.ge.s32.totalorder %s21_s17, 4  }
 0x610   :  { %20 = sbr.rel (!%p18_p4) target bundleno = 1 (0x1), region = 94 }

</bundles_post_ra>
